<compile_context>
chip_gen: v6e
topology: v6e:2x2x1
jax: 0.10.0
libtpu: 0.0.40
codegen_flags: <defaults>
</compile_context>

<pallas_src>
import jax
import jax.numpy as jnp
from jax.experimental import pallas as pl
from jax.experimental.pallas import tpu as pltpu

_SQRT1_2 = 0.7071067811865476


def _round_up(x, m):
    return ((x + m - 1) // m) * m


# ----------------------------------------------------------------------------- kernel

def _mlp_kernel(x_ref, w1_ref, b1_ref, w2_ref, b2_ref, o_ref, acc_ref):
    """One (TILE_N, C_in) row tile x one hidden-dim tile of the fused FFN.

    grid = (row_tiles, hidden_tiles). The hidden axis is the fc2 reduction,
    accumulated in an f32 VMEM scratch and finalized on the last hidden step.
    Matmuls take bf16 operands and accumulate in f32 on the MXU; GELU is the
    exact (erf) formulation matching torch.nn.GELU.
    """
    j = pl.program_id(1)

    @pl.when(j == 0)
    def _():
        acc_ref[...] = jnp.zeros_like(acc_ref)

    x = x_ref[...].astype(jnp.bfloat16)
    # fc1 (hidden slice) + bias, f32 accumulate.
    h = jnp.dot(x, w1_ref[...], preferred_element_type=jnp.float32) + b1_ref[0, :]
    # Exact GELU in f32 (elementwise per hidden unit, so hidden tiling is safe).
    h = 0.5 * h * (1.0 + jax.lax.erf(h * _SQRT1_2))
    # fc2 partial product, accumulated over hidden tiles.
    acc_ref[...] += jnp.dot(h.astype(jnp.bfloat16), w2_ref[...],
                            preferred_element_type=jnp.float32)

    @pl.when(j == pl.num_programs(1) - 1)
    def _():
        o_ref[...] = (acc_ref[...] + b2_ref[0, :]).astype(o_ref.dtype)


# ----------------------------------------------------------------------------- sizing

def _vmem_budget_bytes():
    """3/4 of physical VMEM (v7x: ~48 MiB, v5e/v6e: 96 MiB), capped at 96 MiB."""
    try:
        cap = pltpu.get_tpu_info().vmem_capacity_bytes
    except Exception:
        cap = 64 * 1024 * 1024  # conservative (v7x) fallback
    return int(min((cap * 3) // 4, 96 * 1024 * 1024))


def _vmem_estimate(tn, th, c_in, c_out, x_bytes, o_bytes):
    wgt = 2 * 2 * (c_in * th + th * c_out)   # bf16 weights, double-buffered
    bias = 2 * 4 * (th + c_out)
    xin = 2 * tn * c_in * x_bytes            # x tile, double-buffered
    out = 2 * tn * c_out * o_bytes
    acc = 4 * tn * c_out                     # f32 accumulator scratch
    mid = 4 * tn * th                        # (tn, th) f32 intermediate
    return wgt + bias + xin + out + acc + mid


# ----------------------------------------------------------------------------- wrapper

def mlp_pallas(x, w1, b1, w2, b2, *, ffn_drop=0.0, tile_n=512):
    """Fused FFN: x @ w1 + b1 -> GELU -> @ w2 + b2 (dropout identity at p=0).

    x:  (..., C_in)   f32 or bf16 (I/O dtype preserved; bf16 halves HBM traffic)
    w1: (C_in, hidden), b1: (hidden,)
    w2: (hidden, C_out), b2: (C_out,)
    """
    if ffn_drop != 0.0:
        # TODO(synk): training-mode dropout (ffn_drop > 0) is not implemented.
        raise NotImplementedError("mlp_pallas only supports ffn_drop == 0.0")

    orig_shape = x.shape
    c_in = orig_shape[-1]
    hidden = w1.shape[1]
    c_out = w2.shape[1]

    x2d = x.reshape(-1, c_in)
    n = x2d.shape[0]
    x_bytes = x2d.dtype.itemsize
    o_bytes = x_bytes

    # Row tile: multiple of 16 (legal sublane tiling for both bf16 and f32).
    # For n > tile_n the grid automatically has >= 2 row steps (v7x megacore).
    tn = min(tile_n, _round_up(n, 16))
    n_pad = _round_up(n, tn)
    grid_rows = n_pad // tn

    budget = _vmem_budget_bytes()

    # Hidden tile: weights fully resident when they fit the budget, otherwise
    # split the hidden dim (128-multiple divisors) and accumulate in f32 scratch.
    th = hidden
    while _vmem_estimate(tn, th, c_in, c_out, x_bytes, o_bytes) > budget:
        nxt = th // 2
        if nxt < 128 or nxt % 128 != 0 or hidden % nxt != 0:
            break
        th = nxt
    grid_h = hidden // th
    grid = (grid_rows, grid_h)

    if n_pad != n:
        x2d = jnp.pad(x2d, ((0, n_pad - n), (0, 0)))

    # Weights as bf16 (MXU-native, half the broadcast DMA); biases f32.
    w1b = w1.astype(jnp.bfloat16)
    w2b = w2.astype(jnp.bfloat16)
    b1r = b1.reshape(1, hidden).astype(jnp.float32)
    b2r = b2.reshape(1, c_out).astype(jnp.float32)

    cost = pl.CostEstimate(
        flops=2 * n_pad * (c_in * hidden + hidden * c_out),
        transcendentals=n_pad * hidden,
        bytes_accessed=(n_pad * c_in * x_bytes + n_pad * c_out * o_bytes
                        + 2 * (c_in * hidden + hidden * c_out)
                        + 4 * (hidden + c_out)),
    )

    out = pl.pallas_call(
        _mlp_kernel,
        out_shape=jax.ShapeDtypeStruct((n_pad, c_out), x.dtype),
        grid=grid,
        in_specs=[
            pl.BlockSpec((tn, c_in), lambda i, j: (i, 0)),    # x: row-tiled, j-invariant
            pl.BlockSpec((c_in, th), lambda i, j: (0, j)),    # fc1 weight tile
            pl.BlockSpec((1, th), lambda i, j: (0, j)),       # fc1 bias tile
            pl.BlockSpec((th, c_out), lambda i, j: (j, 0)),   # fc2 weight tile
            pl.BlockSpec((1, c_out), lambda i, j: (0, 0)),    # fc2 bias
        ],
        out_specs=pl.BlockSpec((tn, c_out), lambda i, j: (i, 0)),
        scratch_shapes=[pltpu.VMEM((tn, c_out), jnp.float32)],
        compiler_params=pltpu.CompilerParams(
            dimension_semantics=(pltpu.PARALLEL, pltpu.ARBITRARY),
            vmem_limit_bytes=budget,
        ),
        cost_estimate=cost,
    )(x2d, w1b, b1r, w2b, b2r)

    if n_pad != n:
        out = out[:n]
    return out.reshape(orig_shape[:-1] + (c_out,))


# ----------------------------------------------------------------------------- reference

def reference_mlp(x, w1, b1, w2, b2):
    """Pure-JAX reference with matching bf16-in / f32-accumulate math."""
    orig_shape = x.shape
    c_out = w2.shape[1]
    x2d = x.reshape(-1, orig_shape[-1]).astype(jnp.bfloat16)
    h = jnp.dot(x2d, w1.astype(jnp.bfloat16),
                preferred_element_type=jnp.float32) + b1.astype(jnp.float32)
    h = 0.5 * h * (1.0 + jax.lax.erf(h * _SQRT1_2))
    y = jnp.dot(h.astype(jnp.bfloat16), w2.astype(jnp.bfloat16),
                preferred_element_type=jnp.float32) + b2.astype(jnp.float32)
    return y.astype(x.dtype).reshape(orig_shape[:-1] + (c_out,))


# ----------------------------------------------------------------------------- main

if __name__ == "__main__":
    # Token layout (B, S, C) as used by the transformer blocks in uniformer.
    B, S, C = 2, 512, 128            # in_features = 128
    hidden = 4 * C                   # mlp_ratio = 4 -> hidden_features = 512

    key = jax.random.PRNGKey(0)
    kx, k1, k2, k3, k4 = jax.random.split(key, 5)
    x_f32 = jax.random.normal(kx, (B, S, C), jnp.float32)
    w1 = (0.02 * jax.random.normal(k1, (C, hidden))).astype(jnp.float32)
    b1 = (0.01 * jax.random.normal(k2, (hidden,))).astype(jnp.float32)
    w2 = (0.02 * jax.random.normal(k3, (hidden, C))).astype(jnp.float32)
    b2 = (0.01 * jax.random.normal(k4, (C,))).astype(jnp.float32)

    # f32 activation I/O (module default precision).
    out = jax.block_until_ready(mlp_pallas(x_f32, w1, b1, w2, b2))
    ref = reference_mlp(x_f32, w1, b1, w2, b2)
    assert out.shape == (B, S, C)
    err = float(jnp.max(jnp.abs(out - ref)))
    assert err < 2e-2, f"f32 I/O max abs error {err}"

    # bf16 activation I/O: halves the two dominant HBM streams on the mem-bound path.
    x_bf16 = x_f32.astype(jnp.bfloat16)
    out_bf = jax.block_until_ready(mlp_pallas(x_bf16, w1, b1, w2, b2))
    ref_bf = reference_mlp(x_bf16, w1, b1, w2, b2)
    assert out_bf.dtype == jnp.bfloat16
    err_bf = float(jnp.max(jnp.abs(out_bf.astype(jnp.float32)
                                   - ref_bf.astype(jnp.float32))))
    assert err_bf < 2e-2, f"bf16 I/O max abs error {err_bf}"

    # Non-tile-divisible token count exercises the padded-rows path
    # (no whole-tensor fallback anymore).
    x_odd = x_f32[:1, :37, :]
    out_odd = jax.block_until_ready(mlp_pallas(x_odd, w1, b1, w2, b2))
    ref_odd = reference_mlp(x_odd, w1, b1, w2, b2)
    err_odd = float(jnp.max(jnp.abs(out_odd - ref_odd)))
    assert err_odd < 2e-2, f"padded-path max abs error {err_odd}"

    print("KERNEL_OK")
</pallas_src>

<mosaic_0001>
module attributes {stable_mosaic.version = 11 : i64} {
  func.func @_mlp_kernel(%arg0: i32, %arg1: i32, %arg2: memref<512x128xf32, #tpu.memory_space<vmem>>, %arg3: memref<128x512xbf16, #tpu.memory_space<vmem>>, %arg4: memref<1x512xf32, #tpu.memory_space<vmem>>, %arg5: memref<512x128xbf16, #tpu.memory_space<vmem>>, %arg6: memref<1x128xf32, #tpu.memory_space<vmem>>, %arg7: memref<512x128xf32, #tpu.memory_space<vmem>>, %arg8: memref<512x128xf32, #tpu.memory_space<vmem>>) attributes {dimension_semantics = [#tpu.dimension_semantics<parallel>, #tpu.dimension_semantics<arbitrary>], iteration_bounds = array<i64: 2, 1>, scalar_prefetch = 0 : i64, scratch_operands = 1 : i64, tpu.core_type = #tpu.core_type<tc>, window_params = [{transform_indices = @transform_0, window_bounds = array<i64: 512, 128>}, {transform_indices = @transform_1, window_bounds = array<i64: 128, 512>}, {transform_indices = @transform_2, window_bounds = array<i64: 1, 512>}, {transform_indices = @transform_3, window_bounds = array<i64: 512, 128>}, {pipeline_mode = #tpu.pipeline_mode<synchronous>, transform_indices = @transform_4, window_bounds = array<i64: 1, 128>}, {transform_indices = @transform_5, window_bounds = array<i64: 512, 128>}]} {
    %c0_i32 = arith.constant 0 : i32
    %0 = arith.cmpi eq, %arg1, %c0_i32 : i32
    %1 = arith.extui %0 : i1 to i32
    %c0_i32_0 = arith.constant 0 : i32
    %2 = arith.cmpi ne, %1, %c0_i32_0 : i32
    scf.if %2 {
      %cst_18 = arith.constant 0.000000e+00 : f32
      %29 = vector.broadcast %cst_18 : f32 to vector<512x128xf32>
      %c0_19 = arith.constant 0 : index
      %c0_20 = arith.constant 0 : index
      %30 = vector.load %arg8[%c0_19, %c0_20] : memref<512x128xf32, #tpu.memory_space<vmem>>, vector<512x128xf32>
      tpu.vector_store %arg8[%c0_19, %c0_20], %29 {strides = array<i32>} : memref<512x128xf32, #tpu.memory_space<vmem>>, vector<512x128xf32>,
    } else {
    }
    %c0 = arith.constant 0 : index
    %c0_1 = arith.constant 0 : index
    %3 = vector.load %arg2[%c0, %c0_1] : memref<512x128xf32, #tpu.memory_space<vmem>>, vector<512x128xf32>
    %4 = arith.truncf %3 : vector<512x128xf32> to vector<512x128xbf16>
    %c0_2 = arith.constant 0 : index
    %c0_3 = arith.constant 0 : index
    %5 = vector.load %arg3[%c0_2, %c0_3] : memref<128x512xbf16, #tpu.memory_space<vmem>>, vector<128x512xbf16>
    %cst = arith.constant dense<0.000000e+00> : vector<512x512xf32>
    %6 = tpu.matmul %4, %5, %cst {dimension_numbers = #tpu.dot_dimension_numbers<[1], [0], [0], [1], [0, 0, 1, 1], [], []>} : vector<512x128xbf16>, vector<128x512xbf16>, vector<512x512xf32> -> vector<512x512xf32>
    %c0_4 = arith.constant 0 : index
    %c0_5 = arith.constant 0 : index
    %7 = vector.load %arg4[%c0_4, %c0_5] : memref<1x512xf32, #tpu.memory_space<vmem>>, vector<1x512xf32>
    %8 = vector.shape_cast %7 : vector<1x512xf32> to vector<512xf32>
    %9 = vector.shape_cast %8 : vector<512xf32> to vector<1x512xf32>
    %10 = vector.broadcast %9 : vector<1x512xf32> to vector<512x512xf32>
    %11 = arith.addf %6, %10 : vector<512x512xf32>
    %cst_6 = arith.constant 5.000000e-01 : f32
    %12 = vector.broadcast %cst_6 : f32 to vector<512x512xf32>
    %13 = arith.mulf %12, %11 : vector<512x512xf32>
    %cst_7 = arith.constant 0.707106769 : f32
    %14 = vector.broadcast %cst_7 : f32 to vector<512x512xf32>
    %15 = arith.mulf %11, %14 : vector<512x512xf32>
    %16 = math.erf %15 : vector<512x512xf32>
    %cst_8 = arith.constant 1.000000e+00 : f32
    %17 = vector.broadcast %cst_8 : f32 to vector<512x512xf32>
    %18 = arith.addf %17, %16 : vector<512x512xf32>
    %19 = arith.mulf %13, %18 : vector<512x512xf32>
    %c0_9 = arith.constant 0 : index
    %c0_10 = arith.constant 0 : index
    %20 = vector.load %arg8[%c0_9, %c0_10] : memref<512x128xf32, #tpu.memory_space<vmem>>, vector<512x128xf32>
    %21 = arith.truncf %19 : vector<512x512xf32> to vector<512x512xbf16>
    %c0_11 = arith.constant 0 : index
    %c0_12 = arith.constant 0 : index
    %22 = vector.load %arg5[%c0_11, %c0_12] : memref<512x128xbf16, #tpu.memory_space<vmem>>, vector<512x128xbf16>
    %cst_13 = arith.constant dense<0.000000e+00> : vector<512x128xf32>
    %23 = tpu.matmul %21, %22, %cst_13 {dimension_numbers = #tpu.dot_dimension_numbers<[1], [0], [0], [1], [0, 0, 1, 1], [], []>} : vector<512x512xbf16>, vector<512x128xbf16>, vector<512x128xf32> -> vector<512x128xf32>
    %24 = arith.addf %20, %23 : vector<512x128xf32>
    %c0_14 = arith.constant 0 : index
    %c0_15 = arith.constant 0 : index
    %25 = vector.load %arg8[%c0_14, %c0_15] : memref<512x128xf32, #tpu.memory_space<vmem>>, vector<512x128xf32>
    tpu.vector_store %arg8[%c0_14, %c0_15], %24 {strides = array<i32>} : memref<512x128xf32, #tpu.memory_space<vmem>>, vector<512x128xf32>,
    %c0_i32_16 = arith.constant 0 : i32
    %26 = arith.cmpi eq, %arg1, %c0_i32_16 : i32
    %27 = arith.extui %26 : i1 to i32
    %c0_i32_17 = arith.constant 0 : i32
    %28 = arith.cmpi ne, %27, %c0_i32_17 : i32
    scf.if %28 {
      %c0_18 = arith.constant 0 : index
      %c0_19 = arith.constant 0 : index
      %29 = vector.load %arg8[%c0_18, %c0_19] : memref<512x128xf32, #tpu.memory_space<vmem>>, vector<512x128xf32>
      %c0_20 = arith.constant 0 : index
      %c0_21 = arith.constant 0 : index
      %30 = vector.load %arg6[%c0_20, %c0_21] : memref<1x128xf32, #tpu.memory_space<vmem>>, vector<1x128xf32>
      %31 = vector.shape_cast %30 : vector<1x128xf32> to vector<128xf32>
      %32 = vector.shape_cast %31 : vector<128xf32> to vector<1x128xf32>
      %33 = vector.broadcast %32 : vector<1x128xf32> to vector<512x128xf32>
      %34 = arith.addf %29, %33 : vector<512x128xf32>
      %c0_22 = arith.constant 0 : index
      %c0_23 = arith.constant 0 : index
      %35 = vector.load %arg7[%c0_22, %c0_23] : memref<512x128xf32, #tpu.memory_space<vmem>>, vector<512x128xf32>
      tpu.vector_store %arg7[%c0_22, %c0_23], %34 {strides = array<i32>} : memref<512x128xf32, #tpu.memory_space<vmem>>, vector<512x128xf32>,
    } else {
    }
    return
  }
  func.func @transform_0(%arg0: i32, %arg1: i32) -> (i32, i32) {
    %c0_i32 = arith.constant 0 : i32
    %c0_i32_0 = arith.constant 0 : i32
    return %arg0, %c0_i32 : i32, i32
  }
  func.func @transform_1(%arg0: i32, %arg1: i32) -> (i32, i32) {
    %c0_i32 = arith.constant 0 : i32
    %c0_i32_0 = arith.constant 0 : i32
    return %c0_i32, %arg1 : i32, i32
  }
  func.func @transform_2(%arg0: i32, %arg1: i32) -> (i32, i32) {
    %c0_i32 = arith.constant 0 : i32
    %c0_i32_0 = arith.constant 0 : i32
    return %c0_i32, %arg1 : i32, i32
  }
  func.func @transform_3(%arg0: i32, %arg1: i32) -> (i32, i32) {
    %c0_i32 = arith.constant 0 : i32
    %c0_i32_0 = arith.constant 0 : i32
    return %arg1, %c0_i32 : i32, i32
  }
  func.func @transform_4(%arg0: i32, %arg1: i32) -> (i32, i32) {
    %c0_i32 = arith.constant 0 : i32
    %c0_i32_0 = arith.constant 0 : i32
    %c0_i32_1 = arith.constant 0 : i32
    return %c0_i32, %c0_i32_0 : i32, i32
  }
  func.func @transform_5(%arg0: i32, %arg1: i32) -> (i32, i32) {
    %c0_i32 = arith.constant 0 : i32
    %c0_i32_0 = arith.constant 0 : i32
    return %arg0, %c0_i32 : i32, i32
  }
}

</mosaic_0001>

<bundles_post_ra>
// kernel: tpu_custom_call.1
= control target key start
LH: loop header
LB: loop body
LE: loop exit
PB: predicated region body
PF: predicated region fallthrough
CT: control target
= control target key end

     0   :  { %s9029_s0 = inlined_call_operand.hbm [shape: f32[1024,128], index: 0, kind: input, shape index: {}]   ;;  %s9030_s1 = inlined_call_operand.hbm [shape: bf16[128,512], index: 1, kind: input, shape index: {}]   ;;  %s9031_s2 = inlined_call_operand.hbm [shape: f32[1,512], index: 2, kind: input, shape index: {}]   ;;  %s9032_s3 = inlined_call_operand.hbm [shape: bf16[512,128], index: 3, kind: input, shape index: {}]   ;;  %s9033_s4 = inlined_call_operand.vmem [shape: f32[1,128], index: 4, kind: input, shape index: {}]   ;;  %s9034_s5 = inlined_call_operand.hbm [shape: f32[1024,128], index: 5, kind: output, shape index: {}]  }
   0x1   :  { %9103 = sst [smem:[#allocation107_spill]] %s9030_s1 }
   0x2   :  { %10 = vsyncpa [#allocation4], 0 }
   0x3   :  { %12 = vsyncpa [#allocation4 + $0x1], 0 }
   0x4   :  { %13 = vsyncpa [#allocation7], 0 }
   0x5   :  { %14 = vsyncpa [#allocation10], 0 }
   0x6   :  { %15 = vsyncpa [#allocation5], 0 }
   0x7   :  { %17 = vsyncpa [#allocation5 + $0x1], 0  ;;  %s5200_s18 = smov 0   ;;  %s5202_s19 = smov 0  }
   0x8   :  { %s5204_s20 = smov 0   ;;  %s5206_s21 = smov 0  }
   0x9   :  { %s5208_s22 = smov 0   ;;  %s5210_s23 = smov 0  }
   0xa LB: > { %s4177_s24 = sadd.s32 4294967295, %s5154_s23   ;;  %s4178_s25 = sadd.s32 4294967294, %s5154_s23   ;;  %s5154_s23 = sphi %s5210_s23, %s23_s23   ;;  %s5150_s22 = sphi %s5208_s22, %s9828_s22   ;;  %s5146_s21 = sphi %s5206_s21, %s9827_s21   ;;  %s5142_s20 = sphi %s5204_s20, %s9826_s20   ;;  %s5138_s19 = sphi %s5202_s19, %s9825_s19   ;;  %s5134_s18 = sphi %s5200_s18, %s9824_s18  }
   0xb   : > { %p55_p0 = scmp.ne.s32.totalorder %s5138_s19, %s5134_s18  ;;  %p5234_p1 = scmp.eq.s32.totalorder %s4177_s24, 0 }
   0xc   : > { %p5238_p2 = scmp.eq.s32.totalorder %s4177_s24, 1  ;;  %p184_p3 = scmp.eq.s32.totalorder %s4178_s25, 1 }
   0xd   : > { %s9104_s26 = scalar_select %p5234_p1, 1, 0 }
   0xe   : > { %p5244_p4 = por %p5234_p1, %p55_p0  ;;  %p4179_p5 = scmp.ge.s32.totalorder %s5154_s23, 1 }
   0xf   : > { %p5249_p6 = por %p184_p3, %p55_p0  ;;  %p191_p7 = scmp.lt.s32.totalorder %s5154_s23, 3 }
  0x10   : > { %s9106_s28 = scalar_select %p5244_p4, 1, 0 }
  0x11   : > { %s9107_s29 = scalar_select %p5249_p6, 1, 0 }
  0x12   : > { %p5254_p8 = pnand %p4179_p5, %p191_p7  ;;  %s5156_s6 = smov [#allocation6]  }
  0x13   : > { %s206_s7 = sshll.u32 %s5156_s6, 4  ;;  %s5157_s9 = smov [#allocation8]   ;;  %s207_s7 = int_to_ptr.vmem [resolvable:$true] %s206_s7 }
  0x14   : > { %s9108_s30 = scalar_select %p5254_p8, 1, 0 }
  0x15   : > { %p4281_p9 = pneg %p5254_p8  ;;  %s223_s10 = sshll.u32 %s5157_s9, 4  ;;  %s224_s10 = int_to_ptr.vmem [resolvable:$true] %s223_s10 }
  0x16   : > { %s5158_s11 = smov [#allocation9]   ;;  %s4971_s13 = scalar_lea.vmem %s207_s7, 4096 }
  0x17   : > { %p5263_p11 = pnand %p4281_p9, %p5234_p1  ;;  %s236_s12 = sshll.u32 %s5158_s11, 4  ;;  %s237_s12 = int_to_ptr.vmem [resolvable:$true] %s236_s12 }
  0x18   : > { %p4972_p13 = scmp.ne.s32.totalorder %s207_s7, %s4971_s13  ;;  %p4979_p5 = scmp.lt.s32.totalorder %s207_s7, %s207_s7 }
  0x19   : > { %p4962_p12 = pneg %p5263_p11  ;;  %p4980_p7 = scmp.lt.s32.totalorder %s4971_s13, %s4971_s13 }
  0x1b   : > { %p4974_p0 = pnand %p4972_p13, %p4962_p12  ;;  %p4981_p9 = por %p4980_p7, %p4979_p5 }
  0x1d   : > { %p4975_p3 = pneg %p4974_p0 }
  0x1f   : > { %p4982_p10 = pnand %p4981_p9, %p4975_p3 }
  0x21   : > { %4985 = shalt.err (!%p4982_p10)
}
  0x22   : > { %s5159_s14 = smov 256   ;;  %s5160_s15 = smov 16  }
  0x23   : > { %s9110_s1 = sld [smem:[#allocation107_spill]]  ;;  %s4997_s24 = scalar_lea.vmem %s224_s10, 64 }
  0x24   : > { %p4998_p6 = scmp.ne.s32.totalorder %s224_s10, %s4997_s24  ;;  %p5005_p1 = scmp.lt.s32.totalorder %s224_s10, %s224_s10 }
  0x25   : > { %p5006_p4 = scmp.lt.s32.totalorder %s4997_s24, %s4997_s24 }
  0x26   : > { %p5000_p13 = pnand %p4998_p6, %p4962_p12 }
  0x27   : > { %p5007_p5 = por %p5006_p4, %p5005_p1 }
  0x28   : > { %p5001_p0 = pneg %p5000_p13 }
  0x29   : > { %4284 = dma.hbm_to_vmem [thread:$0]  (!%p5263_p11), %s9110_s1, 4096, %s207_s7, [#allocation7], %s5159_s14, %s5159_s14, %s5160_s15  }
  0x2a   : > { %p5008_p3 = pnand %p5007_p5, %p5001_p0 }
  0x2c   : > { %5011 = shalt.err (!%p5008_p3)
}
  0x2d   : > { %4287 = dma.hbm_to_vmem [thread:$0]  (!%p5263_p11), %s9031_s2, 64, %s224_s10, [#allocation7]  }
  0x2e   : > { %s5023_s7 = scalar_lea.vmem %s237_s12, 4096  ;;  %p5031_p9 = scmp.lt.s32.totalorder %s237_s12, %s237_s12 }
  0x2f   : > { %p5024_p10 = scmp.ne.s32.totalorder %s237_s12, %s5023_s7  ;;  %p5032_p13 = scmp.lt.s32.totalorder %s5023_s7, %s5023_s7 }
  0x31   : > { %p5026_p7 = pnand %p5024_p10, %p4962_p12  ;;  %p5033_p8 = por %p5032_p13, %p5031_p9 }
  0x33   : > { %p5027_p6 = pneg %p5026_p7 }
  0x35   : > { %p5034_p1 = pnand %p5033_p8, %p5027_p6 }
  0x37   : > { %5037 = shalt.err (!%p5034_p1)
}
  0x38   : > { %s5161_s9 = smov 64   ;;  %s5162_s10 = smov 4  }
  0x39   : > { %4290 = dma.hbm_to_vmem [thread:$0]  (!%p5263_p11), %s9032_s3, 4096, %s237_s12, [#allocation10], %s5161_s9, %s5161_s9, %s5162_s10  }
  0x3a   : > { %s42_s14 = sadd.s32 1, %s5142_s20  ;;  %s35_s15 = sadd.s32 1, %s5150_s22 }
  0x3b   : > { %p49_p4 = scmp.ne.s32.totalorder %s5142_s20, %s5138_s19  ;;  %p37_p8 = scmp.ge.s32.totalorder %s35_s15, 2 }
  0x3c   : > { %p50_p12 = scmp.eq.s32.totalorder %s5154_s23, 0  ;;  %p4302_p5 = scmp.lt.s32.totalorder %s5154_s23, 2 }
  0x3d   : > { %p5300_p0 = por %p5238_p2, %p49_p4  ;;  %s9830_s15 = smov (%p37_p8, %s35_s15), 0 }
  0x3e   : > { %p51_p3 = por %p50_p12, %p49_p4  ;;  %s253_s8 = sand.u32 1, %s5142_s20  }
  0x3f   : > { %s39_s17 = ssub.s32 %s5150_s22, %s9830_s15  ;;  %s4184_s12 = sshll.u32 %s253_s8, 9 }
  0x40   : > { %p40_p10 = scmp.eq.s32.totalorder %s39_s17, 0  ;;  %s4263_s24 = sshll.u32 %s5150_s22, 13 }
  0x41   : > { %s263_s27 = scalar_lea.hbm %s9029_s0, %s4263_s24  ;;  %s257_s9 = scalar_lea.vmem [#allocation3], %s4184_s12 }
  0x42   : > { %s5312_s25 = scalar_select %p40_p10, %s5142_s20, %s42_s14  }
  0x43   : > { %s264_s10 = sshll.u32 %s257_s9, 4  ;;  %p5319_p2 = pnand %p4302_p5, %p51_p3  ;;  %s265_s10 = int_to_ptr.vmem [resolvable:$true] %s264_s10 }
  0x44   : > { %s254_s13 = scalar_lea.sflag [#allocation4], %s253_s8  ;;  %s5051_s17 = scalar_lea.vmem %s265_s10, 8192 }
  0x45   : > { %p5040_p11 = pneg %p5319_p2  ;;  %p5052_p7 = scmp.ne.s32.totalorder %s265_s10, %s5051_s17 }
  0x46   : > { %s5163_s14 = smov [#allocation3]  }
  0x47   : > { %p5054_p6 = pnand %p5052_p7, %p5040_p11  ;;  %s5056_s1 = sshll.u32 %s5163_s14, 4  ;;  %s5057_s1 = int_to_ptr.vmem [resolvable:$false] %s5056_s1 }
  0x48   : > { %s5058_s24 = scalar_lea.vmem %s5057_s1, 16384  ;;  %p5059_p13 = scmp.lt.s32.totalorder %s265_s10, %s5057_s1 }
  0x49   : > { %p5055_p9 = pneg %p5054_p6  ;;  %p5060_p1 = scmp.lt.s32.totalorder %s5058_s24, %s5051_s17 }
  0x4b   : > { %p5061_p4 = por %p5060_p1, %p5059_p13 }
  0x4d   : > { %p5062_p8 = pnand %p5061_p4, %p5055_p9 }
  0x4f   : > { %5065 = shalt.err (!%p5062_p8)
}
  0x50   : > { %s5164_s12 = smov 128   ;;  %s5165_s6 = smov 8  }
  0x51   : > { %4294 = dma.hbm_to_vmem [thread:$0]  (!%p5319_p2), %s263_s27, 8192, %s265_s10, %s254_s13, %s5164_s12, %s5164_s12, %s5165_s6  }
  0x52   : > { %p9113_p12 = scmp.ne.s32.totalorder %s9108_s30, 0 }
  0x54   : > { %276 = sbr.rel (%p9113_p12) target bundleno = 1003 (0x3eb), region = 40 }
  0x59   : > { %s5330_s8 = sand.u32 1, %s5138_s19   ;;  %p9114_p5 = scmp.ne.s32.totalorder %s9106_s28, 0 }
  0x5a   : > { %s4188_s1 = sshll.u32 %s5330_s8, 9  ;;  %s279_s7 = scalar_lea.sflag [#allocation4], %s5330_s8 }
  0x5b   : > { %s5336_s9 = scalar_lea.vmem [#allocation3], %s4188_s1 }
  0x5c   : > { %5117 = dma.done.wait (%p9114_p5), %s279_s7, 8192  }
  0x5d   : > { %5119 = vsyncadd (%p9114_p5), %s279_s7, 4294959104  ;;  %p9115_p3 = scmp.ne.s32.totalorder %s9104_s26, 0 }
  0x5f   : > { %5121 = dma.done.wait (%p9115_p3), [#allocation7], 4160  }
  0x60   : > { %5123 = vsyncadd (%p9115_p3), [#allocation7], 4294963136 }
  0x61   : > { %5125 = dma.done.wait (%p9115_p3), [#allocation10], 4096  }
  0x62   : > { %5127 = vsyncadd (%p9115_p3), [#allocation10], 4294963200  ;;  %v9039_v0 = vmov 0   ;;  %v4367_v1 = vld [vmem:[#allocation6 + $0xe4] ss:$16 sps:$4 sm:$0xff]   ;;  %v396_v34 = vld [vmem:[%s5336_s9 + $0x8] sm:$0xff] }
  0x63   : > { %737 = vmatprep.mubr.bf16.mxu0 %v9039_v0  ;;  %1090 = vmatprep.mubr.bf16.mxu1 %v9039_v0  ;;  %v4369_v2 = vld [vmem:[#allocation6 + $0xec] ss:$16 sps:$4 sm:$0xff]   ;;  %v4371_v3 = vld [vmem:[#allocation6 + $0xe0] ss:$16 sps:$4 sm:$0xff]   ;;  %v4372_v4 = vld [vmem:[#allocation6 + $0xe8] ss:$16 sps:$4 sm:$0xff]  }
  0x64   : > { %705 = vmatprep.subr.bf16.mxu0 %v4367_v1  ;;  %1058 = vmatprep.subr.bf16.mxu1 %v4369_v2  ;;  %v4373_v5 = vld [vmem:[#allocation6 + $0xc4] ss:$16 sps:$4 sm:$0xff]   ;;  %v4375_v6 = vld [vmem:[#allocation6 + $0xcc] ss:$16 sps:$4 sm:$0xff]   ;;  %v4377_v7 = vld [vmem:[#allocation6 + $0xc0] ss:$16 sps:$4 sm:$0xff]  }
  0x65   : > { %706 = vmatpush1.bf16.msra.mxu0 %v4371_v3  ;;  %1059 = vmatpush1.bf16.msra.mxu1 %v4372_v4  ;;  %v4378_v8 = vld [vmem:[#allocation6 + $0xc8] ss:$16 sps:$4 sm:$0xff]   ;;  %v4379_v9 = vld [vmem:[#allocation6 + $0xa4] ss:$16 sps:$4 sm:$0xff]   ;;  %v4381_v10 = vld [vmem:[#allocation6 + $0xac] ss:$16 sps:$4 sm:$0xff]  }
  0x66   : > { %707 = vmatprep.subr.bf16.mxu0 %v4373_v5  ;;  %1060 = vmatprep.subr.bf16.mxu1 %v4375_v6  ;;  %v4383_v11 = vld [vmem:[#allocation6 + $0xa0] ss:$16 sps:$4 sm:$0xff]   ;;  %v4384_v12 = vld [vmem:[#allocation6 + $0xa8] ss:$16 sps:$4 sm:$0xff]   ;;  %v4385_v13 = vld [vmem:[#allocation6 + $0x84] ss:$16 sps:$4 sm:$0xff]  }
  0x67   : > { %v4387_v14 = vld [vmem:[#allocation6 + $0x8c] ss:$16 sps:$4 sm:$0xff]   ;;  %v4389_v15 = vld [vmem:[#allocation6 + $0x80] ss:$16 sps:$4 sm:$0xff]   ;;  %v4390_v16 = vld [vmem:[#allocation6 + $0x88] ss:$16 sps:$4 sm:$0xff]  }
  0x68   : > { %v4391_v17 = vld [vmem:[#allocation6 + $0x64] ss:$16 sps:$4 sm:$0xff]   ;;  %v4393_v18 = vld [vmem:[#allocation6 + $0x6c] ss:$16 sps:$4 sm:$0xff]   ;;  %v4395_v19 = vld [vmem:[#allocation6 + $0x60] ss:$16 sps:$4 sm:$0xff]  }
  0x69   : > { %708 = vmatpush1.bf16.msra.mxu0 %v4377_v7  ;;  %1061 = vmatpush1.bf16.msra.mxu1 %v4378_v8  ;;  %v4396_v20 = vld [vmem:[#allocation6 + $0x68] ss:$16 sps:$4 sm:$0xff]   ;;  %v4397_v21 = vld [vmem:[#allocation6 + $0x44] ss:$16 sps:$4 sm:$0xff]   ;;  %v4399_v22 = vld [vmem:[#allocation6 + $0x4c] ss:$16 sps:$4 sm:$0xff]  }
  0x6a   : > { %709 = vmatprep.subr.bf16.mxu0 %v4379_v9  ;;  %1062 = vmatprep.subr.bf16.mxu1 %v4381_v10  ;;  %v4401_v23 = vld [vmem:[#allocation6 + $0x40] ss:$16 sps:$4 sm:$0xff]   ;;  %v4402_v24 = vld [vmem:[#allocation6 + $0x48] ss:$16 sps:$4 sm:$0xff]   ;;  %v4403_v25 = vld [vmem:[#allocation6 + $0x24] ss:$16 sps:$4 sm:$0xff]  }
  0x6b   : > { %v4405_v26 = vld [vmem:[#allocation6 + $0x2c] ss:$16 sps:$4 sm:$0xff]   ;;  %v4407_v27 = vld [vmem:[#allocation6 + $0x20] ss:$16 sps:$4 sm:$0xff]   ;;  %v4408_v28 = vld [vmem:[#allocation6 + $0x28] ss:$16 sps:$4 sm:$0xff]  }
  0x6c   : > { %v4409_v29 = vld [vmem:[#allocation6 + $0x4] ss:$16 sps:$4 sm:$0xff]   ;;  %v4411_v30 = vld [vmem:[#allocation6 + $0xc] ss:$16 sps:$4 sm:$0xff]   ;;  %v4413_v31 = vld [vmem:[#allocation6] ss:$16 sps:$4 sm:$0xff]  }
  0x6d   : > { %710 = vmatpush1.bf16.msra.mxu0 %v4383_v11  ;;  %1063 = vmatpush1.bf16.msra.mxu1 %v4384_v12  ;;  %v4414_v32 = vld [vmem:[#allocation6 + $0x8] ss:$16 sps:$4 sm:$0xff]   ;;  %v395_v33 = vld [vmem:[%s5336_s9] sm:$0xff]  ;;  %v397_v38 = vld [vmem:[%s5336_s9 + $0x10] sm:$0xff]  ;;  %s8671_s30 = scalar_lea.vmem [#allocation11], %s4188_s1  ;;  %s4264_s11 = sshll.u32 %s5146_s21, 13 }
  0x6e   : > { %711 = vmatprep.subr.bf16.mxu0 %v4385_v13  ;;  %1064 = vmatprep.subr.bf16.mxu1 %v4387_v14  ;;  %v459_v35 = vpack.c.bf16 %v396_v34, %v395_v33  ;;  %v4415_v36 = vld [vmem:[#allocation9 + $0x38] sm:$0xff]   ;;  %v4417_v40 = vld [vmem:[#allocation9 + $0x30] sm:$0xff]   ;;  %v4419_v43 = vld [vmem:[#allocation9 + $0x28] sm:$0xff]   ;;  %s4061_s13 = sshll.u32 %s8671_s30, 4  ;;  %s8978_s24 = scalar_lea.hbm %s9034_s5, %s4264_s11  ;;  %s8980_s13 = int_to_ptr.vmem [resolvable:$true] %s4061_s13 }
  0x6f   : > { %v4416_v37 = vld [vmem:[#allocation9 + $0xb8] sm:$0xff]   ;;  %v4418_v41 = vld [vmem:[#allocation9 + $0xb0] sm:$0xff]   ;;  %v4420_v44 = vld [vmem:[#allocation9 + $0xa8] sm:$0xff]   ;;  %s4048_s12 = scalar_lea.sflag [#allocation5], %s5330_s8  ;;  %s5066_s6 = scalar_lea.vmem %s8980_s13, 8192 }
  0x70   : > { %v398_v39 = vld [vmem:[%s5336_s9 + $0x18] sm:$0xff]  ;;  %v399_v45 = vld [vmem:[%s5336_s9 + $0x20] sm:$0xff]  ;;  %v400_v46 = vld [vmem:[%s5336_s9 + $0x28] sm:$0xff]  ;;  %p5067_p10 = scmp.ne.s32.totalorder %s8980_s13, %s5066_s6  ;;  %s5167_s21 = smov [#allocation11]  }
  0x71   : > { %712 = vmatpush1.bf16.msra.mxu0 %v4389_v15  ;;  %1065 = vmatpush1.bf16.msra.mxu1 %v4390_v16  ;;  %v460_v42 = vpack.c.bf16 %v398_v39, %v397_v38  ;;  %v4421_v47 = vld [vmem:[#allocation9 + $0x20] sm:$0xff]   ;;  %v461_v49 = vpack.c.bf16 %v400_v46, %v399_v45  ;;  %v4423_v50 = vld [vmem:[#allocation9 + $0x18] sm:$0xff]   ;;  %v401_v52 = vld [vmem:[%s5336_s9 + $0x30] sm:$0xff]  ;;  %s5070_s1 = sshll.u32 %s5167_s21, 4  ;;  %s5071_s1 = int_to_ptr.vmem [resolvable:$false] %s5070_s1 }
  0x72   : > { %713 = vmatprep.subr.bf16.mxu0 %v4391_v17  ;;  %1066 = vmatprep.subr.bf16.mxu1 %v4393_v18  ;;  %v4422_v48 = vld [vmem:[#allocation9 + $0xa0] sm:$0xff]   ;;  %v4424_v51 = vld [vmem:[#allocation9 + $0x98] sm:$0xff]   ;;  %v4425_v54 = vld [vmem:[#allocation9 + $0x10] sm:$0xff]   ;;  %p5068_p2 = pnand %p5067_p10, %p5300_p0  ;;  %s5072_s7 = scalar_lea.vmem %s5071_s1, 16384 }
  0x73   : > { %v402_v53 = vld [vmem:[%s5336_s9 + $0x38] sm:$0xff]  ;;  %v4427_v57 = vld [vmem:[#allocation9 + $0x8] sm:$0xff]   ;;  %v403_v59 = vld [vmem:[%s5336_s9 + $0x40] sm:$0xff]  ;;  %p5073_p7 = scmp.lt.s32.totalorder %s8980_s13, %s5071_s1  ;;  %p5074_p6 = scmp.lt.s32.totalorder %s5072_s7, %s5066_s6 }
  0x74   : > { %v4426_v55 = vld [vmem:[#allocation9 + $0x90] sm:$0xff]   ;;  %v462_v56 = vpack.c.bf16 %v402_v53, %v401_v52  ;;  %v4428_v58 = vld [vmem:[#allocation9 + $0x88] sm:$0xff]   ;;  %v4429_v61 = vld [vmem:[#allocation9] sm:$0xff]   ;;  %p5069_p11 = pneg %p5068_p2 }
  0x75   : > { %714 = vmatpush1.bf16.msra.mxu0 %v4395_v19  ;;  %1067 = vmatpush1.bf16.msra.mxu1 %v4396_v20  ;;  %v404_v60 = vld [vmem:[%s5336_s9 + $0x48] sm:$0xff]  ;;  %v4431_v1 = vld [vmem:[#allocation9 + $0x78] sm:$0xff]   ;;  %v405_v3 = vld [vmem:[%s5336_s9 + $0x50] sm:$0xff]  ;;  %p5075_p9 = por %p5074_p6, %p5073_p7 }
  0x76   : > { %715 = vmatprep.subr.bf16.mxu0 %v4397_v21  ;;  %1068 = vmatprep.subr.bf16.mxu1 %v4399_v22  ;;  %v4430_v62 = vld [vmem:[#allocation9 + $0x80] sm:$0xff]   ;;  %v463_v63 = vpack.c.bf16 %v404_v60, %v403_v59  ;;  %v4432_v2 = vld [vmem:[#allocation9 + $0xf8] sm:$0xff]   ;;  %v4433_v5 = vld [vmem:[#allocation9 + $0x70] sm:$0xff]  }
  0x77   : > { %v406_v4 = vld [vmem:[%s5336_s9 + $0x58] sm:$0xff]  ;;  %v4435_v8 = vld [vmem:[#allocation9 + $0x68] sm:$0xff]   ;;  %v407_v10 = vld [vmem:[%s5336_s9 + $0x60] sm:$0xff]  ;;  %p5076_p13 = pnand %p5075_p9, %p5069_p11 }
  0x78   : > { %v4434_v6 = vld [vmem:[#allocation9 + $0xf0] sm:$0xff]   ;;  %v464_v7 = vpack.c.bf16 %v406_v4, %v405_v3  ;;  %v4436_v9 = vld [vmem:[#allocation9 + $0xe8] sm:$0xff]   ;;  %v4437_v13 = vld [vmem:[#allocation9 + $0x60] sm:$0xff]  }
  0x79   : > { %716 = vmatpush1.bf16.msra.mxu0 %v4401_v23  ;;  %1069 = vmatpush1.bf16.msra.mxu1 %v4402_v24  ;;  %v408_v11 = vld [vmem:[%s5336_s9 + $0x68] sm:$0xff]  ;;  %v409_v15 = vld [vmem:[%s5336_s9 + $0x70] sm:$0xff]  ;;  %v410_v16 = vld [vmem:[%s5336_s9 + $0x78] sm:$0xff] }
  0x7a   : > { %717 = vmatprep.subr.bf16.mxu0 %v4403_v25  ;;  %1070 = vmatprep.subr.bf16.mxu1 %v4405_v26  ;;  %v465_v12 = vpack.c.bf16 %v408_v11, %v407_v10  ;;  %v4438_v14 = vld [vmem:[#allocation9 + $0xe0] sm:$0xff]   ;;  %v466_v17 = vpack.c.bf16 %v410_v16, %v409_v15  ;;  %v413_v21 = vld [vmem:[%s5336_s9 + $0x90] sm:$0xff]  ;;  %v414_v22 = vld [vmem:[%s5336_s9 + $0x98] sm:$0xff] }
  0x7b   : > { %v411_v18 = vld [vmem:[%s5336_s9 + $0x80] sm:$0xff]  ;;  %v412_v19 = vld [vmem:[%s5336_s9 + $0x88] sm:$0xff]  ;;  %v468_v23 = vpack.c.bf16 %v414_v22, %v413_v21  ;;  %v4441_v38 = vld [vmem:[#allocation9 + $0x50] sm:$0xff]  }
  0x7c   : > { %v467_v20 = vpack.c.bf16 %v412_v19, %v411_v18  ;;  %v415_v24 = vld [vmem:[%s5336_s9 + $0xa0] sm:$0xff]  ;;  %v416_v25 = vld [vmem:[%s5336_s9 + $0xa8] sm:$0xff]  ;;  %v4442_v39 = vld [vmem:[#allocation9 + $0xd0] sm:$0xff]  }
  0x7d   : > { %718 = vmatpush1.bf16.msra.mxu0 %v4407_v27  ;;  %1071 = vmatpush1.bf16.msra.mxu1 %v4408_v28  ;;  %v469_v26 = vpack.c.bf16 %v416_v25, %v415_v24  ;;  %v417_v27 = vld [vmem:[%s5336_s9 + $0xb0] sm:$0xff]  ;;  %v418_v28 = vld [vmem:[%s5336_s9 + $0xb8] sm:$0xff]  ;;  %v420_v33 = vld [vmem:[%s5336_s9 + $0xc8] sm:$0xff] }
  0x7e   : > { %719 = vmatprep.subr.bf16.mxu0 %v4409_v29  ;;  %1072 = vmatprep.subr.bf16.mxu1 %v4411_v30  ;;  %v470_v29 = vpack.c.bf16 %v418_v28, %v417_v27  ;;  %v4439_v30 = vld [vmem:[#allocation9 + $0x58] sm:$0xff]   ;;  %v4444_v52 = vld [vmem:[#allocation9 + $0xc8] sm:$0xff]   ;;  %v4445_v60 = vld [vmem:[#allocation9 + $0x40] sm:$0xff]  }
  0x7f   : > { %v427_v46 = vld [vmem:[%s5336_s9 + $0x100] sm:$0xff]  ;;  %v438_v3 = vld [vmem:[%s5336_s9 + $0x158] sm:$0xff] }
  0x80   : > { %v443_v11 = vld [vmem:[%s5336_s9 + $0x180] sm:$0xff]  ;;  %v446_v18 = vld [vmem:[%s5336_s9 + $0x198] sm:$0xff] }
  0x81   : > { %720 = vmatpush1.bf16.msra.mxu0 %v4413_v31  ;;  %1073 = vmatpush1.bf16.msra.mxu1 %v4414_v32  ;;  %v4440_v31 = vld [vmem:[#allocation9 + $0xd8] sm:$0xff]  }
  0x82   : > { %3139 = vmatprep.subr.bf16.mxu0 %v9039_v0  ;;  %3428 = vmatprep.subr.bf16.mxu1 %v9039_v0  ;;  %v419_v32 = vld [vmem:[%s5336_s9 + $0xc0] sm:$0xff] }
  0x83   : > { %v471_v34 = vpack.c.bf16 %v420_v33, %v419_v32  ;;  %v523_v28 = vld [vmem:[#allocation8] sm:$0xf] }
  0x84   : > { %738 = vmatmul.mubr.bf16.vlgmr.msra.gmra.mxu0 %v459_v35  ;;  %1091 = vmatmul.mubr.bf16.vlgmr.msra.gmra.mxu1 %v459_v35  ;;  %v421_v35 = vld [vmem:[%s5336_s9 + $0xd0] sm:$0xff]  ;;  %v447_v33 = vld [vmem:[%s5336_s9 + $0x1a0] sm:$0xff] }
  0x85   : > { %3140 = vmatpush1.bf16.msra.mxu0 %v4415_v36  ;;  %3429 = vmatpush1.bf16.msra.mxu1 %v4416_v37  ;;  %v422_v36 = vld [vmem:[%s5336_s9 + $0xd8] sm:$0xff] }
  0x86   : > { %747 = vmatprep.mubr.bf16.mxu0 %v9039_v0  ;;  %1100 = vmatprep.mubr.bf16.mxu1 %v9039_v0  ;;  %v472_v37 = vpack.c.bf16 %v422_v36, %v421_v35 }
  0x87   : > { %3141 = vmatprep.subr.bf16.mxu0 %v9039_v0  ;;  %3430 = vmatprep.subr.bf16.mxu1 %v9039_v0 }
  0x89   : > { %3142 = vmatpush1.bf16.msra.mxu0 %v4417_v40  ;;  %3431 = vmatpush1.bf16.msra.mxu1 %v4418_v41  ;;  %v423_v40 = vld [vmem:[%s5336_s9 + $0xe0] sm:$0xff]  ;;  %v424_v41 = vld [vmem:[%s5336_s9 + $0xe8] sm:$0xff] }
  0x8a   : > { %3143 = vmatprep.subr.bf16.mxu0 %v9039_v0  ;;  %3432 = vmatprep.subr.bf16.mxu1 %v9039_v0 }
  0x8c   : > { %748 = vmatmul.mubr.bf16.gmra.mxu0 %v460_v42  ;;  %1101 = vmatmul.mubr.bf16.gmra.mxu1 %v460_v42  ;;  %v473_v42 = vpack.c.bf16 %v424_v41, %v423_v40 }
  0x8d   : > { %757 = vmatprep.mubr.bf16.mxu0 %v9039_v0  ;;  %1110 = vmatprep.mubr.bf16.mxu1 %v9039_v0 }
  0x8e   : > { %3144 = vmatpush1.bf16.msra.mxu0 %v4419_v43  ;;  %3433 = vmatpush1.bf16.msra.mxu1 %v4420_v44  ;;  %v425_v43 = vld [vmem:[%s5336_s9 + $0xf0] sm:$0xff]  ;;  %v426_v44 = vld [vmem:[%s5336_s9 + $0xf8] sm:$0xff] }
  0x8f   : > { %3145 = vmatprep.subr.bf16.mxu0 %v9039_v0  ;;  %3434 = vmatprep.subr.bf16.mxu1 %v9039_v0  ;;  %v474_v45 = vpack.c.bf16 %v426_v44, %v425_v43 }
  0x92   : > { %3146 = vmatpush1.bf16.msra.mxu0 %v4421_v47  ;;  %3435 = vmatpush1.bf16.msra.mxu1 %v4422_v48  ;;  %v428_v47 = vld [vmem:[%s5336_s9 + $0x108] sm:$0xff] }
  0x93   : > { %3147 = vmatprep.subr.bf16.mxu0 %v9039_v0  ;;  %3436 = vmatprep.subr.bf16.mxu1 %v9039_v0  ;;  %v475_v48 = vpack.c.bf16 %v428_v47, %v427_v46 }
  0x94   : > { %758 = vmatmul.mubr.bf16.gmra.mxu0 %v461_v49  ;;  %1111 = vmatmul.mubr.bf16.gmra.mxu1 %v461_v49  ;;  %v429_v49 = vld [vmem:[%s5336_s9 + $0x110] sm:$0xff] }
  0x95   : > { %767 = vmatprep.mubr.bf16.mxu0 %v9039_v0  ;;  %1120 = vmatprep.mubr.bf16.mxu1 %v9039_v0 }
  0x96   : > { %3148 = vmatpush1.bf16.msra.mxu0 %v4423_v50  ;;  %3437 = vmatpush1.bf16.msra.mxu1 %v4424_v51  ;;  %v430_v50 = vld [vmem:[%s5336_s9 + $0x118] sm:$0xff]  ;;  %v4443_v51 = vld [vmem:[#allocation9 + $0x48] sm:$0xff]  }
  0x97   : > { %3149 = vmatprep.subr.bf16.mxu0 %v9039_v0  ;;  %3438 = vmatprep.subr.bf16.mxu1 %v9039_v0  ;;  %v476_v53 = vpack.c.bf16 %v430_v50, %v429_v49 }
  0x9a   : > { %3150 = vmatpush1.bf16.msra.mxu0 %v4425_v54  ;;  %3439 = vmatpush1.bf16.msra.mxu1 %v4426_v55  ;;  %v431_v54 = vld [vmem:[%s5336_s9 + $0x120] sm:$0xff]  ;;  %v432_v55 = vld [vmem:[%s5336_s9 + $0x128] sm:$0xff] }
  0x9b   : > { %3151 = vmatprep.subr.bf16.mxu0 %v9039_v0  ;;  %3440 = vmatprep.subr.bf16.mxu1 %v9039_v0 }
  0x9c   : > { %768 = vmatmul.mubr.bf16.gmra.mxu0 %v462_v56  ;;  %1121 = vmatmul.mubr.bf16.gmra.mxu1 %v462_v56  ;;  %v477_v56 = vpack.c.bf16 %v432_v55, %v431_v54 }
  0x9d   : > { %777 = vmatprep.mubr.bf16.mxu0 %v9039_v0  ;;  %1130 = vmatprep.mubr.bf16.mxu1 %v9039_v0 }
  0x9e   : > { %3152 = vmatpush1.bf16.msra.mxu0 %v4427_v57  ;;  %3441 = vmatpush1.bf16.msra.mxu1 %v4428_v58  ;;  %v433_v57 = vld [vmem:[%s5336_s9 + $0x130] sm:$0xff]  ;;  %v434_v58 = vld [vmem:[%s5336_s9 + $0x138] sm:$0xff] }
  0x9f   : > { %3153 = vmatprep.subr.bf16.mxu0 %v9039_v0  ;;  %3442 = vmatprep.subr.bf16.mxu1 %v9039_v0  ;;  %v478_v59 = vpack.c.bf16 %v434_v58, %v433_v57 }
  0xa2   : > { %3154 = vmatpush1.bf16.msra.mxu0 %v4429_v61  ;;  %3443 = vmatpush1.bf16.msra.mxu1 %v4430_v62  ;;  %v4446_v61 = vld [vmem:[#allocation9 + $0xc0] sm:$0xff]  }
  0xa3   : > { %3155 = vmatprep.subr.bf16.mxu0 %v9039_v0  ;;  %3444 = vmatprep.subr.bf16.mxu1 %v9039_v0  ;;  %v435_v62 = vld [vmem:[%s5336_s9 + $0x140] sm:$0xff] }
  0xa4   : > { %778 = vmatmul.mubr.bf16.gmra.mxu0 %v463_v63  ;;  %1131 = vmatmul.mubr.bf16.gmra.mxu1 %v463_v63  ;;  %v436_v63 = vld [vmem:[%s5336_s9 + $0x148] sm:$0xff] }
  0xa5   : > { %787 = vmatprep.mubr.bf16.mxu0 %v9039_v0  ;;  %1140 = vmatprep.mubr.bf16.mxu1 %v9039_v0 }
  0xa6   : > { %3156 = vmatpush2.bf16.msra.mxu0 %v4431_v1  ;;  %3445 = vmatpush2.bf16.msra.mxu1 %v4432_v2  ;;  %v479_v1 = vpack.c.bf16 %v436_v63, %v435_v62  ;;  %v437_v2 = vld [vmem:[%s5336_s9 + $0x150] sm:$0xff] }
  0xa7   : > { %3157 = vmatprep.subr.bf16.mxu0 %v9039_v0  ;;  %3446 = vmatprep.subr.bf16.mxu1 %v9039_v0  ;;  %v480_v4 = vpack.c.bf16 %v438_v3, %v437_v2 }
  0xaa   : > { %3158 = vmatpush2.bf16.msra.mxu0 %v4433_v5  ;;  %3447 = vmatpush2.bf16.msra.mxu1 %v4434_v6  ;;  %v439_v5 = vld [vmem:[%s5336_s9 + $0x160] sm:$0xff]  ;;  %v440_v6 = vld [vmem:[%s5336_s9 + $0x168] sm:$0xff] }
  0xab   : > { %3159 = vmatprep.subr.bf16.mxu0 %v9039_v0  ;;  %3448 = vmatprep.subr.bf16.mxu1 %v9039_v0 }
  0xac   : > { %788 = vmatmul.mubr.bf16.gmra.mxu0 %v464_v7  ;;  %1141 = vmatmul.mubr.bf16.gmra.mxu1 %v464_v7  ;;  %v481_v7 = vpack.c.bf16 %v440_v6, %v439_v5 }
  0xad   : > { %797 = vmatprep.mubr.bf16.mxu0 %v9039_v0  ;;  %1150 = vmatprep.mubr.bf16.mxu1 %v9039_v0 }
  0xae   : > { %3160 = vmatpush2.bf16.msra.mxu0 %v4435_v8  ;;  %3449 = vmatpush2.bf16.msra.mxu1 %v4436_v9  ;;  %v441_v8 = vld [vmem:[%s5336_s9 + $0x170] sm:$0xff]  ;;  %v442_v9 = vld [vmem:[%s5336_s9 + $0x178] sm:$0xff] }
  0xaf   : > { %3161 = vmatprep.subr.bf16.mxu0 %v9039_v0  ;;  %3450 = vmatprep.subr.bf16.mxu1 %v9039_v0  ;;  %v482_v10 = vpack.c.bf16 %v442_v9, %v441_v8 }
  0xb2   : > { %3162 = vmatpush2.bf16.msra.mxu0 %v4437_v13  ;;  %3451 = vmatpush2.bf16.msra.mxu1 %v4438_v14  ;;  %v525_v14 = vlaneseq }
  0xb3   : > { %3163 = vmatprep.subr.bf16.mxu0 %v9039_v0  ;;  %3452 = vmatprep.subr.bf16.mxu1 %v9039_v0 }
  0xb4   : > { %798 = vmatmul.mubr.bf16.gmra.mxu0 %v465_v12  ;;  %1151 = vmatmul.mubr.bf16.gmra.mxu1 %v465_v12  ;;  %v444_v12 = vld [vmem:[%s5336_s9 + $0x188] sm:$0xff]  ;;  %v526_v21 = vshrl.u32 %v525_v14, 7 }
  0xb5   : > { %807 = vmatprep.mubr.bf16.mxu0 %v9039_v0  ;;  %1160 = vmatprep.mubr.bf16.mxu1 %v9039_v0  ;;  %v483_v13 = vpack.c.bf16 %v444_v12, %v443_v11  ;;  %v452_v14 = vld [vmem:[%s5336_s9 + $0x1c8] sm:$0xff] }
  0xb6   : > { %3164 = vmatpush2.bf16.msra.mxu0 %v4439_v30  ;;  %3453 = vmatpush2.bf16.msra.mxu1 %v4440_v31  ;;  %v527_v27 = vsub.s32 0, %v526_v21  ;;  %v531_v32 = vsub.s32 1, %v526_v21 }
  0xb7   : > { %3165 = vmatprep.subr.bf16.mxu0 %v9039_v0  ;;  %3454 = vmatprep.subr.bf16.mxu1 %v9039_v0 }
  0xb8   : > { %v5496_v43 = vrot.slane %v523_v28, %v531_v32  ;;  %v457_v32 = vld [vmem:[%s5336_s9 + $0x1f0] sm:$0xff] }
  0xba   : > { %3166 = vmatpush2.bf16.msra.mxu0 %v4441_v38  ;;  %3455 = vmatpush2.bf16.msra.mxu1 %v4442_v39  ;;  %v539_v38 = vsub.s32 3, %v526_v21 }
  0xbb   : > { %3167 = vmatprep.subr.bf16.mxu0 %v9039_v0  ;;  %3456 = vmatprep.subr.bf16.mxu1 %v9039_v0 }
  0xbc   : > { %808 = vmatmul.mubr.bf16.gmra.mxu0 %v466_v17  ;;  %1161 = vmatmul.mubr.bf16.gmra.mxu1 %v466_v17  ;;  %v445_v17 = vld [vmem:[%s5336_s9 + $0x190] sm:$0xff]  ;;  %v5505_v47 = vrot.slane %v523_v28, %v539_v38 }
  0xbd   : > { %817 = vmatprep.mubr.bf16.mxu0 %v9039_v0  ;;  %1170 = vmatprep.mubr.bf16.mxu1 %v9039_v0  ;;  %v484_v24 = vpack.c.bf16 %v446_v18, %v445_v17 }
  0xbe   : > { %3168 = vmatpush2.bf16.msra.mxu0 %v4443_v51  ;;  %3457 = vmatpush2.bf16.msra.mxu1 %v4444_v52  ;;  %v449_v52 = vld [vmem:[%s5336_s9 + $0x1b0] sm:$0xff] }
  0xbf   : > { %3169 = vmatprep.subr.bf16.mxu0 %v9039_v0  ;;  %3458 = vmatprep.subr.bf16.mxu1 %v9039_v0 }
  0xc2   : > { %3170 = vmatpush2.bf16.msra.mxu0 %v4445_v60  ;;  %3459 = vmatpush2.bf16.msra.mxu1 %v4446_v61 }
  0xc4   : > { %818 = vmatmul.mubr.bf16.gmra.mxu0 %v467_v20  ;;  %1171 = vmatmul.mubr.bf16.gmra.mxu1 %v467_v20 }
  0xc5   : > { %827 = vmatprep.mubr.bf16.mxu0 %v9039_v0  ;;  %1180 = vmatprep.mubr.bf16.mxu1 %v9039_v0 }
  0xcc   : > { %828 = vmatmul.mubr.bf16.gmra.mxu0 %v468_v23  ;;  %1181 = vmatmul.mubr.bf16.gmra.mxu1 %v468_v23 }
  0xcd   : > { %837 = vmatprep.mubr.bf16.mxu0 %v9039_v0  ;;  %1190 = vmatprep.mubr.bf16.mxu1 %v9039_v0 }
  0xd4   : > { %838 = vmatmul.mubr.bf16.gmra.mxu0 %v469_v26  ;;  %1191 = vmatmul.mubr.bf16.gmra.mxu1 %v469_v26 }
  0xd5   : > { %847 = vmatprep.mubr.bf16.mxu0 %v9039_v0  ;;  %1200 = vmatprep.mubr.bf16.mxu1 %v9039_v0 }
  0xdc   : > { %848 = vmatmul.mubr.bf16.gmra.mxu0 %v470_v29  ;;  %1201 = vmatmul.mubr.bf16.gmra.mxu1 %v470_v29  ;;  %v535_v29 = vsub.s32 2, %v526_v21 }
  0xdd   : > { %857 = vmatprep.mubr.bf16.mxu0 %v9039_v0  ;;  %1210 = vmatprep.mubr.bf16.mxu1 %v9039_v0 }
  0xde   : > { %v5494_v39 = vrot.slane %v523_v28, %v535_v29 }
  0xe4   : > { %858 = vmatmul.mubr.bf16.gmra.mxu0 %v471_v34  ;;  %1211 = vmatmul.mubr.bf16.gmra.mxu1 %v471_v34  ;;  %v448_v34 = vld [vmem:[%s5336_s9 + $0x1a8] sm:$0xff] }
  0xe5   : > { %867 = vmatprep.mubr.bf16.mxu0 %v9039_v0  ;;  %1220 = vmatprep.mubr.bf16.mxu1 %v9039_v0 }
  0xec   : > { %868 = vmatmul.mubr.bf16.gmra.mxu0 %v472_v37  ;;  %1221 = vmatmul.mubr.bf16.gmra.mxu1 %v472_v37  ;;  %v5492_v37 = vrot.slane %v523_v28, %v527_v27  ;;  %v454_v27 = vld [vmem:[%s5336_s9 + $0x1d8] sm:$0xff]  ;;  %v455_v28 = vld [vmem:[%s5336_s9 + $0x1e0] sm:$0xff] }
  0xed   : > { %877 = vmatprep.mubr.bf16.mxu0 %v9039_v0  ;;  %1230 = vmatprep.mubr.bf16.mxu1 %v9039_v0 }
  0xf4   : > { %878 = vmatmul.mubr.bf16.gmra.mxu0 %v473_v42  ;;  %1231 = vmatmul.mubr.bf16.gmra.mxu1 %v473_v42  ;;  %v485_v42 = vpack.c.bf16 %v448_v34, %v447_v33  ;;  %v458_v33 = vld [vmem:[%s5336_s9 + $0x1f8] sm:$0xff] }
  0xf5   : > { %887 = vmatprep.mubr.bf16.mxu0 %v9039_v0  ;;  %1240 = vmatprep.mubr.bf16.mxu1 %v9039_v0 }
  0xfc   : > { %888 = vmatmul.mubr.bf16.gmra.mxu0 %v474_v45  ;;  %1241 = vmatmul.mubr.bf16.gmra.mxu1 %v474_v45 }
  0xfd   : > { %897 = vmatprep.mubr.bf16.mxu0 %v9039_v0  ;;  %1250 = vmatprep.mubr.bf16.mxu1 %v9039_v0 }
 0x104   : > { %898 = vmatmul.mubr.bf16.gmra.mxu0 %v475_v48  ;;  %1251 = vmatmul.mubr.bf16.gmra.mxu1 %v475_v48 }
 0x105   : > { %907 = vmatprep.mubr.bf16.mxu0 %v9039_v0  ;;  %1260 = vmatprep.mubr.bf16.mxu1 %v9039_v0 }
 0x10c   : > { %908 = vmatmul.mubr.bf16.gmra.mxu0 %v476_v53  ;;  %1261 = vmatmul.mubr.bf16.gmra.mxu1 %v476_v53  ;;  %v450_v53 = vld [vmem:[%s5336_s9 + $0x1b8] sm:$0xff] }
 0x10d   : > { %917 = vmatprep.mubr.bf16.mxu0 %v9039_v0  ;;  %1270 = vmatprep.mubr.bf16.mxu1 %v9039_v0  ;;  %v486_v62 = vpack.c.bf16 %v450_v53, %v449_v52 }
 0x114   : > { %918 = vmatmul.mubr.bf16.gmra.mxu0 %v477_v56  ;;  %1271 = vmatmul.mubr.bf16.gmra.mxu1 %v477_v56 }
 0x115   : > { %927 = vmatprep.mubr.bf16.mxu0 %v9039_v0  ;;  %1280 = vmatprep.mubr.bf16.mxu1 %v9039_v0 }
 0x11c   : > { %928 = vmatmul.mubr.bf16.gmra.mxu0 %v478_v59  ;;  %1281 = vmatmul.mubr.bf16.gmra.mxu1 %v478_v59 }
 0x11d   : > { %937 = vmatprep.mubr.bf16.mxu0 %v9039_v0  ;;  %1290 = vmatprep.mubr.bf16.mxu1 %v9039_v0 }
 0x124   : > { %938 = vmatmul.mubr.bf16.gmra.mxu0 %v479_v1  ;;  %1291 = vmatmul.mubr.bf16.gmra.mxu1 %v479_v1 }
 0x125   : > { %947 = vmatprep.mubr.bf16.mxu0 %v9039_v0  ;;  %1300 = vmatprep.mubr.bf16.mxu1 %v9039_v0 }
 0x12c   : > { %948 = vmatmul.mubr.bf16.gmra.mxu0 %v480_v4  ;;  %1301 = vmatmul.mubr.bf16.gmra.mxu1 %v480_v4 }
 0x12d   : > { %957 = vmatprep.mubr.bf16.mxu0 %v9039_v0  ;;  %1310 = vmatprep.mubr.bf16.mxu1 %v9039_v0 }
 0x134   : > { %958 = vmatmul.mubr.bf16.gmra.mxu0 %v481_v7  ;;  %1311 = vmatmul.mubr.bf16.gmra.mxu1 %v481_v7 }
 0x135   : > { %967 = vmatprep.mubr.bf16.mxu0 %v9039_v0  ;;  %1320 = vmatprep.mubr.bf16.mxu1 %v9039_v0 }
 0x13c   : > { %968 = vmatmul.mubr.bf16.gmra.mxu0 %v482_v10  ;;  %1321 = vmatmul.mubr.bf16.gmra.mxu1 %v482_v10 }
 0x13d   : > { %977 = vmatprep.mubr.bf16.mxu0 %v9039_v0  ;;  %1330 = vmatprep.mubr.bf16.mxu1 %v9039_v0 }
 0x144   : > { %v739_v15 = vpop.f32.mrf.mxu0  ;;  %978 = vmatmul.mubr.bf16.gmra.mxu0 %v483_v13  ;;  %v1092_v16 = vpop.f32.mrf.mxu1  ;;  %1331 = vmatmul.mubr.bf16.gmra.mxu1 %v483_v13  ;;  %v451_v13 = vld [vmem:[%s5336_s9 + $0x1c0] sm:$0xff] }
 0x145   : > { %987 = vmatprep.mubr.bf16.mxu0 %v9039_v0  ;;  %1340 = vmatprep.mubr.bf16.mxu1 %v9039_v0  ;;  %v5503_v46 = vadd.f32 %v739_v15, %v5492_v37  ;;  %v5508_v48 = vadd.f32 %v1092_v16, %v5494_v39 }
 0x146   : > { %v741_v19 = vpop.f32.mrf.mxu0  ;;  %v1094_v20 = vpop.f32.mrf.mxu1 }
 0x147   : > { %v5515_v51 = vadd.f32 %v741_v19, %v5496_v43  ;;  %v1667_v57 = vmul.f32 0.70710677, %v5503_v46  ;;  %v5530_v58 = vadd.f32 %v1094_v20, %v5505_v47  ;;  %v1669_v59 = vmul.f32 0.70710677, %v5508_v48 }
 0x148   : > { %v743_v22 = vpop.f32.mrf.mxu0  ;;  %v1096_v23 = vpop.f32.mrf.mxu1 }
 0x149   : > { %v5522_v54 = vadd.f32 %v743_v22, %v5492_v37  ;;  %v1668_v63 = vmul.f32 0.70710677, %v5515_v51  ;;  %v5539_v1 = vadd.f32 %v1096_v23, %v5494_v39  ;;  %4447 = verf.f32 %v1667_v57 }
 0x14a   : > { %v745_v25 = vpop.f32.mrf.mxu0  ;;  %v1098_v26 = vpop.f32.mrf.mxu1  ;;  %v1670_v6 = vmul.f32 0.70710677, %v5530_v58  ;;  %4449 = verf.f32 %v1669_v59  ;;  %v5610_v57 = vpack.c.bf16 %v458_v33, %v457_v32  ;;  %v5613_v59 = vmul.f32 0.5, %v5503_v46 }
 0x14b   : > { %v1671_v2 = vmul.f32 0.70710677, %v5522_v54  ;;  %v5543_v3 = vadd.f32 %v745_v25, %v5496_v43  ;;  %v5551_v7 = vadd.f32 %v1098_v26, %v5505_v47  ;;  %4451 = verf.f32 %v1668_v63  ;;  %v453_v26 = vld [vmem:[%s5336_s9 + $0x1d0] sm:$0xff] }
 0x14c   : > { %v749_v30 = vpop.f32.mrf.mxu0  ;;  %988 = vmatmul.mubr.bf16.gmra.mxu0 %v484_v24  ;;  %v1102_v31 = vpop.f32.mrf.mxu1  ;;  %1341 = vmatmul.mubr.bf16.gmra.mxu1 %v484_v24  ;;  %v1673_v11 = vmul.f32 0.70710677, %v5539_v1  ;;  %v487_v25 = vpack.c.bf16 %v452_v14, %v451_v13  ;;  %v5635_v14 = vmul.f32 0.5, %v5522_v54 }
 0x14d   : > { %997 = vmatprep.mubr.bf16.mxu0 %v9039_v0  ;;  %1350 = vmatprep.mubr.bf16.mxu1 %v9039_v0  ;;  %v5554_v8 = vadd.f32 %v749_v30, %v5492_v37  ;;  %v5562_v12 = vadd.f32 %v1102_v31, %v5494_v39  ;;  %4453 = verf.f32 %v1671_v2  ;;  %v1672_v15 = vmul.f32 0.70710677, %v5543_v3  ;;  %v456_v31 = vld [vmem:[%s5336_s9 + $0x1e8] sm:$0xff] }
 0x14e   : > { %v751_v35 = vpop.f32.mrf.mxu0  ;;  %v5490_v36 = vpop.f32.mrf.mxu1  ;;  %4455 = verf.f32 %v1670_v6  ;;  %v1674_v19 = vmul.f32 0.70710677, %v5551_v7  ;;  %v5608_v53 = vpack.c.bf16 %v456_v31, %v455_v28  ;;  %v5620_v2 = vmul.f32 0.5, %v5508_v48 }
 0x14f   : > { %v5570_v16 = vadd.f32 %v751_v35, %v5496_v43  ;;  %v1675_v21 = vmul.f32 0.70710677, %v5554_v8  ;;  %4457 = verf.f32 %v1673_v11  ;;  %v1677_v29 = vmul.f32 0.70710677, %v5562_v12 }
 0x150   : > { %v753_v40 = vpop.f32.mrf.mxu0  ;;  %v1106_v41 = vpop.f32.mrf.mxu1  ;;  %v1105_v30 = vadd.f32 %v5490_v36, %v5505_v47  ;;  %4459 = verf.f32 %v1672_v15  ;;  %v5623_v6 = vmul.f32 0.5, %v5515_v51  ;;  %v5638_v48 = vmul.f32 0.5, %v5539_v1 }
 0x151   : > { %v5578_v20 = vadd.f32 %v753_v40, %v5492_v37  ;;  %v5582_v22 = vadd.f32 %v1106_v41, %v5494_v39  ;;  %v1676_v34 = vmul.f32 0.70710677, %v5570_v16  ;;  %4461 = verf.f32 %v1674_v19 }
 0x152   : > { %v5498_v44 = vpop.f32.mrf.mxu0  ;;  %v5500_v45 = vpop.f32.mrf.mxu1  ;;  %v488_v41 = vpack.c.bf16 %v454_v27, %v453_v26  ;;  %4463 = verf.f32 %v1675_v21  ;;  %v5641_v15 = vmul.f32 0.5, %v5543_v3  ;;  %v5653_v1 = vmul.f32 0.5, %v5554_v8 }
 0x153   : > { %v1679_v40 = vmul.f32 0.70710677, %v5578_v20  ;;  %4465 = verf.f32 %v1677_v29  ;;  %v756_v63 = vadd.f32 %v5498_v44, %v5496_v43  ;;  %v1109_v46 = vadd.f32 %v5500_v45, %v5505_v47 }
 0x154   : > { %v5510_v49 = vpop.f32.mrf.mxu0  ;;  %998 = vmatmul.mubr.bf16.gmra.mxu0 %v485_v42  ;;  %v5512_v50 = vpop.f32.mrf.mxu1  ;;  %1351 = vmatmul.mubr.bf16.gmra.mxu1 %v485_v42  ;;  %v1681_v42 = vmul.f32 0.70710677, %v5582_v22  ;;  %4467 = verf.f32 %v1676_v34  ;;  %v5632_v44 = vmul.f32 0.5, %v5530_v58  ;;  %v5644_v45 = vmul.f32 0.5, %v5551_v7 }
 0x155   : > { %1007 = vmatprep.mubr.bf16.mxu0 %v9039_v0  ;;  %1360 = vmatprep.mubr.bf16.mxu1 %v9039_v0  ;;  %4469 = verf.f32 %v1679_v40  ;;  %v760_v19 = vadd.f32 %v5510_v49, %v5492_v37  ;;  %v1113_v3 = vadd.f32 %v5512_v50, %v5494_v39  ;;  %v5658_v7 = vmul.f32 0.5, %v5562_v12 }
 0x156   : > { %v5524_v55 = vpop.f32.mrf.mxu0  ;;  %v5526_v56 = vpop.f32.mrf.mxu1  ;;  %4471 = verf.f32 %v1681_v42  ;;  %v5661_v27 = vmul.f32 0.5, %v5570_v16  ;;  %v1682_v49 = vmul.f32 0.70710677, %v1109_v46  ;;  %v5669_v32 = vmul.f32 0.5, %v1105_v30 }
 0x157   : > { %v4448_v51 = vpop.eup %4447  ;;  %v762_v28 = vadd.f32 %v5524_v55, %v5496_v43  ;;  %v5672_v50 = vmul.f32 0.5, %v5578_v20  ;;  %v5675_v12 = vmul.f32 0.5, %v5582_v22  ;;  %v5681_v55 = vmul.f32 0.5, %v756_v63 }
 0x158   : > { %v5533_v60 = vpop.f32.mrf.mxu0  ;;  %v5535_v61 = vpop.f32.mrf.mxu1  ;;  %v2179_v34 = vadd.f32 1.0, %v4448_v51  ;;  %v1683_v40 = vmul.f32 0.70710677, %v760_v19  ;;  %v1115_v42 = vadd.f32 %v5526_v56, %v5505_v47 }
 0x159   : > { %v4450_v54 = vpop.eup %4449  ;;  %v5679_v16 = vadd.f32 %v5533_v60, %v5492_v37  ;;  %v1685_v60 = vmul.f32 0.70710677, %v1113_v3  ;;  %v5695_v56 = vadd.f32 %v5535_v61, %v5494_v39 }
 0x15a   : > { %v5545_v4 = vpop.f32.mrf.mxu0  ;;  %v5547_v5 = vpop.f32.mrf.mxu1  ;;  %v2181_v22 = vadd.f32 1.0, %v4450_v54  ;;  %v1686_v61 = vmul.f32 0.70710677, %v1115_v42 }
 0x15b   : > { %v4452_v26 = vpop.eup %4451 }
 0x15c   : > { %v5556_v9 = vpop.f32.mrf.mxu0  ;;  %1008 = vmatmul.mubr.bf16.gmra.mxu0 %v486_v62  ;;  %v5558_v10 = vpop.f32.mrf.mxu1  ;;  %1361 = vmatmul.mubr.bf16.gmra.mxu1 %v486_v62  ;;  %v1678_v62 = vmul.f32 0.70710677, %v1105_v30 }
 0x15d   : > { %1017 = vmatprep.mubr.bf16.mxu0 %v9039_v0  ;;  %1370 = vmatprep.mubr.bf16.mxu1 %v9039_v0  ;;  %v4454_v31 = vpop.eup %4453 }
 0x15e   : > { %v5572_v17 = vpop.f32.mrf.mxu0  ;;  %v5574_v18 = vpop.f32.mrf.mxu1  ;;  %4473 = verf.f32 %v1678_v62  ;;  %v5689_v62 = vmul.f32 0.5, %v1109_v46  ;;  %v2183_v51 = vadd.f32 1.0, %v4454_v31  ;;  %v2180_v46 = vadd.f32 1.0, %v4452_v26 }
 0x15f   : > { %v4456_v33 = vpop.eup %4455  ;;  %v5705_v31 = vmul.f32 %v2179_v34, %v5613_v59  ;;  %v5714_v26 = vmul.f32 %v2181_v22, %v5620_v2 }
 0x160   : > { %v5584_v23 = vpop.f32.mrf.mxu0  ;;  %v5586_v24 = vpop.f32.mrf.mxu1  ;;  %v5721_v34 = vmul.f32 %v2183_v51, %v5635_v14  ;;  %v5740_v51 = vmul.f32 0.5, %v1115_v42  ;;  %v5756_v42 = vmul.f32 0.5, %v5679_v16 }
 0x161   : > { %9123 = vst [vmem:[#allocation23_spill] sm:$0xff] %v5705_v31 }
 0x162   : > { %v5598_v35 = vpop.f32.mrf.mxu0  ;;  %v5600_v38 = vpop.f32.mrf.mxu1 }
 0x164   : > { %v5604_v52 = vpop.f32.mrf.mxu0  ;;  %1018 = vmatmul.mubr.bf16.gmra.mxu0 %v487_v25  ;;  %v5606_v36 = vpop.f32.mrf.mxu1  ;;  %1371 = vmatmul.mubr.bf16.gmra.mxu1 %v487_v25  ;;  %v1680_v25 = vmul.f32 0.70710677, %v756_v63 }
 0x165   : > { %1027 = vmatprep.mubr.bf16.mxu0 %v9039_v0  ;;  %1380 = vmatprep.mubr.bf16.mxu1 %v9039_v0  ;;  %v4458_v63 = vpop.eup %4457 }
 0x166   : > { %v5627_v11 = vpop.f32.mrf.mxu0  ;;  %v5629_v13 = vpop.f32.mrf.mxu1  ;;  %4475 = verf.f32 %v1680_v25  ;;  %v2182_v25 = vadd.f32 1.0, %v4456_v33  ;;  %v5718_v33 = vadd.f32 %v5545_v4, %v5496_v43 }
 0x167   : > { %4477 = verf.f32 %v1682_v49  ;;  %v4460_v54 = vpop.eup %4459  ;;  %v5707_v49 = vmul.f32 0.5, %v1113_v3  ;;  %v1689_v3 = vmul.f32 0.70710677, %v5695_v56 }
 0x168   : > { %v5648_v58 = vpop.f32.mrf.mxu0  ;;  %v5650_v21 = vpop.f32.mrf.mxu1  ;;  %4479 = verf.f32 %v1683_v40  ;;  %v5726_v40 = vadd.f32 %v5547_v5, %v5505_v47  ;;  %v5736_v4 = vmul.f32 %v2182_v25, %v5632_v44  ;;  %v2184_v14 = vadd.f32 1.0, %v4460_v54 }
 0x169   : > { %9116 = vst [vmem:[#allocation16_spill] sm:$0xff] %v5650_v21  ;;  %4481 = verf.f32 %v1685_v60  ;;  %v5733_v60 = vmul.f32 %v2180_v46, %v5623_v6  ;;  %v5744_v5 = vadd.f32 %v5556_v9, %v5492_v37  ;;  %v1688_v54 = vmul.f32 0.70710677, %v5718_v33 }
 0x16a   : > { %v5665_v29 = vpop.f32.mrf.mxu0  ;;  %v5667_v8 = vpop.f32.mrf.mxu1  ;;  %9126 = vst [vmem:[#allocation26_spill] sm:$0xff] %v5736_v4  ;;  %v9129_v9 = vmov 0   ;;  %v5778_v25 = vadd.f32 %v5584_v23, %v5492_v37 }
 0x16b   : > { %9117 = vst [vmem:[#allocation17_spill] sm:$0xff] %v5665_v29  ;;  %9118 = vst [vmem:[#allocation18_spill] sm:$0xff] %v5667_v8  ;;  %v1684_v8 = vmul.f32 0.70710677, %v762_v28  ;;  %v1687_v29 = vmul.f32 0.70710677, %v5679_v16 }
 0x16c   : > { %v5685_v30 = vpop.f32.mrf.mxu0  ;;  %1028 = vmatmul.mubr.bf16.gmra.mxu0 %v488_v41  ;;  %v5687_v20 = vpop.f32.mrf.mxu1  ;;  %1381 = vmatmul.mubr.bf16.gmra.mxu1 %v488_v41 }
 0x16d   : > { %9119 = vst [vmem:[#allocation19_spill] sm:$0xff] %v5685_v30  ;;  %9120 = vst [vmem:[#allocation20_spill] sm:$0xff] %v5687_v20  ;;  %1037 = vmatprep.mubr.bf16.mxu0 %v9039_v0  ;;  %1390 = vmatprep.mubr.bf16.mxu1 %v9039_v0  ;;  %v5701_v20 = vmul.f32 0.5, %v760_v19  ;;  %v4462_v0 = vpop.eup %4461  ;;  %v2185_v19 = vadd.f32 1.0, %v4458_v63  ;;  %4483 = verf.f32 %v1684_v8  ;;  %v5738_v63 = vmul.f32 0.5, %v762_v28 }
 0x16e   : > { %v5697_v30 = vpop.f32.mrf.mxu0  ;;  %v5699_v41 = vpop.f32.mrf.mxu1  ;;  %4485 = verf.f32 %v1687_v29  ;;  %v2186_v28 = vadd.f32 1.0, %v4462_v0 }
 0x16f   : > { %9121 = vst [vmem:[#allocation21_spill] sm:$0xff] %v5697_v30  ;;  %9122 = vst [vmem:[#allocation22_spill] sm:$0xff] %v5699_v41  ;;  %v4464_v41 = vpop.eup %4463  ;;  %4487 = verf.f32 %v1686_v61  ;;  %v5753_v29 = vmul.f32 %v2185_v19, %v5638_v48  ;;  %v5766_v48 = vadd.f32 %v5558_v10, %v5494_v39  ;;  %v5773_v61 = vmul.f32 %v2184_v14, %v5641_v15 }
 0x170   : > { %v5709_v21 = vpop.f32.mrf.mxu0  ;;  %v5711_v30 = vpop.f32.mrf.mxu1  ;;  %4489 = verf.f32 %v1689_v3  ;;  %v2187_v19 = vadd.f32 1.0, %v4464_v41  ;;  %v1691_v3 = vmul.f32 0.70710677, %v5744_v5  ;;  %v5788_v41 = vadd.f32 %v5586_v24, %v5494_v39 }
 0x171   : > { %9124 = vst [vmem:[#allocation24_spill] sm:$0xff] %v5711_v30  ;;  %v4466_v59 = vpop.eup %4465  ;;  %4491 = verf.f32 %v1688_v54  ;;  %v1693_v23 = vmul.f32 0.70710677, %v5766_v48  ;;  %v5796_v14 = vadd.f32 %v5572_v17, %v5496_v43 }
 0x172   : > { %v5728_v30 = vpop.f32.mrf.mxu0  ;;  %v5730_v2 = vpop.f32.mrf.mxu1 }
 0x173   : > { %9125 = vst [vmem:[#allocation25_spill] sm:$0xff] %v5730_v2  ;;  %v4468_v22 = vpop.eup %4467 }
 0x174   : > { %v4470_v8 = vpop.eup %4469  ;;  %v5746_v2 = vpop.f32.mrf.mxu0  ;;  %1038 = vmatmul.mubr.bf16.gmra.mxu0 %v5608_v53  ;;  %1391 = vmatmul.mubr.bf16.gmra.mxu1 %v5608_v53  ;;  %v1690_v53 = vmul.f32 0.70710677, %v5726_v40 }
 0x175   : > { %9127 = vst [vmem:[#allocation27_spill] sm:$0xff] %v5746_v2  ;;  %v5749_v6 = vpop.f32.mrf.mxu1  ;;  %v4472_v44 = vpop.eup %4471  ;;  %1047 = vmatprep.mubr.bf16.mxu0 %v9129_v9  ;;  %1400 = vmatprep.mubr.bf16.mxu1 %v9129_v9  ;;  %v2189_v9 = vadd.f32 1.0, %v4466_v59  ;;  %v2191_v4 = vadd.f32 1.0, %v4470_v8 }
 0x176   : > { %9128 = vst [vmem:[#allocation28_spill] sm:$0xff] %v5749_v6  ;;  %v4474_v46 = vpop.eup %4473  ;;  %v5768_v0 = vpop.f32.mrf.mxu0  ;;  %v2188_v6 = vadd.f32 1.0, %v4468_v22  ;;  %v2193_v2 = vadd.f32 1.0, %v4472_v44  ;;  %v5791_v22 = vmul.f32 %v2186_v28, %v5644_v45  ;;  %4493 = verf.f32 %v1690_v53 }
 0x177   : > { %v5770_v16 = vpop.f32.mrf.mxu1  ;;  %v2190_v15 = vadd.f32 1.0, %v4474_v46  ;;  %v4476_v59 = vpop.eup %4475  ;;  %v5803_v46 = vmul.f32 %v2187_v19, %v5653_v1  ;;  %v5806_v24 = vmul.f32 %v2189_v9, %v5658_v7  ;;  %v5809_v45 = vmul.f32 %v2191_v4, %v5672_v50 }
 0x178   : > { %9130 = vst [vmem:[#allocation29_spill] sm:$0xff] %v5770_v16  ;;  %v5780_v10 = vpop.f32.mrf.mxu0  ;;  %v4478_v54 = vpop.eup %4477  ;;  %v1125_v28 = vadd.f32 %v5574_v18, %v5505_v47  ;;  %v5814_v17 = vmul.f32 %v2188_v6, %v5661_v27  ;;  %v5817_v53 = vmul.f32 %v2193_v2, %v5675_v12  ;;  %4495 = verf.f32 %v1691_v3 }
 0x179   : > { %v5782_v31 = vpop.f32.mrf.mxu1  ;;  %9131 = vst [vmem:[#allocation30_spill] sm:$0xff] %v5803_v46  ;;  %9132 = vst [vmem:[#allocation31_spill] sm:$0xff] %v5806_v24  ;;  %v1695_v16 = vmul.f32 0.70710677, %v5778_v25  ;;  %v4480_v50 = vpop.eup %4479  ;;  %v5827_v18 = vmul.f32 %v2190_v15, %v5669_v32  ;;  %v2192_v27 = vadd.f32 1.0, %v4476_v59  ;;  %v5830_v4 = vmul.f32 0.5, %v5695_v56 }
 0x17a   : > { %v5798_v8 = vpop.f32.mrf.mxu0  ;;  %9133 = vst [vmem:[#allocation32_spill] sm:$0xff] %v5814_v17  ;;  %v1697_v12 = vmul.f32 0.70710677, %v5788_v41  ;;  %v4482_v2 = vpop.eup %4481  ;;  %v2194_v6 = vadd.f32 1.0, %v4478_v54  ;;  %4497 = verf.f32 %v1693_v23  ;;  %v1692_v19 = vmul.f32 0.70710677, %v5796_v14 }
 0x17b   : > { %v5800_v44 = vpop.f32.mrf.mxu1  ;;  %9134 = vst [vmem:[#allocation33_spill] sm:$0xff] %v5827_v18  ;;  %v776_v9 = vadd.f32 %v5598_v35, %v5496_v43  ;;  %v4484_v32 = vpop.eup %4483  ;;  %v5843_v56 = vmul.f32 0.5, %v5718_v33  ;;  %v5846_v59 = vmul.f32 0.5, %v5726_v40  ;;  %v1694_v23 = vmul.f32 0.70710677, %v1125_v28 }
 0x17c   : > { %v5820_v1 = vpop.f32.mrf.mxu0  ;;  %1048 = vmatmul.mubr.bf16.gmra.mxu0 %v5610_v57  ;;  %1401 = vmatmul.mubr.bf16.gmra.mxu1 %v5610_v57  ;;  %v4486_v54 = vpop.eup %4485  ;;  %v2195_v35 = vadd.f32 1.0, %v4480_v50  ;;  %4499 = verf.f32 %v1695_v16  ;;  %v5857_v33 = vmul.f32 %v2192_v27, %v5681_v55  ;;  %v2197_v40 = vadd.f32 1.0, %v4482_v2 }
 0x17d   : > { %v5823_v7 = vpop.f32.mrf.mxu1  ;;  %v4488_v15 = vpop.eup %4487  ;;  %v5860_v46 = vmul.f32 0.5, %v5744_v5  ;;  %4501 = verf.f32 %v1697_v12  ;;  %v5863_v18 = vmul.f32 %v2194_v6, %v5689_v62  ;;  %v5866_v16 = vmul.f32 0.5, %v5766_v48 }
 0x17e   : > { %v5836_v3 = vpop.f32.mrf.mxu0  ;;  %4503 = verf.f32 %v1692_v19  ;;  %v4490_v24 = vpop.eup %4489  ;;  %v2196_v55 = vadd.f32 1.0, %v4484_v32  ;;  %v2199_v27 = vadd.f32 1.0, %v4486_v54  ;;  %v780_v5 = vadd.f32 %v5604_v52, %v5492_v37 }
 0x17f   : > { %9135 = vst [vmem:[#allocation34_spill] sm:$0xff] %v5836_v3  ;;  %v5838_v57 = vpop.f32.mrf.mxu1  ;;  %4505 = verf.f32 %v1694_v23  ;;  %v5875_v12 = vmul.f32 %v2195_v35, %v5701_v20  ;;  %v2198_v62 = vadd.f32 1.0, %v4488_v15  ;;  %v1133_v48 = vadd.f32 %v5606_v36, %v5494_v39  ;;  %v4492_v20 = vpop.eup %4491 }
 0x180   : > { %9136 = vst [vmem:[#allocation35_spill] sm:$0xff] %v5838_v57  ;;  %v1129_v57 = vadd.f32 %v5600_v38, %v5505_v47  ;;  %v5852_v3 = vpop.f32.mrf.mxu0  ;;  %v1696_v38 = vmul.f32 0.70710677, %v776_v9  ;;  %v5887_v32 = vmul.f32 0.5, %v5796_v14  ;;  %v5889_v23 = vmul.f32 0.5, %v1125_v28 }
 0x181   : > { %v5854_v17 = vpop.f32.mrf.mxu1  ;;  %9139 = vst [vmem:[#allocation38_spill] sm:$0xff] %v5875_v12  ;;  %v782_v52 = vadd.f32 %v5627_v11, %v5496_v43  ;;  %v2201_v15 = vadd.f32 1.0, %v4490_v24  ;;  %v5894_v54 = vmul.f32 0.5, %v5778_v25  ;;  %v784_v36 = vadd.f32 %v5648_v58, %v5492_v37 }
 0x182   : > { %9137 = vst [vmem:[#allocation36_spill] sm:$0xff] %v5854_v17  ;;  %v5868_v50 = vpop.f32.mrf.mxu0  ;;  %v1698_v2 = vmul.f32 0.70710677, %v1129_v57  ;;  %4507 = verf.f32 %v1696_v38  ;;  %v5903_v28 = vmul.f32 %v2196_v55, %v5738_v63  ;;  %v5909_v11 = vmul.f32 0.5, %v5788_v41  ;;  %v9150_v41 = vld [vmem:[#allocation16_spill] sm:$0xff] }
 0x183   : > { %v5870_v17 = vpop.f32.mrf.mxu1  ;;  %v4494_v14 = vpop.eup %4493  ;;  %v1699_v25 = vmul.f32 0.70710677, %v780_v5  ;;  %v5912_v24 = vmul.f32 %v2198_v62, %v5740_v51  ;;  %v1701_v58 = vmul.f32 0.70710677, %v1133_v48  ;;  %v1135_v38 = vadd.f32 %v5629_v13, %v5505_v47 }
 0x184   : > { %9138 = vst [vmem:[#allocation37_spill] sm:$0xff] %v5870_v17  ;;  %v5879_v6 = vpop.f32.mrf.mxu0  ;;  %v5884_v17 = vmul.f32 %v2197_v40, %v5707_v49  ;;  %9145 = vst [vmem:[#allocation44_spill] sm:$0xff] %v5903_v28  ;;  %v5906_v40 = vmul.f32 %v2199_v27, %v5756_v42  ;;  %4509 = verf.f32 %v1698_v2  ;;  %v2200_v55 = vadd.f32 1.0, %v4492_v20 }
 0x185   : > { %9140 = vst [vmem:[#allocation39_spill] sm:$0xff] %v5879_v6  ;;  %v5881_v19 = vpop.f32.mrf.mxu1  ;;  %9147 = vst [vmem:[#allocation46_spill] sm:$0xff] %v5912_v24  ;;  %v4496_v63 = vpop.eup %4495  ;;  %v5920_v42 = vmul.f32 0.5, %v776_v9  ;;  %v1700_v27 = vmul.f32 0.70710677, %v782_v52  ;;  %v5925_v51 = vmul.f32 %v2201_v15, %v5830_v4  ;;  %v2202_v62 = vadd.f32 1.0, %v4494_v14 }
 0x186   : > { %9141 = vst [vmem:[#allocation40_spill] sm:$0xff] %v5881_v19  ;;  %9142 = vst [vmem:[#allocation41_spill] sm:$0xff] %v5884_v17  ;;  %v5898_v35 = vpop.f32.mrf.mxu0  ;;  %v1137_v19 = vadd.f32 %v9150_v41, %v5494_v39  ;;  %v5927_v2 = vmul.f32 0.5, %v1129_v57  ;;  %v1703_v24 = vmul.f32 0.70710677, %v784_v36  ;;  %v5935_v20 = vmul.f32 0.5, %v780_v5 }
 0x187   : > { %9143 = vst [vmem:[#allocation42_spill] sm:$0xff] %v5898_v35  ;;  %v5900_v49 = vpop.f32.mrf.mxu1  ;;  %9146 = vst [vmem:[#allocation45_spill] sm:$0xff] %v5906_v40  ;;  %4511 = verf.f32 %v1699_v25  ;;  %v5937_v28 = vmul.f32 0.5, %v1133_v48  ;;  %v2203_v41 = vadd.f32 1.0, %v4496_v63  ;;  %v1702_v4 = vmul.f32 0.70710677, %v1135_v38 }
 0x188   : > { %9144 = vst [vmem:[#allocation43_spill] sm:$0xff] %v5900_v49  ;;  %v5916_v49 = vpop.f32.mrf.mxu0  ;;  %9151 = vst [vmem:[#allocation16_spill] sm:$0xff] %v5925_v51  ;;  %4513 = verf.f32 %v1701_v58  ;;  %v9154_v57 = vld [vmem:[#allocation17_spill] sm:$0xff]  ;;  %v5946_v6 = vmul.f32 %v2200_v55, %v5843_v56  ;;  %v1705_v5 = vmul.f32 0.70710677, %v1137_v19  ;;  %v9157_v25 = vld [vmem:[#allocation18_spill] sm:$0xff]  ;;  %v5953_v63 = vmul.f32 %v2202_v62, %v5846_v59 }
 0x189   : > { %9148 = vst [vmem:[#allocation47_spill] sm:$0xff] %v5916_v49  ;;  %v5918_v35 = vpop.f32.mrf.mxu1  ;;  %v786_v15 = vadd.f32 %v9154_v57, %v5496_v43  ;;  %4515 = verf.f32 %v1700_v27  ;;  %v1139_v48 = vadd.f32 %v9157_v25, %v5505_v47  ;;  %v5959_v55 = vmul.f32 0.5, %v782_v52  ;;  %v9160_v25 = vld [vmem:[#allocation19_spill] sm:$0xff] }
 0x18a   : > { %9149 = vst [vmem:[#allocation48_spill] sm:$0xff] %v5918_v35  ;;  %v5929_v13 = vpop.f32.mrf.mxu0  ;;  %v4498_v35 = vpop.eup %4497  ;;  %4517 = verf.f32 %v1703_v24  ;;  %v5961_v27 = vmul.f32 0.5, %v1135_v38  ;;  %v5963_v12 = vmul.f32 0.5, %v784_v36  ;;  %v790_v40 = vadd.f32 %v9160_v25, %v5492_v37  ;;  %v9164_v36 = vld [vmem:[#allocation20_spill] sm:$0xff] }
 0x18b   : > { %9152 = vst [vmem:[#allocation49_spill] sm:$0xff] %v5929_v13  ;;  %v5931_v49 = vpop.f32.mrf.mxu1  ;;  %v2205_v57 = vadd.f32 1.0, %v4498_v35  ;;  %v5968_v59 = vmul.f32 %v2203_v41, %v5860_v46  ;;  %4519 = verf.f32 %v1702_v4  ;;  %v1704_v24 = vmul.f32 0.70710677, %v786_v15 }
 0x18c   : > { %9153 = vst [vmem:[#allocation50_spill] sm:$0xff] %v5931_v49  ;;  %v5941_v14 = vpop.f32.mrf.mxu0  ;;  %v4500_v49 = vpop.eup %4499  ;;  %4521 = verf.f32 %v1705_v5  ;;  %v1706_v38 = vmul.f32 0.70710677, %v1139_v48  ;;  %v5979_v51 = vmul.f32 0.5, %v1137_v19  ;;  %v5983_v46 = vadd.f32 %v5709_v21, %v5492_v37  ;;  %v9170_v21 = vld [vmem:[#allocation21_spill] sm:$0xff] }
 0x18d   : > { %9155 = vst [vmem:[#allocation17_spill] sm:$0xff] %v5941_v14  ;;  %v5943_v13 = vpop.f32.mrf.mxu1  ;;  %v4502_v9 = vpop.eup %4501  ;;  %9161 = vst [vmem:[#allocation19_spill] sm:$0xff] %v5968_v59  ;;  %v2207_v35 = vadd.f32 1.0, %v4500_v49  ;;  %v5977_v17 = vmul.f32 %v2205_v57, %v5866_v16  ;;  %v5989_v5 = vmul.f32 0.5, %v786_v15  ;;  %4523 = verf.f32 %v1704_v24 }
 0x18e   : > { %9156 = vst [vmem:[#allocation51_spill] sm:$0xff] %v5943_v13  ;;  %v5955_v14 = vpop.f32.mrf.mxu0  ;;  %v4504_v56 = vpop.eup %4503  ;;  %v2209_v52 = vadd.f32 1.0, %v4502_v9  ;;  %v5998_v57 = vmul.f32 0.5, %v1139_v48  ;;  %4525 = verf.f32 %v1706_v38  ;;  %v1711_v24 = vmul.f32 0.70710677, %v5983_v46 }
 0x18f   : > { %9158 = vst [vmem:[#allocation18_spill] sm:$0xff] %v5955_v14  ;;  %v5957_v13 = vpop.f32.mrf.mxu1  ;;  %v4506_v58 = vpop.eup %4505  ;;  %v1143_v14 = vadd.f32 %v9164_v36, %v5494_v39  ;;  %9165 = vst [vmem:[#allocation20_spill] sm:$0xff] %v5977_v17  ;;  %v2204_v25 = vadd.f32 1.0, %v4504_v56  ;;  %v9168_v36 = vld [vmem:[#allocation24_spill] sm:$0xff]  ;;  %v5996_v19 = vmul.f32 %v2207_v35, %v5894_v54  ;;  %v792_v56 = vadd.f32 %v9170_v21, %v5496_v43 }
 0x190   : > { %9159 = vst [vmem:[#allocation52_spill] sm:$0xff] %v5957_v13  ;;  %v5970_v62 = vpop.f32.mrf.mxu0  ;;  %v4508_v9 = vpop.eup %4507  ;;  %v2206_v4 = vadd.f32 1.0, %v4506_v58  ;;  %v5993_v16 = vadd.f32 %v9168_v36, %v5494_v39  ;;  %v6007_v58 = vmul.f32 %v2209_v52, %v5909_v11  ;;  %v6017_v21 = vadd.f32 %v5728_v30, %v5496_v43  ;;  %v9178_v30 = vld [vmem:[#allocation25_spill] sm:$0xff] }
 0x191   : > { %9162 = vst [vmem:[#allocation53_spill] sm:$0xff] %v5970_v62  ;;  %v5972_v13 = vpop.f32.mrf.mxu1  ;;  %9169 = vst [vmem:[#allocation24_spill] sm:$0xff] %v5996_v19  ;;  %v4510_v15 = vpop.eup %4509  ;;  %v1709_v36 = vmul.f32 0.70710677, %v1143_v14  ;;  %v9173_v62 = vld [vmem:[#allocation22_spill] sm:$0xff]  ;;  %v6012_v35 = vmul.f32 %v2204_v25, %v5887_v32  ;;  %v2208_v48 = vadd.f32 1.0, %v4508_v9  ;;  %v2756_v38 = vpack.c.bf16 %v5773_v61, %v5733_v60 }
 0x192   : > { %9163 = vst [vmem:[#allocation54_spill] sm:$0xff] %v5972_v13  ;;  %v5985_v49 = vpop.f32.mrf.mxu0  ;;  %v1707_v13 = vmul.f32 0.70710677, %v790_v40  ;;  %v1145_v54 = vadd.f32 %v9173_v62, %v5505_v47  ;;  %v6024_v11 = vmul.f32 %v2206_v4, %v5889_v23  ;;  %v6026_v52 = vmul.f32 0.5, %v790_v40  ;;  %v9184_v60 = vld [vmem:[#allocation26_spill] sm:$0xff] }
 0x193   : > { %9166 = vst [vmem:[#allocation55_spill] sm:$0xff] %v5985_v49  ;;  %v5987_v41 = vpop.f32.mrf.mxu1  ;;  %9174 = vst [vmem:[#allocation22_spill] sm:$0xff] %v6012_v35  ;;  %v1713_v32 = vmul.f32 0.70710677, %v5993_v16  ;;  %v2210_v25 = vadd.f32 1.0, %v4510_v15  ;;  %v6033_v35 = vadd.f32 %v9178_v30, %v5505_v47  ;;  %v6044_v15 = vmul.f32 %v2208_v48, %v5920_v42  ;;  %v9183_v48 = vld [vmem:[#allocation28_spill] sm:$0xff]  ;;  %3171 = vmatprep.mubr.bf16.mxu0 %v2756_v38 }
 0x194   : > { %9167 = vst [vmem:[#allocation56_spill] sm:$0xff] %v5987_v41  ;;  %v6002_v49 = vpop.f32.mrf.mxu0  ;;  %9177 = vst [vmem:[#allocation60_spill] sm:$0xff] %v6024_v11  ;;  %4527 = verf.f32 %v1707_v13  ;;  %v4512_v62 = vpop.eup %4511  ;;  %v1708_v9 = vmul.f32 0.70710677, %v792_v56  ;;  %v6041_v13 = vmul.f32 0.5, %v1143_v14  ;;  %v6053_v14 = vmul.f32 0.5, %v792_v56 }
 0x195   : > { %9171 = vst [vmem:[#allocation21_spill] sm:$0xff] %v6002_v49  ;;  %v6004_v41 = vpop.f32.mrf.mxu1  ;;  %v4514_v23 = vpop.eup %4513  ;;  %4529 = verf.f32 %v1709_v36  ;;  %v1710_v4 = vmul.f32 0.70710677, %v1145_v54  ;;  %v1712_v30 = vmul.f32 0.70710677, %v6017_v21  ;;  %v2211_v40 = vadd.f32 1.0, %v4512_v62 }
 0x196   : > { %9172 = vst [vmem:[#allocation57_spill] sm:$0xff] %v6004_v41  ;;  %v6019_v41 = vpop.f32.mrf.mxu0  ;;  %v4516_v11 = vpop.eup %4515  ;;  %4531 = verf.f32 %v1711_v24  ;;  %v9182_v36 = vld [vmem:[#allocation27_spill] sm:$0xff]  ;;  %v1714_v42 = vmul.f32 0.70710677, %v6033_v35  ;;  %v6062_v24 = vadd.f32 %v9183_v48, %v5494_v39  ;;  %v2758_v61 = vpack.c.bf16 %v5791_v22, %v9184_v60 }
 0x197   : > { %9175 = vst [vmem:[#allocation58_spill] sm:$0xff] %v6019_v41  ;;  %v6021_v49 = vpop.f32.mrf.mxu1  ;;  %v4518_v19 = vpop.eup %4517  ;;  %4533 = verf.f32 %v1713_v32  ;;  %v6057_v17 = vadd.f32 %v9182_v36, %v5492_v37  ;;  %v6071_v62 = vmul.f32 %v2210_v25, %v5927_v2  ;;  %v2213_v36 = vadd.f32 1.0, %v4514_v23  ;;  %v9187_v48 = vld [vmem:[#allocation23_spill] sm:$0xff] }
 0x198   : > { %9176 = vst [vmem:[#allocation59_spill] sm:$0xff] %v6021_v49  ;;  %v6035_v41 = vpop.f32.mrf.mxu0  ;;  %4535 = verf.f32 %v1708_v9  ;;  %v4520_v32 = vpop.eup %4519  ;;  %v6075_v9 = vadd.f32 %v5768_v0, %v5496_v43  ;;  %v9188_v38 = vpack.c.bf16 %v5721_v34, %v9187_v48  ;;  %v2212_v22 = vadd.f32 1.0, %v4516_v11  ;;  %3460 = vmatprep.mubr.bf16.mxu1 %v2758_v61 }
 0x199   : > { %v6037_v49 = vpop.f32.mrf.mxu1  ;;  %4537 = verf.f32 %v1710_v4  ;;  %v2215_v60 = vadd.f32 1.0, %v4518_v19  ;;  %v6089_v0 = vmul.f32 %v2211_v40, %v5935_v20  ;;  %v6091_v23 = vmul.f32 0.5, %v1145_v54 }
 0x19a   : > { %9179 = vst [vmem:[#allocation25_spill] sm:$0xff] %v6037_v49  ;;  %v6049_v59 = vpop.f32.mrf.mxu0  ;;  %3172 = vmatmul.mubr.bf16.vlgmr.msra.gmra.mxu0 %v9188_v38  ;;  %4539 = verf.f32 %v1712_v30  ;;  %v1715_v34 = vmul.f32 0.70710677, %v6057_v17  ;;  %v6096_v19 = vadd.f32 %v5780_v10, %v5492_v37  ;;  %v9192_v11 = vpack.c.bf16 %v5753_v29, %v5714_v26 }
 0x19b   : > { %9180 = vst [vmem:[#allocation61_spill] sm:$0xff] %v6049_v59  ;;  %v6051_v49 = vpop.f32.mrf.mxu1  ;;  %v4522_v59 = vpop.eup %4521  ;;  %v6102_v4 = vmul.f32 0.5, %v5983_v46  ;;  %4541 = verf.f32 %v1714_v42  ;;  %v1717_v30 = vmul.f32 0.70710677, %v6062_v24  ;;  %v6107_v20 = vadd.f32 %v5782_v31, %v5494_v39 }
 0x19c   : > { %9181 = vst [vmem:[#allocation62_spill] sm:$0xff] %v6051_v49  ;;  %v6066_v49 = vpop.f32.mrf.mxu0  ;;  %3461 = vmatmul.mubr.bf16.vlgmr.msra.gmra.mxu1 %v9192_v11  ;;  %v4524_v10 = vpop.eup %4523  ;;  %v6114_v61 = vmul.f32 %v2213_v36, %v5937_v28  ;;  %v2214_v26 = vadd.f32 1.0, %v4520_v32  ;;  %v2217_v29 = vadd.f32 1.0, %v4522_v59  ;;  %v1716_v46 = vmul.f32 0.70710677, %v6075_v9 }
 0x19d   : > { %9185 = vst [vmem:[#allocation27_spill] sm:$0xff] %v6066_v49  ;;  %v6068_v56 = vpop.f32.mrf.mxu1  ;;  %v6118_v42 = vmul.f32 %v2212_v22, %v5959_v55  ;;  %v6121_v48 = vmul.f32 %v2215_v60, %v5963_v12  ;;  %v6124_v31 = vmul.f32 0.5, %v5993_v16  ;;  %v6132_v59 = vmul.f32 0.5, %v6017_v21 }
 0x19e   : > { %9186 = vst [vmem:[#allocation28_spill] sm:$0xff] %v6068_v56  ;;  %v9189_v56 = vld [vmem:[#allocation29_spill] sm:$0xff]  ;;  %v6084_v2 = vpop.f32.mrf.mxu0  ;;  %4543 = verf.f32 %v1715_v34  ;;  %v1719_v32 = vmul.f32 0.70710677, %v6096_v19  ;;  %v6137_v55 = vadd.f32 %v5798_v8, %v5496_v43  ;;  %v2216_v36 = vadd.f32 1.0, %v4524_v10 }
 0x19f   : > { %v6082_v49 = vadd.f32 %v9189_v56, %v5505_v47  ;;  %9190 = vst [vmem:[#allocation26_spill] sm:$0xff] %v6084_v2  ;;  %v6086_v25 = vpop.f32.mrf.mxu1  ;;  %9193 = vst [vmem:[#allocation29_spill] sm:$0xff] %v6114_v61  ;;  %v4526_v56 = vpop.eup %4525  ;;  %4545 = verf.f32 %v1717_v30  ;;  %v1721_v16 = vmul.f32 0.70710677, %v6107_v20  ;;  %v6142_v22 = vadd.f32 %v5800_v44, %v5505_v47  ;;  %v9202_v2 = vld [vmem:[#allocation32_spill] sm:$0xff] }
 0x1a0   : > { %9191 = vst [vmem:[#allocation23_spill] sm:$0xff] %v6086_v25  ;;  %v6109_v54 = vpop.f32.mrf.mxu0  ;;  %v6149_v34 = vmul.f32 %v2217_v29, %v5979_v51  ;;  %4547 = verf.f32 %v1716_v46  ;;  %v6153_v8 = vadd.f32 %v5820_v1, %v5492_v37  ;;  %v6156_v10 = vmul.f32 %v2214_v26, %v5961_v27 }
 0x1a1   : > { %v6111_v40 = vpop.f32.mrf.mxu1  ;;  %v1718_v38 = vmul.f32 0.70710677, %v6082_v49  ;;  %v4528_v12 = vpop.eup %4527  ;;  %v6168_v1 = vmul.f32 0.5, %v6057_v17  ;;  %v1720_v27 = vmul.f32 0.70710677, %v6137_v55 }
 0x1a2   : > { %v6127_v11 = vpop.f32.mrf.mxu0  ;;  %v4530_v30 = vpop.eup %4529  ;;  %v2219_v46 = vadd.f32 1.0, %v4528_v12 }
 0x1a3   : > { %9194 = vst [vmem:[#allocation63_spill] sm:$0xff] %v6127_v11  ;;  %v6129_v28 = vpop.f32.mrf.mxu1  ;;  %v6161_v11 = vmul.f32 0.5, %v6033_v35  ;;  %4549 = verf.f32 %v1718_v38  ;;  %v4532_v29 = vpop.eup %4531  ;;  %v1722_v35 = vmul.f32 0.70710677, %v6142_v22  ;;  %v6177_v38 = vadd.f32 %v5823_v7, %v5494_v39 }
 0x1a4   : > { %9195 = vst [vmem:[#allocation64_spill] sm:$0xff] %v6129_v28  ;;  %v6144_v60 = vpop.f32.mrf.mxu0  ;;  %v2218_v28 = vadd.f32 1.0, %v4526_v56  ;;  %4551 = verf.f32 %v1719_v32  ;;  %v4534_v26 = vpop.eup %4533  ;;  %v6172_v56 = vmul.f32 %v2216_v36, %v5989_v5  ;;  %v6189_v5 = vmul.f32 0.5, %v6062_v24 }
 0x1a5   : > { %9196 = vst [vmem:[#allocation65_spill] sm:$0xff] %v6144_v60  ;;  %v6146_v21 = vpop.f32.mrf.mxu1  ;;  %4553 = verf.f32 %v1721_v16  ;;  %v4536_v17 = vpop.eup %4535  ;;  %v1723_v36 = vmul.f32 0.70710677, %v6153_v8  ;;  %v6193_v7 = vmul.f32 0.5, %v6075_v9  ;;  %v6204_v24 = vmul.f32 %v2219_v46, %v6026_v52 }
 0x1a6   : > { %9197 = vst [vmem:[#allocation66_spill] sm:$0xff] %v6146_v21  ;;  %v6163_v25 = vpop.f32.mrf.mxu0  ;;  %v4538_v16 = vpop.eup %4537  ;;  %v2221_v60 = vadd.f32 1.0, %v4530_v30  ;;  %v2225_v61 = vadd.f32 1.0, %v4534_v26  ;;  %4555 = verf.f32 %v1720_v27  ;;  %v6207_v9 = vmul.f32 0.5, %v6082_v49  ;;  %v9209_v27 = vld [vmem:[#allocation30_spill] sm:$0xff] }
 0x1a7   : > { %9198 = vst [vmem:[#allocation67_spill] sm:$0xff] %v6163_v25  ;;  %v6165_v51 = vpop.f32.mrf.mxu1  ;;  %v2223_v25 = vadd.f32 1.0, %v4532_v29  ;;  %4557 = verf.f32 %v1722_v35  ;;  %v2220_v46 = vadd.f32 1.0, %v4536_v17  ;;  %v2222_v30 = vadd.f32 1.0, %v4538_v16  ;;  %v9211_v35 = vld [vmem:[#allocation31_spill] sm:$0xff] }
 0x1a8   : > { %9199 = vst [vmem:[#allocation68_spill] sm:$0xff] %v6165_v51  ;;  %v6179_v44 = vpop.f32.mrf.mxu0  ;;  %v6186_v51 = vmul.f32 %v2218_v28, %v5998_v57  ;;  %v4540_v28 = vpop.eup %4539  ;;  %4559 = verf.f32 %v1723_v36  ;;  %v814_v49 = vadd.f32 %v5852_v3, %v5492_v37  ;;  %v9210_v26 = vpack.c.bf16 %v5809_v45, %v9209_v27  ;;  %v9213_v17 = vld [vmem:[#allocation35_spill] sm:$0xff] }
 0x1a9   : > { %9200 = vst [vmem:[#allocation69_spill] sm:$0xff] %v6179_v44  ;;  %v6181_v12 = vpop.f32.mrf.mxu1  ;;  %v9203_v44 = vld [vmem:[#allocation33_spill] sm:$0xff]  ;;  %v4542_v52 = vpop.eup %4541  ;;  %v1165_v36 = vadd.f32 %v9213_v17, %v5505_v47  ;;  %v6237_v45 = vmul.f32 %v2221_v60, %v6041_v13 }
 0x1aa   : > { %9201 = vst [vmem:[#allocation70_spill] sm:$0xff] %v6181_v12  ;;  %v2760_v12 = vpack.c.bf16 %v5857_v33, %v9202_v2  ;;  %v2762_v21 = vpack.c.bf16 %v5863_v18, %v9203_v44  ;;  %v6199_v32 = vpop.f32.mrf.mxu0  ;;  %v1725_v33 = vmul.f32 0.70710677, %v6177_v38  ;;  %v9206_v2 = vld [vmem:[#allocation34_spill] sm:$0xff]  ;;  %v2226_v27 = vadd.f32 1.0, %v4542_v52 }
 0x1ab   : > { %9204 = vst [vmem:[#allocation32_spill] sm:$0xff] %v6199_v32  ;;  %v6201_v57 = vpop.f32.mrf.mxu1  ;;  %v812_v18 = vadd.f32 %v9206_v2, %v5496_v43  ;;  %v9212_v2 = vpack.c.bf16 %v5817_v53, %v9211_v35  ;;  %9216 = vst [vmem:[#allocation35_spill] sm:$0xff] %v6237_v45  ;;  %v6240_v53 = vmul.f32 %v2225_v61, %v6124_v31  ;;  %v6261_v31 = vmul.f32 0.5, %v6142_v22 }
 0x1ac   : > { %9205 = vst [vmem:[#allocation33_spill] sm:$0xff] %v6201_v57  ;;  %3179 = vmatprep.mubr.bf16.mxu0 %v2760_v12  ;;  %3468 = vmatprep.mubr.bf16.mxu1 %v2762_v21  ;;  %v6212_v44 = vpop.f32.mrf.mxu0  ;;  %v6225_v21 = vmul.f32 %v2223_v25, %v6102_v4  ;;  %v2224_v12 = vadd.f32 1.0, %v4540_v28  ;;  %v6228_v57 = vmul.f32 0.5, %v6096_v19  ;;  %v6243_v25 = vmul.f32 0.5, %v6107_v20  ;;  %v9217_v4 = vld [vmem:[#allocation36_spill] sm:$0xff]  ;;  %v4544_v28 = vpop.eup %4543 }
 0x1ad   : > { %9207 = vst [vmem:[#allocation34_spill] sm:$0xff] %v6212_v44  ;;  %v6214_v29 = vpop.f32.mrf.mxu1  ;;  %3180 = vmatmul.mubr.bf16.gmra.mxu0 %v9210_v26  ;;  %3469 = vmatmul.mubr.bf16.gmra.mxu1 %v9212_v2  ;;  %v1167_v19 = vadd.f32 %v9217_v4, %v5494_v39  ;;  %v6248_v26 = vmul.f32 0.5, %v6137_v55  ;;  %4561 = verf.f32 %v1725_v33  ;;  %v1724_v35 = vmul.f32 0.70710677, %v812_v18  ;;  %v4546_v60 = vpop.eup %4545 }
 0x1ae   : > { %9208 = vst [vmem:[#allocation71_spill] sm:$0xff] %v6214_v29  ;;  %v6232_v16 = vpop.f32.mrf.mxu0  ;;  %v6255_v61 = vmul.f32 %v2220_v46, %v6053_v14  ;;  %v6258_v20 = vmul.f32 %v2222_v30, %v6091_v23  ;;  %v1727_v52 = vmul.f32 0.70710677, %v814_v49  ;;  %v4548_v17 = vpop.eup %4547  ;;  %v6266_v33 = vmul.f32 %v2224_v12, %v6132_v59 }
 0x1af   : > { %9214 = vst [vmem:[#allocation30_spill] sm:$0xff] %v6232_v16  ;;  %v6234_v3 = vpop.f32.mrf.mxu1  ;;  %v6269_v4 = vmul.f32 0.5, %v6153_v8  ;;  %v6278_v30 = vmul.f32 0.5, %v6177_v38  ;;  %v1729_v16 = vmul.f32 0.70710677, %v1167_v19  ;;  %v816_v59 = vadd.f32 %v5868_v50, %v5496_v43 }
 0x1b0   : > { %9215 = vst [vmem:[#allocation31_spill] sm:$0xff] %v6234_v3  ;;  %v6250_v2 = vpop.f32.mrf.mxu0  ;;  %v1726_v3 = vmul.f32 0.70710677, %v1165_v36  ;;  %v4550_v23 = vpop.eup %4549  ;;  %v6283_v8 = vmul.f32 %v2226_v27, %v6161_v11  ;;  %v2227_v55 = vadd.f32 1.0, %v4544_v28  ;;  %v6285_v32 = vmul.f32 0.5, %v812_v18  ;;  %v9225_v11 = vld [vmem:[#allocation39_spill] sm:$0xff] }
 0x1b1   : > { %9218 = vst [vmem:[#allocation36_spill] sm:$0xff] %v6250_v2  ;;  %v6252_v13 = vpop.f32.mrf.mxu1  ;;  %v4552_v12 = vpop.eup %4551  ;;  %4563 = verf.f32 %v1724_v35  ;;  %v2228_v38 = vadd.f32 1.0, %v4548_v17  ;;  %v9224_v2 = vld [vmem:[#allocation37_spill] sm:$0xff]  ;;  %v2230_v50 = vadd.f32 1.0, %v4550_v23  ;;  %v820_v27 = vadd.f32 %v9225_v11, %v5492_v37  ;;  %v9226_v28 = vld [vmem:[#allocation44_spill] sm:$0xff]  ;;  %v9229_v17 = vld [vmem:[#allocation46_spill] sm:$0xff] }
 0x1b2   : > { %9219 = vst [vmem:[#allocation72_spill] sm:$0xff] %v6252_v13  ;;  %v6271_v14 = vpop.f32.mrf.mxu0  ;;  %v4554_v22 = vpop.eup %4553  ;;  %v2229_v13 = vadd.f32 1.0, %v4546_v60  ;;  %4565 = verf.f32 %v1727_v52  ;;  %v1169_v29 = vadd.f32 %v9224_v2, %v5505_v47  ;;  %v2764_v18 = vpack.c.bf16 %v5946_v6, %v9226_v28  ;;  %v9230_v11 = vld [vmem:[#allocation40_spill] sm:$0xff] }
 0x1b3   : > { %9220 = vst [vmem:[#allocation73_spill] sm:$0xff] %v6271_v14  ;;  %v6273_v46 = vpop.f32.mrf.mxu1  ;;  %4567 = verf.f32 %v1726_v3  ;;  %v1728_v60 = vmul.f32 0.70710677, %v816_v59  ;;  %v2766_v52 = vpack.c.bf16 %v5953_v63, %v9229_v17  ;;  %v4556_v44 = vpop.eup %4555  ;;  %v2233_v2 = vadd.f32 1.0, %v4554_v22  ;;  %v9236_v17 = vld [vmem:[#allocation38_spill] sm:$0xff] }
 0x1b4   : > { %9221 = vst [vmem:[#allocation74_spill] sm:$0xff] %v6273_v46  ;;  %v6287_v46 = vpop.f32.mrf.mxu0  ;;  %4569 = verf.f32 %v1729_v16  ;;  %v6303_v23 = vmul.f32 0.5, %v1165_v36  ;;  %v6305_v3 = vmul.f32 0.5, %v814_v49  ;;  %v1173_v45 = vadd.f32 %v9230_v11, %v5494_v39  ;;  %3187 = vmatprep.mubr.bf16.mxu0 %v2764_v18  ;;  %v9235_v49 = vld [vmem:[#allocation45_spill] sm:$0xff] }
 0x1b5   : > { %9222 = vst [vmem:[#allocation75_spill] sm:$0xff] %v6287_v46  ;;  %v6289_v14 = vpop.f32.mrf.mxu1  ;;  %v6314_v16 = vmul.f32 %v2227_v55, %v6168_v1  ;;  %v6317_v63 = vmul.f32 %v2229_v13, %v6189_v5  ;;  %v6319_v22 = vmul.f32 0.5, %v1167_v19  ;;  %v1730_v36 = vmul.f32 0.70710677, %v1169_v29  ;;  %3476 = vmatprep.mubr.bf16.mxu1 %v2766_v52  ;;  %v9238_v5 = vld [vmem:[#allocation16_spill] sm:$0xff]  ;;  %v9239_v13 = vld [vmem:[#allocation41_spill] sm:$0xff] }
 0x1b6   : > { %9223 = vst [vmem:[#allocation76_spill] sm:$0xff] %v6289_v14  ;;  %v6297_v35 = vpop.f32.mrf.mxu0  ;;  %v2231_v14 = vadd.f32 1.0, %v4552_v12  ;;  %v4558_v12 = vpop.eup %4557  ;;  %v6325_v11 = vmul.f32 %v2228_v38, %v6193_v7  ;;  %v6330_v1 = vmul.f32 0.5, %v816_v59  ;;  %v1731_v55 = vmul.f32 0.70710677, %v820_v27  ;;  %v9244_v7 = vld [vmem:[#allocation42_spill] sm:$0xff] }
 0x1b7   : > { %9227 = vst [vmem:[#allocation37_spill] sm:$0xff] %v6297_v35  ;;  %v6299_v46 = vpop.f32.mrf.mxu1  ;;  %9233 = vst [vmem:[#allocation40_spill] sm:$0xff] %v6314_v16  ;;  %v4560_v18 = vpop.eup %4559  ;;  %v6328_v35 = vmul.f32 %v2230_v50, %v6207_v9  ;;  %v9240_v19 = vpack.c.bf16 %v9238_v5, %v9239_v13  ;;  %4571 = verf.f32 %v1728_v60  ;;  %v822_v9 = vadd.f32 %v9244_v7, %v5496_v43  ;;  %v9249_v60 = vld [vmem:[#allocation47_spill] sm:$0xff] }
 0x1b8   : > { %9228 = vst [vmem:[#allocation39_spill] sm:$0xff] %v6299_v46  ;;  %v6309_v6 = vpop.f32.mrf.mxu0  ;;  %9234 = vst [vmem:[#allocation77_spill] sm:$0xff] %v6317_v63  ;;  %v9237_v46 = vpack.c.bf16 %v9235_v49, %v9236_v17  ;;  %v2232_v49 = vadd.f32 1.0, %v4556_v44  ;;  %v6345_v59 = vmul.f32 %v2233_v2, %v6243_v25  ;;  %v6347_v38 = vmul.f32 0.5, %v1169_v29  ;;  %v9246_v17 = vld [vmem:[#allocation43_spill] sm:$0xff]  ;;  %v9250_v25 = vld [vmem:[#allocation21_spill] sm:$0xff] }
 0x1b9   : > { %9231 = vst [vmem:[#allocation44_spill] sm:$0xff] %v6309_v6  ;;  %v6311_v28 = vpop.f32.mrf.mxu1  ;;  %3477 = vmatmul.mubr.bf16.gmra.mxu1 %v9240_v19  ;;  %v1733_v50 = vmul.f32 0.70710677, %v1173_v45  ;;  %v1175_v5 = vadd.f32 %v9246_v17, %v5505_v47  ;;  %v2235_v44 = vadd.f32 1.0, %v4560_v18  ;;  %4573 = verf.f32 %v1730_v36 }
 0x1ba   : > { %9232 = vst [vmem:[#allocation46_spill] sm:$0xff] %v6311_v28  ;;  %3188 = vmatmul.mubr.bf16.gmra.mxu0 %v9237_v46  ;;  %v6335_v28 = vpop.f32.mrf.mxu0  ;;  %v6340_v46 = vmul.f32 %v2231_v14, %v6228_v57  ;;  %9245 = vst [vmem:[#allocation41_spill] sm:$0xff] %v6345_v59  ;;  %v4562_v57 = vpop.eup %4561  ;;  %v2234_v14 = vadd.f32 1.0, %v4558_v12  ;;  %v824_v7 = vadd.f32 %v9249_v60, %v5492_v37  ;;  %4575 = verf.f32 %v1731_v55 }
 0x1bb   : > { %9241 = vst [vmem:[#allocation45_spill] sm:$0xff] %v6335_v28  ;;  %v6337_v52 = vpop.f32.mrf.mxu1  ;;  %v6359_v29 = vmul.f32 0.5, %v1173_v45  ;;  %v6363_v2 = vadd.f32 %v9250_v25, %v5492_v37  ;;  %v6372_v36 = vmul.f32 %v2232_v49, %v6248_v26  ;;  %v1732_v18 = vmul.f32 0.70710677, %v822_v9  ;;  %v9254_v25 = vld [vmem:[#allocation48_spill] sm:$0xff] }
 0x1bc   : > { %9242 = vst [vmem:[#allocation38_spill] sm:$0xff] %v6337_v52  ;;  %9243 = vst [vmem:[#allocation16_spill] sm:$0xff] %v6340_v46  ;;  %v6351_v13 = vpop.f32.mrf.mxu0  ;;  %v6357_v52 = vmul.f32 0.5, %v820_v27  ;;  %v9253_v27 = vld [vmem:[#allocation57_spill] sm:$0xff]  ;;  %v2237_v45 = vadd.f32 1.0, %v4562_v57  ;;  %4577 = verf.f32 %v1733_v50  ;;  %v6387_v49 = vmul.f32 %v2234_v14, %v6261_v31 }
 0x1bd   : > { %9247 = vst [vmem:[#allocation42_spill] sm:$0xff] %v6351_v13  ;;  %v6353_v19 = vpop.f32.mrf.mxu1  ;;  %v6376_v55 = vadd.f32 %v9253_v27, %v5494_v39  ;;  %v1734_v60 = vmul.f32 0.70710677, %v1175_v5  ;;  %v6390_v27 = vmul.f32 %v2235_v44, %v6269_v4  ;;  %v1735_v57 = vmul.f32 0.70710677, %v824_v7  ;;  %v9261_v44 = vld [vmem:[#allocation60_spill] sm:$0xff] }
 0x1be   : > { %9248 = vst [vmem:[#allocation43_spill] sm:$0xff] %v6353_v19  ;;  %v6365_v17 = vpop.f32.mrf.mxu0  ;;  %v1177_v19 = vadd.f32 %v9254_v25, %v5494_v39  ;;  %v4564_v28 = vpop.eup %4563  ;;  %v6392_v12 = vmul.f32 0.5, %v822_v9  ;;  %v6394_v6 = vmul.f32 0.5, %v1175_v5  ;;  %v1747_v25 = vmul.f32 0.70710677, %v6363_v2 }
 0x1bf   : > { %9251 = vst [vmem:[#allocation47_spill] sm:$0xff] %v6365_v17  ;;  %v6367_v13 = vpop.f32.mrf.mxu1  ;;  %9257 = vst [vmem:[#allocation78_spill] sm:$0xff] %v6390_v27  ;;  %v4566_v50 = vpop.eup %4565  ;;  %4579 = verf.f32 %v1732_v18  ;;  %v6403_v14 = vmul.f32 0.5, %v824_v7  ;;  %v1749_v4 = vmul.f32 0.70710677, %v6376_v55  ;;  %v2770_v9 = vpack.c.bf16 %v6071_v62, %v9261_v44 }
 0x1c0   : > { %9252 = vst [vmem:[#allocation21_spill] sm:$0xff] %v6367_v13  ;;  %v6380_v17 = vpop.f32.mrf.mxu0  ;;  %v4568_v31 = vpop.eup %4567  ;;  %v6409_v63 = vmul.f32 %v2237_v45, %v6278_v30  ;;  %4581 = verf.f32 %v1734_v60  ;;  %v1737_v59 = vmul.f32 0.70710677, %v1177_v19  ;;  %v2236_v7 = vadd.f32 1.0, %v4564_v28  ;;  %v9266_v30 = vld [vmem:[#allocation24_spill] sm:$0xff]  ;;  %v9267_v45 = vld [vmem:[#allocation19_spill] sm:$0xff] }
 0x1c1   : > { %9255 = vst [vmem:[#allocation57_spill] sm:$0xff] %v6380_v17  ;;  %v6382_v13 = vpop.f32.mrf.mxu1  ;;  %v9258_v17 = vld [vmem:[#allocation22_spill] sm:$0xff]  ;;  %v4570_v5 = vpop.eup %4569  ;;  %4583 = verf.f32 %v1735_v57  ;;  %3484 = vmatprep.mubr.bf16.mxu1 %v2770_v9  ;;  %v6419_v62 = vadd.f32 %v6035_v41, %v5492_v37  ;;  %v9268_v60 = vpack.c.bf16 %v9266_v30, %v9267_v45  ;;  %v2238_v44 = vadd.f32 1.0, %v4568_v31  ;;  %v9271_v28 = vld [vmem:[#allocation20_spill] sm:$0xff]  ;;  %v9275_v31 = vld [vmem:[#allocation17_spill] sm:$0xff] }
 0x1c2   : > { %9256 = vst [vmem:[#allocation48_spill] sm:$0xff] %v6382_v13  ;;  %v2768_v13 = vpack.c.bf16 %v6044_v15, %v9258_v17  ;;  %v6399_v16 = vpop.f32.mrf.mxu0  ;;  %9262 = vst [vmem:[#allocation60_spill] sm:$0xff] %v6409_v63  ;;  %v9263_v15 = vld [vmem:[#allocation49_spill] sm:$0xff]  ;;  %4585 = verf.f32 %v1747_v25  ;;  %v9272_v57 = vpack.c.bf16 %v6007_v58, %v9271_v28  ;;  %v2241_v9 = vadd.f32 1.0, %v4570_v5 }
 0x1c3   : > { %9259 = vst [vmem:[#allocation22_spill] sm:$0xff] %v6399_v16  ;;  %v6401_v26 = vpop.f32.mrf.mxu1  ;;  %v826_v17 = vadd.f32 %v9263_v15, %v5496_v43  ;;  %v2239_v16 = vadd.f32 1.0, %v4566_v50  ;;  %v9269_v15 = vld [vmem:[#allocation50_spill] sm:$0xff]  ;;  %v6437_v30 = vmul.f32 0.5, %v1177_v19  ;;  %v830_v45 = vadd.f32 %v9275_v31, %v5492_v37 }
 0x1c4   : > { %9260 = vst [vmem:[#allocation79_spill] sm:$0xff] %v6401_v26  ;;  %3195 = vmatprep.mubr.bf16.mxu0 %v2768_v13  ;;  %v6413_v26 = vpop.f32.mrf.mxu0  ;;  %v1179_v13 = vadd.f32 %v9269_v15, %v5505_v47  ;;  %3485 = vmatmul.mubr.bf16.gmra.mxu1 %v9272_v57  ;;  %4587 = verf.f32 %v1749_v4  ;;  %v4572_v25 = vpop.eup %4571  ;;  %v1751_v46 = vmul.f32 0.70710677, %v6419_v62  ;;  %v6450_v19 = vmul.f32 %v2236_v7, %v6285_v32 }
 0x1c5   : > { %9264 = vst [vmem:[#allocation49_spill] sm:$0xff] %v6413_v26  ;;  %v6415_v18 = vpop.f32.mrf.mxu1  ;;  %3196 = vmatmul.mubr.bf16.gmra.mxu0 %v9268_v60  ;;  %v9270_v26 = vld [vmem:[#allocation25_spill] sm:$0xff]  ;;  %v1736_v60 = vmul.f32 0.70710677, %v826_v17  ;;  %v6453_v5 = vmul.f32 %v2239_v16, %v6305_v3  ;;  %4589 = verf.f32 %v1737_v59  ;;  %v6455_v4 = vmul.f32 0.5, %v826_v17  ;;  %v9284_v3 = vld [vmem:[#allocation27_spill] sm:$0xff] }
 0x1c6   : > { %9265 = vst [vmem:[#allocation80_spill] sm:$0xff] %v6415_v18  ;;  %v6428_v18 = vadd.f32 %v9270_v26, %v5494_v39  ;;  %v6433_v50 = vpop.f32.mrf.mxu0  ;;  %v9276_v26 = vld [vmem:[#allocation51_spill] sm:$0xff]  ;;  %9279 = vst [vmem:[#allocation20_spill] sm:$0xff] %v6450_v19  ;;  %v4574_v31 = vpop.eup %4573  ;;  %4591 = verf.f32 %v1751_v46  ;;  %v2240_v7 = vadd.f32 1.0, %v4572_v25  ;;  %v1739_v19 = vmul.f32 0.70710677, %v830_v45 }
 0x1c7   : > { %9273 = vst [vmem:[#allocation24_spill] sm:$0xff] %v6433_v50  ;;  %v6435_v41 = vpop.f32.mrf.mxu1  ;;  %v1183_v15 = vadd.f32 %v9276_v26, %v5494_v39  ;;  %9280 = vst [vmem:[#allocation17_spill] sm:$0xff] %v6453_v5  ;;  %v6458_v26 = vmul.f32 %v2238_v44, %v6303_v23  ;;  %v1738_v50 = vmul.f32 0.70710677, %v1179_v13  ;;  %v4576_v32 = vpop.eup %4575  ;;  %v6468_v16 = vadd.f32 %v9284_v3, %v5492_v37  ;;  %v9286_v46 = vld [vmem:[#allocation28_spill] sm:$0xff] }
 0x1c8   : > { %9274 = vst [vmem:[#allocation19_spill] sm:$0xff] %v6435_v41  ;;  %v1753_v58 = vmul.f32 0.70710677, %v6428_v18  ;;  %v6445_v28 = vpop.f32.mrf.mxu0  ;;  %v6460_v41 = vmul.f32 0.5, %v1179_v13  ;;  %v6471_v59 = vmul.f32 %v2241_v9, %v6319_v22  ;;  %v6473_v23 = vmul.f32 0.5, %v830_v45  ;;  %v9289_v22 = vld [vmem:[#allocation18_spill] sm:$0xff] }
 0x1c9   : > { %9277 = vst [vmem:[#allocation50_spill] sm:$0xff] %v6445_v28  ;;  %v6447_v57 = vpop.f32.mrf.mxu1  ;;  %9281 = vst [vmem:[#allocation51_spill] sm:$0xff] %v6458_v26  ;;  %v6477_v17 = vadd.f32 %v9286_v46, %v5494_v39  ;;  %v4578_v25 = vpop.eup %4577  ;;  %v6485_v3 = vmul.f32 0.5, %v1183_v15  ;;  %v832_v9 = vadd.f32 %v9289_v22, %v5496_v43  ;;  %v2242_v45 = vadd.f32 1.0, %v4574_v31  ;;  %v9290_v46 = vld [vmem:[#allocation52_spill] sm:$0xff] }
 0x1ca   : > { %9278 = vst [vmem:[#allocation25_spill] sm:$0xff] %v6447_v57  ;;  %v6462_v28 = vpop.f32.mrf.mxu0  ;;  %4593 = verf.f32 %v1753_v58  ;;  %9285 = vst [vmem:[#allocation27_spill] sm:$0xff] %v6471_v59  ;;  %v1755_v58 = vmul.f32 0.70710677, %v6468_v16  ;;  %v2245_v31 = vadd.f32 1.0, %v4578_v25  ;;  %v1495_v63 = vmul.f32 0.5, %v6419_v62 }
 0x1cb   : > { %9282 = vst [vmem:[#allocation81_spill] sm:$0xff] %v6462_v28  ;;  %v6464_v57 = vpop.f32.mrf.mxu1  ;;  %4595 = verf.f32 %v1736_v60  ;;  %v2243_v60 = vadd.f32 1.0, %v4576_v32  ;;  %v1185_v28 = vadd.f32 %v9290_v46, %v5505_v47  ;;  %v1757_v46 = vmul.f32 0.70710677, %v6477_v17 }
 0x1cc   : > { %9283 = vst [vmem:[#allocation82_spill] sm:$0xff] %v6464_v57  ;;  %v6479_v44 = vpop.f32.mrf.mxu0  ;;  %v1741_v57 = vmul.f32 0.70710677, %v1183_v15  ;;  %4597 = verf.f32 %v1738_v50  ;;  %v2772_v15 = vpack.c.bf16 %v6172_v56, %v6118_v42  ;;  %v4580_v22 = vpop.eup %4579  ;;  %v9293_v50 = vld [vmem:[#allocation53_spill] sm:$0xff]  ;;  %v1740_v42 = vmul.f32 0.70710677, %v832_v9 }
 0x1cd   : > { %9287 = vst [vmem:[#allocation28_spill] sm:$0xff] %v6479_v44  ;;  %v6481_v13 = vpop.f32.mrf.mxu1  ;;  %4599 = verf.f32 %v1739_v19  ;;  %v834_v32 = vadd.f32 %v9293_v50, %v5492_v37  ;;  %v6510_v19 = vpop.eup %4581  ;;  %v9296_v56 = vld [vmem:[#allocation54_spill] sm:$0xff]  ;;  %v6519_v27 = vmul.f32 %v2242_v45, %v6347_v38  ;;  %v6535_v38 = vmul.f32 0.5, %v832_v9 }
 0x1ce   : > { %9288 = vst [vmem:[#allocation83_spill] sm:$0xff] %v6481_v13  ;;  %v6491_v26 = vpop.f32.mrf.mxu0  ;;  %v6496_v13 = vmul.f32 %v2240_v7, %v6330_v1  ;;  %4601 = verf.f32 %v1741_v57  ;;  %v6516_v25 = vadd.f32 %v9296_v56, %v5494_v39  ;;  %3203 = vmatprep.mubr.bf16.mxu0 %v2772_v15  ;;  %v4584_v50 = vpop.eup %4583  ;;  %v9298_v57 = vpack.c.bf16 %v6121_v48, %v6089_v0 }
 0x1cf   : > { %9291 = vst [vmem:[#allocation18_spill] sm:$0xff] %v6491_v26  ;;  %v6493_v44 = vpop.f32.mrf.mxu1  ;;  %v2774_v26 = vpack.c.bf16 %v6186_v51, %v6156_v10  ;;  %9297 = vst [vmem:[#allocation54_spill] sm:$0xff] %v6519_v27  ;;  %v6522_v10 = vmul.f32 %v2243_v60, %v6357_v52  ;;  %v1742_v51 = vmul.f32 0.70710677, %v1185_v28  ;;  %v4586_v7 = vpop.eup %4585  ;;  %v6537_v45 = vmul.f32 0.5, %v1185_v28 }
 0x1d0   : > { %9292 = vst [vmem:[#allocation52_spill] sm:$0xff] %v6493_v44  ;;  %v6506_v44 = vpop.f32.mrf.mxu0  ;;  %3204 = vmatmul.mubr.bf16.gmra.mxu0 %v9298_v57  ;;  %4603 = verf.f32 %v1755_v58  ;;  %v6541_v52 = vadd.f32 %v6111_v40, %v5494_v39  ;;  %v6547_v48 = vmul.f32 %v2245_v31, %v6359_v29  ;;  %v6549_v60 = vmul.f32 0.5, %v834_v32  ;;  %v9305_v29 = vld [vmem:[#allocation55_spill] sm:$0xff] }
 0x1d1   : > { %9294 = vst [vmem:[#allocation53_spill] sm:$0xff] %v6506_v44  ;;  %v6508_v1 = vpop.f32.mrf.mxu1  ;;  %3492 = vmatprep.mubr.bf16.mxu1 %v2774_v26  ;;  %v4588_v0 = vpop.eup %4587  ;;  %v1743_v57 = vmul.f32 0.70710677, %v834_v32  ;;  %4605 = verf.f32 %v1757_v46  ;;  %v1745_v40 = vmul.f32 0.70710677, %v6516_v25  ;;  %v836_v31 = vadd.f32 %v9305_v29, %v5496_v43 }
 0x1d2   : > { %9295 = vst [vmem:[#allocation84_spill] sm:$0xff] %v6508_v1  ;;  %v6526_v1 = vadd.f32 %v6109_v54, %v5492_v37  ;;  %v6531_v56 = vpop.f32.mrf.mxu0  ;;  %v9301_v54 = vld [vmem:[#allocation29_spill] sm:$0xff]  ;;  %4607 = verf.f32 %v1740_v42  ;;  %v1491_v42 = vmul.f32 0.5, %v6363_v2  ;;  %v1497_v2 = vmul.f32 0.5, %v6428_v18 }
 0x1d3   : > { %9299 = vst [vmem:[#allocation85_spill] sm:$0xff] %v6531_v56  ;;  %v6533_v15 = vpop.f32.mrf.mxu1  ;;  %v9302_v26 = vpack.c.bf16 %v6149_v34, %v9301_v54  ;;  %v1761_v34 = vmul.f32 0.70710677, %v6541_v52  ;;  %v4590_v54 = vpop.eup %4589  ;;  %4609 = verf.f32 %v1742_v51  ;;  %v2261_v56 = vadd.f32 1.0, %v4588_v0 }
 0x1d4   : > { %9300 = vst [vmem:[#allocation86_spill] sm:$0xff] %v6533_v15  ;;  %v6551_v9 = vpop.f32.mrf.mxu0  ;;  %v1759_v58 = vmul.f32 0.70710677, %v6526_v1  ;;  %v2259_v15 = vadd.f32 1.0, %v4586_v7  ;;  %v2249_v62 = vadd.f32 1.0, %v4590_v54  ;;  %v2246_v54 = vadd.f32 1.0, %v6510_v19 }
 0x1d5   : > { %3493 = vmatmul.mubr.bf16.gmra.mxu1 %v9302_v26  ;;  %9303 = vst [vmem:[#allocation29_spill] sm:$0xff] %v6551_v9  ;;  %v6553_v28 = vpop.f32.mrf.mxu1  ;;  %v2244_v26 = vadd.f32 1.0, %v4580_v22  ;;  %v4592_v9 = vpop.eup %4591  ;;  %v9308_v22 = vld [vmem:[#allocation65_spill] sm:$0xff]  ;;  %v1744_v18 = vmul.f32 0.70710677, %v836_v31 }
 0x1d6   : > { %9304 = vst [vmem:[#allocation87_spill] sm:$0xff] %v6553_v28  ;;  %v6560_v32 = vpop.f32.mrf.mxu0  ;;  %v2247_v28 = vadd.f32 1.0, %v4584_v50  ;;  %4611 = verf.f32 %v1759_v58  ;;  %v2263_v59 = vadd.f32 1.0, %v4592_v9  ;;  %v6568_v51 = vadd.f32 %v9308_v22, %v5492_v37  ;;  %v9311_v58 = vld [vmem:[#allocation66_spill] sm:$0xff]  ;;  %v9312_v9 = vld [vmem:[#allocation56_spill] sm:$0xff] }
 0x1d7   : > { %9306 = vst [vmem:[#allocation55_spill] sm:$0xff] %v6560_v32  ;;  %v6562_v46 = vpop.f32.mrf.mxu1  ;;  %v4594_v44 = vpop.eup %4593  ;;  %4613 = verf.f32 %v1761_v34  ;;  %v1493_v50 = vmul.f32 0.5, %v6376_v55  ;;  %v6578_v32 = vadd.f32 %v9311_v58, %v5494_v39  ;;  %v1189_v34 = vadd.f32 %v9312_v9, %v5505_v47 }
 0x1d8   : > { %9307 = vst [vmem:[#allocation88_spill] sm:$0xff] %v6562_v46  ;;  %v6570_v7 = vpop.f32.mrf.mxu0  ;;  %v4596_v46 = vpop.eup %4595  ;;  %v2265_v0 = vadd.f32 1.0, %v4594_v44  ;;  %v6582_v22 = vmul.f32 %v2259_v15, %v1491_v42  ;;  %v6584_v5 = vmul.f32 %v2263_v59, %v1495_v63  ;;  %4615 = verf.f32 %v1743_v57 }
 0x1d9   : > { %9309 = vst [vmem:[#allocation65_spill] sm:$0xff] %v6570_v7  ;;  %v6572_v29 = vpop.f32.mrf.mxu1  ;;  %v4598_v55 = vpop.eup %4597  ;;  %v6590_v44 = vmul.f32 %v2261_v56, %v1493_v50  ;;  %v1763_v63 = vmul.f32 0.70710677, %v6568_v51  ;;  %v2776_v59 = vpack.c.bf16 %v6266_v33, %v6255_v61  ;;  %v6607_v56 = vmul.f32 %v2247_v28, %v6403_v14 }
 0x1da   : > { %9310 = vst [vmem:[#allocation89_spill] sm:$0xff] %v6572_v29  ;;  %v6586_v7 = vpop.f32.mrf.mxu0  ;;  %v6592_v27 = vmul.f32 %v2265_v0, %v1497_v2  ;;  %v6594_v58 = vpop.eup %4599  ;;  %v1765_v19 = vmul.f32 0.70710677, %v6578_v32  ;;  %v2778_v2 = vpack.c.bf16 %v6283_v8, %v6258_v20  ;;  %v6615_v9 = vmul.f32 %v2249_v62, %v6437_v30  ;;  %v9321_v20 = vld [vmem:[#allocation69_spill] sm:$0xff]  ;;  %v9323_v62 = vld [vmem:[#allocation58_spill] sm:$0xff] }
 0x1db   : > { %9313 = vst [vmem:[#allocation66_spill] sm:$0xff] %v6586_v7  ;;  %v6588_v29 = vpop.f32.mrf.mxu1  ;;  %9315 = vst [vmem:[#allocation90_spill] sm:$0xff] %v6590_v44  ;;  %v4602_v0 = vpop.eup %4601  ;;  %v6618_v61 = vmul.f32 0.5, %v6516_v25  ;;  %4617 = verf.f32 %v1745_v40  ;;  %v1746_v33 = vmul.f32 0.70710677, %v1189_v34  ;;  %3211 = vmatprep.mubr.bf16.mxu0 %v2776_v59  ;;  %v6625_v50 = vmul.f32 %v2244_v26, %v6392_v12  ;;  %v9324_v12 = vld [vmem:[#allocation70_spill] sm:$0xff] }
 0x1dc   : > { %9314 = vst [vmem:[#allocation56_spill] sm:$0xff] %v6588_v29  ;;  %9316 = vst [vmem:[#allocation91_spill] sm:$0xff] %v6592_v27  ;;  %v6602_v42 = vpop.f32.mrf.mxu0  ;;  %v2248_v15 = vadd.f32 1.0, %v4596_v46  ;;  %4619 = verf.f32 %v1744_v18  ;;  %3500 = vmatprep.mubr.bf16.mxu1 %v2778_v2  ;;  %v6629_v8 = vadd.f32 %v9321_v20, %v5492_v37  ;;  %v9322_v30 = vpack.c.bf16 %v6225_v21, %v6204_v24  ;;  %v9325_v46 = vld [vmem:[#allocation35_spill] sm:$0xff] }
 0x1dd   : > { %9317 = vst [vmem:[#allocation92_spill] sm:$0xff] %v6602_v42  ;;  %v6604_v57 = vpop.f32.mrf.mxu1  ;;  %v4604_v25 = vpop.eup %4603  ;;  %v6634_v40 = vmul.f32 0.5, %v836_v31  ;;  %v6638_v59 = vadd.f32 %v9323_v62, %v5496_v43  ;;  %4621 = verf.f32 %v1763_v63  ;;  %v6642_v26 = vadd.f32 %v9324_v12, %v5494_v39 }
 0x1de   : > { %9318 = vst [vmem:[#allocation93_spill] sm:$0xff] %v6604_v57  ;;  %v6620_v14 = vpop.f32.mrf.mxu0  ;;  %3212 = vmatmul.mubr.bf16.gmra.mxu0 %v9322_v30  ;;  %v9326_v18 = vpack.c.bf16 %v6240_v53, %v9325_v46  ;;  %v4606_v21 = vpop.eup %4605  ;;  %v6652_v31 = vmul.f32 %v2246_v54, %v6394_v6  ;;  %v6656_v63 = vmul.f32 0.5, %v1189_v34  ;;  %4623 = verf.f32 %v1765_v19  ;;  %v9331_v19 = vld [vmem:[#allocation59_spill] sm:$0xff] }
 0x1df   : > { %9319 = vst [vmem:[#allocation94_spill] sm:$0xff] %v6620_v14  ;;  %v6622_v28 = vpop.f32.mrf.mxu1  ;;  %v4608_v30 = vpop.eup %4607  ;;  %4625 = verf.f32 %v1746_v33  ;;  %v1767_v53 = vmul.f32 0.70710677, %v6629_v8  ;;  %v1769_v12 = vmul.f32 0.70710677, %v6642_v26  ;;  %v6669_v54 = vmul.f32 %v2248_v15, %v6455_v4 }
 0x1e0   : > { %9320 = vst [vmem:[#allocation95_spill] sm:$0xff] %v6622_v28  ;;  %3501 = vmatmul.mubr.bf16.gmra.mxu1 %v9326_v18  ;;  %v6647_v2 = vpop.f32.mrf.mxu0  ;;  %v6666_v6 = vpop.eup %4609  ;;  %v2250_v34 = vadd.f32 1.0, %v4598_v55  ;;  %v1195_v20 = vadd.f32 %v9331_v19, %v5505_v47  ;;  %v2267_v28 = vadd.f32 1.0, %v4604_v25  ;;  %v1748_v33 = vmul.f32 0.70710677, %v6638_v59  ;;  %v9334_v55 = vld [vmem:[#allocation34_spill] sm:$0xff] }
 0x1e1   : > { %9327 = vst [vmem:[#allocation69_spill] sm:$0xff] %v6647_v2  ;;  %v6649_v24 = vpop.f32.mrf.mxu1  ;;  %v1499_v14 = vmul.f32 0.5, %v6468_v16  ;;  %4627 = verf.f32 %v1767_v53  ;;  %v1503_v4 = vmul.f32 0.5, %v6526_v1  ;;  %v6682_v19 = vadd.f32 %v9334_v55, %v5492_v37 }
 0x1e2   : > { %9328 = vst [vmem:[#allocation58_spill] sm:$0xff] %v6649_v24  ;;  %v6662_v46 = vpop.f32.mrf.mxu0  ;;  %v2269_v24 = vadd.f32 1.0, %v4606_v21  ;;  %4629 = verf.f32 %v1769_v12  ;;  %v1501_v25 = vmul.f32 0.5, %v6477_v17  ;;  %v1505_v57 = vmul.f32 0.5, %v6541_v52  ;;  %v9335_v21 = vld [vmem:[#allocation71_spill] sm:$0xff]  ;;  %v9340_v52 = vld [vmem:[#allocation61_spill] sm:$0xff] }
 0x1e3   : > { %9329 = vst [vmem:[#allocation70_spill] sm:$0xff] %v6662_v46  ;;  %v6664_v18 = vpop.f32.mrf.mxu1  ;;  %v4612_v62 = vpop.eup %4611  ;;  %v6688_v53 = vadd.f32 %v9335_v21, %v5494_v39  ;;  %v2251_v1 = vadd.f32 1.0, %v6594_v58  ;;  %v6695_v12 = vmul.f32 %v2267_v28, %v1499_v14  ;;  %v2253_v17 = vadd.f32 1.0, %v4602_v0 }
 0x1e4   : > { %9330 = vst [vmem:[#allocation35_spill] sm:$0xff] %v6664_v18  ;;  %v6675_v46 = vpop.f32.mrf.mxu0  ;;  %v4614_v2 = vpop.eup %4613  ;;  %v2271_v15 = vadd.f32 1.0, %v4612_v62  ;;  %v1750_v62 = vmul.f32 0.70710677, %v1195_v20  ;;  %v6701_v29 = vmul.f32 %v2269_v24, %v1501_v25  ;;  %4631 = verf.f32 %v1748_v33 }
 0x1e5   : > { %9332 = vst [vmem:[#allocation59_spill] sm:$0xff] %v6675_v46  ;;  %v6677_v18 = vpop.f32.mrf.mxu1  ;;  %v2273_v16 = vadd.f32 1.0, %v4614_v2  ;;  %9338 = vst [vmem:[#allocation97_spill] sm:$0xff] %v6695_v12  ;;  %v4616_v42 = vpop.eup %4615  ;;  %v846_v2 = vadd.f32 %v9340_v52, %v5496_v43  ;;  %v1771_v14 = vmul.f32 0.70710677, %v6682_v19  ;;  %v2780_v0 = vpack.c.bf16 %v6372_v36, %v6325_v11 }
 0x1e6   : > { %9333 = vst [vmem:[#allocation96_spill] sm:$0xff] %v6677_v18  ;;  %v6690_v46 = vpop.f32.mrf.mxu0  ;;  %v6697_v55 = vmul.f32 %v2271_v15, %v1503_v4  ;;  %9341 = vst [vmem:[#allocation61_spill] sm:$0xff] %v6701_v29  ;;  %v2252_v28 = vadd.f32 1.0, %v4608_v30  ;;  %v2782_v4 = vpack.c.bf16 %v6387_v49, %v6328_v35  ;;  %v6727_v52 = vmul.f32 %v2251_v1, %v6473_v23  ;;  %v9347_v49 = vld [vmem:[#allocation62_spill] sm:$0xff]  ;;  %v9349_v23 = vld [vmem:[#allocation16_spill] sm:$0xff] }
 0x1e7   : > { %9336 = vst [vmem:[#allocation34_spill] sm:$0xff] %v6690_v46  ;;  %v6692_v18 = vpop.f32.mrf.mxu1  ;;  %v6703_v21 = vmul.f32 %v2273_v16, %v1505_v57  ;;  %v1773_v57 = vmul.f32 0.70710677, %v6688_v53  ;;  %v6724_v16 = vmul.f32 %v2250_v34, %v6460_v41  ;;  %v2255_v11 = vadd.f32 1.0, %v4616_v42  ;;  %3219 = vmatprep.mubr.bf16.mxu0 %v2780_v0  ;;  %v9348_v41 = vld [vmem:[#allocation36_spill] sm:$0xff]  ;;  %v9398_v29 = vld [vmem:[#allocation33_spill] sm:$0xff] }
 0x1e8   : > { %9337 = vst [vmem:[#allocation71_spill] sm:$0xff] %v6692_v18  ;;  %9339 = vst [vmem:[#allocation98_spill] sm:$0xff] %v6697_v55  ;;  %v6705_v7 = vpop.f32.mrf.mxu0  ;;  %v4618_v25 = vpop.eup %4617  ;;  %4633 = verf.f32 %v1750_v62  ;;  %v6732_v30 = vmul.f32 0.5, %v6638_v59  ;;  %v1752_v35 = vmul.f32 0.70710677, %v846_v2  ;;  %v6736_v24 = vadd.f32 %v9347_v49, %v5505_v47  ;;  %3508 = vmatprep.mubr.bf16.mxu1 %v2782_v4  ;;  %v9350_v1 = vld [vmem:[#allocation40_spill] sm:$0xff] }
 0x1e9   : > { %9342 = vst [vmem:[#allocation99_spill] sm:$0xff] %v6703_v21  ;;  %9343 = vst [vmem:[#allocation100_spill] sm:$0xff] %v6705_v7  ;;  %v6707_v46 = vpop.f32.mrf.mxu1  ;;  %v6729_v36 = vpop.eup %4619  ;;  %v6740_v34 = vadd.f32 %v9348_v41, %v5492_v37  ;;  %v9351_v42 = vpack.c.bf16 %v9349_v23, %v9350_v1  ;;  %v6750_v58 = vmul.f32 %v2253_v17, %v6485_v3  ;;  %4635 = verf.f32 %v1771_v14  ;;  %v9354_v4 = vld [vmem:[#allocation72_spill] sm:$0xff]  ;;  %v9355_v41 = vld [vmem:[#allocation41_spill] sm:$0xff] }
 0x1ea   : > { %9344 = vst [vmem:[#allocation101_spill] sm:$0xff] %v6707_v46  ;;  %v6719_v15 = vpop.f32.mrf.mxu0  ;;  %v4622_v59 = vpop.eup %4621  ;;  %v6756_v49 = vadd.f32 %v9354_v4, %v5494_v39  ;;  %v6762_v1 = vmul.f32 %v2252_v28, %v6535_v38  ;;  %4637 = verf.f32 %v1773_v57  ;;  %v6774_v14 = vmul.f32 %v2255_v11, %v6549_v60  ;;  %v9363_v60 = vld [vmem:[#allocation23_spill] sm:$0xff] }
 0x1eb   : > { %9345 = vst [vmem:[#allocation102_spill] sm:$0xff] %v6719_v15  ;;  %v6721_v33 = vpop.f32.mrf.mxu1  ;;  %3220 = vmatmul.mubr.bf16.gmra.mxu0 %v9351_v42  ;;  %v9356_v15 = vld [vmem:[#allocation77_spill] sm:$0xff]  ;;  %v4624_v23 = vpop.eup %4623  ;;  %v2254_v42 = vadd.f32 1.0, %v6666_v6  ;;  %4639 = verf.f32 %v1752_v35  ;;  %v1754_v6 = vmul.f32 0.70710677, %v6736_v24  ;;  %v2275_v57 = vadd.f32 1.0, %v4622_v59 }
 0x1ec   : > { %9346 = vst [vmem:[#allocation103_spill] sm:$0xff] %v6721_v33  ;;  %v6745_v62 = vpop.f32.mrf.mxu0  ;;  %v6752_v33 = vmul.f32 0.5, %v1195_v20  ;;  %v9357_v46 = vpack.c.bf16 %v9355_v41, %v9356_v15  ;;  %v6771_v17 = vpop.eup %4625  ;;  %v2257_v15 = vadd.f32 1.0, %v4618_v25  ;;  %v1777_v38 = vmul.f32 0.70710677, %v6756_v49  ;;  %v9364_v59 = vld [vmem:[#allocation75_spill] sm:$0xff] }
 0x1ed   : > { %9352 = vst [vmem:[#allocation62_spill] sm:$0xff] %v6745_v62  ;;  %v6747_v0 = vpop.f32.mrf.mxu1  ;;  %v6789_v25 = vadd.f32 %v9363_v60, %v5505_v47  ;;  %v1507_v11 = vmul.f32 0.5, %v6568_v51  ;;  %v1511_v62 = vmul.f32 0.5, %v6629_v8  ;;  %v1509_v60 = vmul.f32 0.5, %v6578_v32 }
 0x1ee   : > { %9353 = vst [vmem:[#allocation36_spill] sm:$0xff] %v6747_v0  ;;  %3509 = vmatmul.mubr.bf16.gmra.mxu1 %v9357_v46  ;;  %v6765_v0 = vmul.f32 0.5, %v846_v2  ;;  %v6767_v3 = vpop.f32.mrf.mxu0  ;;  %v1775_v46 = vmul.f32 0.70710677, %v6740_v34  ;;  %v9360_v2 = vld [vmem:[#allocation26_spill] sm:$0xff]  ;;  %v1513_v18 = vmul.f32 0.5, %v6642_v26  ;;  %v6910_v21 = vadd.f32 %v9398_v29, %v5505_v47 }
 0x1ef   : > { %9358 = vst [vmem:[#allocation16_spill] sm:$0xff] %v6767_v3  ;;  %v6769_v20 = vpop.f32.mrf.mxu1  ;;  %v6781_v28 = vadd.f32 %v9360_v2, %v5496_v43  ;;  %v2277_v3 = vadd.f32 1.0, %v4624_v23  ;;  %v6795_v2 = vadd.f32 %v9364_v59, %v5492_v37  ;;  %v9367_v23 = vld [vmem:[#allocation76_spill] sm:$0xff]  ;;  %v1758_v32 = vmul.f32 0.70710677, %v6789_v25  ;;  %v9372_v26 = vld [vmem:[#allocation63_spill] sm:$0xff] }
 0x1f0   : > { %9359 = vst [vmem:[#allocation40_spill] sm:$0xff] %v6769_v20  ;;  %v6783_v4 = vpop.f32.mrf.mxu0  ;;  %v4628_v20 = vpop.eup %4627  ;;  %4641 = verf.f32 %v1775_v46  ;;  %v6805_v46 = vadd.f32 %v9367_v23, %v5494_v39  ;;  %v1521_v29 = vmul.f32 0.5, %v6756_v49  ;;  %v9403_v49 = vld [vmem:[#allocation31_spill] sm:$0xff] }
 0x1f1   : > { %9361 = vst [vmem:[#allocation72_spill] sm:$0xff] %v6783_v4  ;;  %v6785_v41 = vpop.f32.mrf.mxu1  ;;  %v4630_v35 = vpop.eup %4629  ;;  %v2279_v7 = vadd.f32 1.0, %v4628_v20  ;;  %4643 = verf.f32 %v1777_v38  ;;  %v1756_v8 = vmul.f32 0.70710677, %v6781_v28  ;;  %v6808_v20 = vmul.f32 %v2275_v57, %v1507_v11  ;;  %v9375_v11 = vld [vmem:[#allocation20_spill] sm:$0xff] }
 0x1f2   : > { %9362 = vst [vmem:[#allocation41_spill] sm:$0xff] %v6785_v41  ;;  %v6797_v4 = vpop.f32.mrf.mxu0  ;;  %v2281_v51 = vadd.f32 1.0, %v4630_v35  ;;  %4645 = verf.f32 %v1754_v6  ;;  %v6819_v35 = vadd.f32 %v9372_v26, %v5496_v43  ;;  %v4632_v6 = vpop.eup %4631  ;;  %v6826_v57 = vmul.f32 %v2257_v15, %v6618_v61  ;;  %v9378_v15 = vld [vmem:[#allocation51_spill] sm:$0xff] }
 0x1f3   : > { %9365 = vst [vmem:[#allocation77_spill] sm:$0xff] %v6797_v4  ;;  %v6799_v41 = vpop.f32.mrf.mxu1  ;;  %9368 = vst [vmem:[#allocation23_spill] sm:$0xff] %v6808_v20  ;;  %v6810_v38 = vmul.f32 %v2279_v7, %v1511_v62  ;;  %v1779_v62 = vmul.f32 0.70710677, %v6795_v2  ;;  %v1781_v61 = vmul.f32 0.70710677, %v6805_v46  ;;  %4647 = verf.f32 %v1756_v8 }
 0x1f4   : > { %9366 = vst [vmem:[#allocation26_spill] sm:$0xff] %v6799_v41  ;;  %v6812_v59 = vpop.f32.mrf.mxu0  ;;  %v6821_v41 = vmul.f32 %v2277_v3, %v1509_v60  ;;  %v6823_v23 = vmul.f32 %v2281_v51, %v1513_v18  ;;  %v6838_v3 = vmul.f32 %v2254_v42, %v6537_v45  ;;  %v9379_v60 = vld [vmem:[#allocation54_spill] sm:$0xff]  ;;  %v2256_v20 = vadd.f32 1.0, %v6729_v36  ;;  %v9385_v8 = vld [vmem:[#allocation17_spill] sm:$0xff] }
 0x1f5   : > { %9369 = vst [vmem:[#allocation75_spill] sm:$0xff] %v6810_v38  ;;  %9370 = vst [vmem:[#allocation76_spill] sm:$0xff] %v6812_v59  ;;  %v6814_v4 = vpop.f32.mrf.mxu1  ;;  %v2786_v51 = vpack.c.bf16 %v9379_v60, %v9378_v15  ;;  %v4634_v7 = vpop.eup %4633  ;;  %4649 = verf.f32 %v1758_v32  ;;  %v1760_v18 = vmul.f32 0.70710677, %v6819_v35  ;;  %v9383_v15 = vld [vmem:[#allocation67_spill] sm:$0xff] }
 0x1f6   : > { %9371 = vst [vmem:[#allocation104_spill] sm:$0xff] %v6814_v4  ;;  %9373 = vst [vmem:[#allocation63_spill] sm:$0xff] %v6821_v41  ;;  %v2784_v4 = vpack.c.bf16 %v6496_v13, %v9375_v11  ;;  %v6833_v59 = vpop.f32.mrf.mxu0  ;;  %v6847_v13 = vmul.f32 0.5, %v6736_v24  ;;  %v9380_v11 = vld [vmem:[#allocation64_spill] sm:$0xff]  ;;  %v6860_v60 = vadd.f32 %v9383_v15, %v5496_v43  ;;  %4651 = verf.f32 %v1779_v62  ;;  %v9388_v15 = vld [vmem:[#allocation46_spill] sm:$0xff] }
 0x1f7   : > { %9374 = vst [vmem:[#allocation105_spill] sm:$0xff] %v6823_v23  ;;  %9376 = vst [vmem:[#allocation20_spill] sm:$0xff] %v6833_v59  ;;  %v6835_v26 = vpop.f32.mrf.mxu1  ;;  %3516 = vmatprep.mubr.bf16.mxu1 %v2786_v51  ;;  %v9384_v24 = vld [vmem:[#allocation44_spill] sm:$0xff]  ;;  %v9389_v51 = vld [vmem:[#allocation27_spill] sm:$0xff]  ;;  %v6887_v38 = vadd.f32 1.0, %v4634_v7  ;;  %4653 = verf.f32 %v1781_v61  ;;  %v6890_v62 = vmul.f32 %v2256_v20, %v6634_v40 }
 0x1f8   : > { %9377 = vst [vmem:[#allocation106_spill] sm:$0xff] %v6835_v26  ;;  %v6851_v26 = vadd.f32 %v9380_v11, %v5505_v47  ;;  %3227 = vmatprep.mubr.bf16.mxu0 %v2784_v4  ;;  %v6853_v45 = vpop.f32.mrf.mxu0  ;;  %v6864_v36 = vadd.f32 %v9384_v24, %v5492_v37  ;;  %v9386_v11 = vld [vmem:[#allocation78_spill] sm:$0xff]  ;;  %v4636_v4 = vpop.eup %4635  ;;  %v9390_v41 = vld [vmem:[#allocation60_spill] sm:$0xff]  ;;  %4655 = verf.f32 %v1760_v18 }
 0x1f9   : > { %9381 = vst [vmem:[#allocation51_spill] sm:$0xff] %v6853_v45  ;;  %v6855_v42 = vpop.f32.mrf.mxu1  ;;  %v9387_v59 = vpack.c.bf16 %v9385_v8, %v9386_v11  ;;  %v6875_v45 = vadd.f32 %v9388_v15, %v5494_v39  ;;  %v9391_v24 = vpack.c.bf16 %v9389_v51, %v9390_v41  ;;  %v2258_v11 = vadd.f32 1.0, %v6771_v17  ;;  %v9397_v20 = vld [vmem:[#allocation32_spill] sm:$0xff] }
 0x1fa   : > { %9382 = vst [vmem:[#allocation54_spill] sm:$0xff] %v6855_v42  ;;  %v6880_v23 = vpop.f32.mrf.mxu0  ;;  %v6885_v42 = vadd.f32 1.0, %v4632_v6  ;;  %v1762_v15 = vmul.f32 0.70710677, %v6851_v26  ;;  %v1783_v41 = vmul.f32 0.70710677, %v6864_v36 }
 0x1fb   : > { %3228 = vmatmul.mubr.bf16.gmra.mxu0 %v9387_v59  ;;  %3517 = vmatmul.mubr.bf16.gmra.mxu1 %v9391_v24  ;;  %9392 = vst [vmem:[#allocation64_spill] sm:$0xff] %v6880_v23  ;;  %v6882_v8 = vpop.f32.mrf.mxu1  ;;  %v4638_v59 = vpop.eup %4637  ;;  %v1785_v51 = vmul.f32 0.70710677, %v6875_v45  ;;  %v1764_v17 = vmul.f32 0.70710677, %v6860_v60  ;;  %v9395_v6 = vld [vmem:[#allocation68_spill] sm:$0xff]  ;;  %v6906_v23 = vadd.f32 %v9397_v20, %v5496_v43 }
 0x1fc   : > { %9393 = vst [vmem:[#allocation67_spill] sm:$0xff] %v6882_v8  ;;  %v6895_v24 = vpop.f32.mrf.mxu0  ;;  %v4640_v32 = vpop.eup %4639  ;;  %v6900_v7 = vadd.f32 %v9395_v6, %v5505_v47  ;;  %v2283_v61 = vadd.f32 1.0, %v4636_v4  ;;  %4657 = verf.f32 %v1783_v41  ;;  %v1515_v6 = vmul.f32 0.5, %v6682_v19  ;;  %v9400_v20 = vld [vmem:[#allocation30_spill] sm:$0xff] }
 0x1fd   : > { %9394 = vst [vmem:[#allocation44_spill] sm:$0xff] %v6895_v24  ;;  %v6902_v8 = vpop.f32.mrf.mxu1  ;;  %v4642_v40 = vpop.eup %4641  ;;  %v2285_v24 = vadd.f32 1.0, %v4638_v59  ;;  %v1519_v4 = vmul.f32 0.5, %v6740_v34  ;;  %4659 = verf.f32 %v1785_v51  ;;  %v6919_v44 = vadd.f32 %v9400_v20, %v5496_v43 }
 0x1fe   : > { %9396 = vst [vmem:[#allocation17_spill] sm:$0xff] %v6902_v8  ;;  %v6912_v18 = vpop.f32.mrf.mxu0  ;;  %v4644_v12 = vpop.eup %4643  ;;  %v2287_v55 = vadd.f32 1.0, %v4642_v40  ;;  %v1517_v8 = vmul.f32 0.5, %v6688_v53  ;;  %4661 = verf.f32 %v1762_v15  ;;  %v1766_v41 = vmul.f32 0.70710677, %v6900_v7 }
 0x1ff   : > { %9399 = vst [vmem:[#allocation78_spill] sm:$0xff] %v6912_v18  ;;  %v2289_v27 = vadd.f32 1.0, %v4644_v12  ;;  %v4646_v59 = vpop.eup %4645  ;;  %v6923_v18 = vmul.f32 %v2283_v61, %v1515_v6  ;;  %v6927_v34 = vpop.f32.mrf.mxu1  ;;  %4663 = verf.f32 %v1764_v17  ;;  %v1768_v53 = vmul.f32 0.70710677, %v6906_v23 }
 0x200   : > { %v6925_v19 = vmul.f32 %v2287_v55, %v1519_v4  ;;  %9401 = vst [vmem:[#allocation46_spill] sm:$0xff] %v6927_v34  ;;  %v6930_v51 = vmul.f32 %v2285_v24, %v1517_v8  ;;  %v6934_v20 = vpop.f32.mrf.mxu0  ;;  %v1770_v12 = vmul.f32 0.70710677, %v6910_v21  ;;  %v6939_v15 = vadd.f32 %v9403_v49, %v5505_v47  ;;  %v9404_v8 = vld [vmem:[#allocation73_spill] sm:$0xff]  ;;  %v4648_v4 = vpop.eup %4647  ;;  %v9405_v55 = vld [vmem:[#allocation74_spill] sm:$0xff] }
 0x201   : > { %v6932_v40 = vmul.f32 %v2289_v27, %v1521_v29  ;;  %9402 = vst [vmem:[#allocation27_spill] sm:$0xff] %v6934_v20  ;;  %v2788_v17 = vpack.c.bf16 %v6669_v54, %v6625_v50  ;;  %v1772_v61 = vmul.f32 0.70710677, %v6919_v44  ;;  %v6950_v24 = vadd.f32 %v9404_v8, %v5496_v43  ;;  %v6958_v50 = vpop.f32.mrf.mxu1 }
 0x202   : > { %v2790_v6 = vpack.c.bf16 %v6724_v16, %v6652_v31  ;;  %v2264_v29 = vadd.f32 1.0, %v4640_v32  ;;  %v2266_v49 = vadd.f32 1.0, %v4646_v59  ;;  %4665 = verf.f32 %v1766_v41  ;;  %9406 = vst [vmem:[#allocation60_spill] sm:$0xff] %v6958_v50  ;;  %v4650_v54 = vpop.eup %4649  ;;  %v6970_v16 = vpop.f32.mrf.mxu0 }
 0x203   : > { %v6956_v34 = vadd.f32 %v9405_v55, %v5505_v47  ;;  %3235 = vmatprep.mubr.bf16.mxu0 %v2788_v17  ;;  %v6961_v27 = vmul.f32 %v2258_v11, %v6656_v63  ;;  %v1500_v8 = vmul.f32 0.5, %v6781_v28  ;;  %v6965_v20 = vmul.f32 0.5, %v6789_v25  ;;  %9408 = vst [vmem:[#allocation68_spill] sm:$0xff] %v6970_v16  ;;  %v4652_v32 = vpop.eup %4651  ;;  %v6983_v11 = vpop.f32.mrf.mxu1  ;;  %v9412_v55 = vld [vmem:[#allocation37_spill] sm:$0xff]  ;;  %v9463_v16 = vld [vmem:[#allocation18_spill] sm:$0xff] }
 0x204   : > { %4667 = verf.f32 %v1768_v53  ;;  %3524 = vmatprep.mubr.bf16.mxu1 %v2790_v6  ;;  %v9407_v31 = vpack.c.bf16 %v6607_v56, %v6522_v10  ;;  %v6974_v59 = vmul.f32 %v6885_v42, %v6732_v30  ;;  %v6977_v63 = vmul.f32 0.5, %v6819_v35  ;;  %9410 = vst [vmem:[#allocation32_spill] sm:$0xff] %v6983_v11  ;;  %v4654_v10 = vpop.eup %4653  ;;  %v6993_v42 = vpop.f32.mrf.mxu0 }
 0x205   : > { %4669 = verf.f32 %v1770_v12  ;;  %v1774_v28 = vmul.f32 0.70710677, %v6939_v15  ;;  %v9409_v25 = vpack.c.bf16 %v6615_v9, %v6547_v48  ;;  %v6987_v56 = vmul.f32 %v6887_v38, %v6752_v33  ;;  %9411 = vst [vmem:[#allocation33_spill] sm:$0xff] %v6993_v42  ;;  %v4656_v38 = vpop.eup %4655 }
 0x206   : > { %3236 = vmatmul.mubr.bf16.gmra.mxu0 %v9407_v31  ;;  %v6990_v30 = vmul.f32 0.5, %v6851_v26  ;;  %4671 = verf.f32 %v1772_v61  ;;  %v1776_v35 = vmul.f32 0.70710677, %v6950_v24  ;;  %v6996_v41 = vmul.f32 %v2264_v29, %v6765_v0  ;;  %v7012_v0 = vpop.f32.mrf.mxu1 }
 0x207   : > { %3525 = vmatmul.mubr.bf16.gmra.mxu1 %v9409_v25  ;;  %v6999_v48 = vmul.f32 %v2266_v49, %v6847_v13  ;;  %v7002_v9 = vmul.f32 0.5, %v6860_v60  ;;  %v1778_v33 = vmul.f32 0.70710677, %v6956_v34  ;;  %v2268_v53 = vadd.f32 1.0, %v4648_v4  ;;  %9413 = vst [vmem:[#allocation30_spill] sm:$0xff] %v7012_v0  ;;  %v9414_v60 = vld [vmem:[#allocation39_spill] sm:$0xff]  ;;  %v7018_v49 = vpop.f32.mrf.mxu0 }
 0x208   : > { %v7006_v26 = vmul.f32 0.5, %v6900_v7  ;;  %v2291_v12 = vadd.f32 1.0, %v4652_v32  ;;  %v7010_v17 = vadd.f32 %v9412_v55, %v5496_v43  ;;  %v2270_v13 = vadd.f32 1.0, %v4650_v54  ;;  %9415 = vst [vmem:[#allocation31_spill] sm:$0xff] %v7018_v49 }
 0x209   : > { %v4658_v61 = vpop.eup %4657  ;;  %4673 = verf.f32 %v1774_v28  ;;  %v2293_v6 = vadd.f32 1.0, %v4654_v10  ;;  %v7016_v29 = vadd.f32 %v9414_v60, %v5505_v47  ;;  %v1523_v7 = vmul.f32 0.5, %v6795_v2  ;;  %v7033_v2 = vpop.f32.mrf.mxu1 }
 0x20a   : > { %v4660_v4 = vpop.eup %4659  ;;  %4675 = verf.f32 %v1776_v35  ;;  %v1527_v31 = vmul.f32 0.5, %v6864_v36  ;;  %v2295_v32 = vadd.f32 1.0, %v4658_v61  ;;  %v1525_v25 = vmul.f32 0.5, %v6805_v46  ;;  %v9416_v35 = vld [vmem:[#allocation45_spill] sm:$0xff]  ;;  %9417 = vst [vmem:[#allocation73_spill] sm:$0xff] %v7033_v2 }
 0x20b   : > { %4677 = verf.f32 %v1778_v33  ;;  %v1529_v54 = vmul.f32 0.5, %v6875_v45  ;;  %v2297_v28 = vadd.f32 1.0, %v4660_v4  ;;  %v4662_v10 = vpop.eup %4661  ;;  %v7024_v55 = vmul.f32 %v2291_v12, %v1523_v7  ;;  %v9419_v12 = vld [vmem:[#allocation38_spill] sm:$0xff]  ;;  %v7044_v4 = vpop.f32.mrf.mxu0 }
 0x20c   : > { %v1780_v60 = vmul.f32 0.70710677, %v7010_v17  ;;  %v7027_v0 = vmul.f32 %v2295_v32, %v1527_v31  ;;  %v7031_v49 = vadd.f32 %v9416_v35, %v5496_v43  ;;  %v4664_v36 = vpop.eup %4663  ;;  %v7035_v33 = vmul.f32 %v2293_v6, %v1525_v25  ;;  %9420 = vst [vmem:[#allocation37_spill] sm:$0xff] %v7044_v4  ;;  %v9421_v32 = vld [vmem:[#allocation42_spill] sm:$0xff] }
 0x20d   : > { %v1782_v46 = vmul.f32 0.70710677, %v7016_v29  ;;  %v7038_v45 = vmul.f32 %v2297_v28, %v1529_v54  ;;  %v7042_v61 = vadd.f32 %v9419_v12, %v5505_v47  ;;  %v2272_v7 = vadd.f32 1.0, %v4656_v38 }
 0x20e   : > { %9418 = vst [vmem:[#allocation74_spill] sm:$0xff] %v7035_v33  ;;  %v7050_v35 = vadd.f32 %v9421_v32, %v5492_v37  ;;  %v2792_v6 = vpack.c.bf16 %v6890_v62, %v6762_v1  ;;  %v7054_v25 = vmul.f32 %v2268_v53, %v1500_v8  ;;  %v2274_v54 = vadd.f32 1.0, %v4662_v10  ;;  %v9422_v32 = vld [vmem:[#allocation43_spill] sm:$0xff]  ;;  %v7066_v1 = vpop.f32.mrf.mxu1 }
 0x20f   : > { %v2794_v12 = vpack.c.bf16 %v6961_v27, %v6838_v3  ;;  %v4666_v38 = vpop.eup %4665  ;;  %v1512_v4 = vmul.f32 0.5, %v6906_v23  ;;  %4679 = verf.f32 %v1780_v60  ;;  %v1784_v31 = vmul.f32 0.70710677, %v7031_v49  ;;  %9423 = vst [vmem:[#allocation39_spill] sm:$0xff] %v7066_v1  ;;  %v7076_v27 = vpop.f32.mrf.mxu0 }
 0x210   : > { %v7064_v2 = vadd.f32 %v9422_v32, %v5494_v39  ;;  %3243 = vmatprep.mubr.bf16.mxu0 %v2792_v6  ;;  %v7069_v8 = vmul.f32 %v2270_v13, %v6965_v20  ;;  %v1514_v53 = vmul.f32 0.5, %v6910_v21  ;;  %4681 = verf.f32 %v1782_v46  ;;  %9425 = vst [vmem:[#allocation45_spill] sm:$0xff] %v7076_v27  ;;  %v9426_v13 = vld [vmem:[#allocation47_spill] sm:$0xff] }
 0x211   : > { %v4668_v62 = vpop.eup %4667  ;;  %v1786_v3 = vmul.f32 0.70710677, %v7042_v61  ;;  %3532 = vmatprep.mubr.bf16.mxu1 %v2794_v12  ;;  %v9424_v23 = vpack.c.bf16 %v6774_v14, %v6727_v52  ;;  %v7079_v60 = vmul.f32 %v2272_v7, %v6977_v63  ;;  %v2276_v6 = vadd.f32 1.0, %v4664_v36  ;;  %v7089_v12 = vpop.f32.mrf.mxu1  ;;  %v9429_v36 = vld [vmem:[#allocation57_spill] sm:$0xff] }
 0x212   : > { %v4670_v10 = vpop.eup %4669  ;;  %v1787_v20 = vmul.f32 0.70710677, %v7050_v35  ;;  %v7084_v21 = vadd.f32 %v9426_v13, %v5496_v43  ;;  %v9427_v46 = vpack.c.bf16 %v6826_v57, %v6750_v58  ;;  %9428 = vst [vmem:[#allocation38_spill] sm:$0xff] %v7089_v12  ;;  %v7092_v14 = vmul.f32 %v2274_v54, %v6990_v30  ;;  %v9431_v57 = vld [vmem:[#allocation48_spill] sm:$0xff] }
 0x213   : > { %3244 = vmatmul.mubr.bf16.gmra.mxu0 %v9424_v23  ;;  %v4672_v52 = vpop.eup %4671  ;;  %v2278_v32 = vadd.f32 1.0, %v4666_v38  ;;  %v1516_v63 = vmul.f32 0.5, %v6919_v44  ;;  %v7097_v7 = vadd.f32 %v9429_v36, %v5492_v37  ;;  %v7099_v23 = vpop.f32.mrf.mxu0  ;;  %v2280_v13 = vadd.f32 1.0, %v4668_v62  ;;  %v9432_v44 = vld [vmem:[#allocation21_spill] sm:$0xff] }
 0x214   : > { %3533 = vmatmul.mubr.bf16.gmra.mxu1 %v9427_v46  ;;  %9430 = vst [vmem:[#allocation42_spill] sm:$0xff] %v7099_v23  ;;  %4683 = verf.f32 %v1784_v31  ;;  %v1789_v58 = vmul.f32 0.70710677, %v7064_v2  ;;  %v7104_v46 = vadd.f32 %v9431_v57, %v5494_v39  ;;  %v2282_v28 = vadd.f32 1.0, %v4670_v10  ;;  %v7111_v38 = vpop.f32.mrf.mxu1 }
 0x215   : > { %v1518_v30 = vmul.f32 0.5, %v6939_v15  ;;  %4685 = verf.f32 %v1786_v3  ;;  %v7109_v54 = vadd.f32 %v9432_v44, %v5505_v47  ;;  %9433 = vst [vmem:[#allocation43_spill] sm:$0xff] %v7111_v38  ;;  %v7114_v62 = vmul.f32 %v2276_v6, %v7002_v9  ;;  %v7117_v57 = vpop.f32.mrf.mxu0  ;;  %v9435_v6 = vld [vmem:[#allocation22_spill] sm:$0xff] }
 0x216   : > { %v4674_v36 = vpop.eup %4673  ;;  %v2284_v31 = vadd.f32 1.0, %v4672_v52  ;;  %4687 = verf.f32 %v1787_v20  ;;  %v1788_v23 = vmul.f32 0.70710677, %v7084_v21  ;;  %9434 = vst [vmem:[#allocation47_spill] sm:$0xff] %v7117_v57  ;;  %v7120_v15 = vmul.f32 %v2278_v32, %v7006_v26  ;;  %v7139_v32 = vpop.f32.mrf.mxu1 }
 0x217   : > { %v4676_v10 = vpop.eup %4675  ;;  %v1520_v3 = vmul.f32 0.5, %v6950_v24  ;;  %v1522_v44 = vmul.f32 0.5, %v6956_v34  ;;  %v1791_v38 = vmul.f32 0.70710677, %v7097_v7  ;;  %v7125_v27 = vmul.f32 %v2280_v13, %v1512_v4  ;;  %9436 = vst [vmem:[#allocation57_spill] sm:$0xff] %v7139_v32 }
 0x218   : > { %v4678_v12 = vpop.eup %4677  ;;  %4689 = verf.f32 %v1789_v58  ;;  %v1793_v9 = vmul.f32 0.70710677, %v7104_v46  ;;  %v7130_v20 = vadd.f32 %v9435_v6, %v5496_v43  ;;  %v7132_v52 = vmul.f32 %v2282_v28, %v1514_v53  ;;  %v9437_v58 = vld [vmem:[#allocation79_spill] sm:$0xff]  ;;  %v7147_v6 = vpop.f32.mrf.mxu0 }
 0x219   : > { %v1524_v26 = vmul.f32 0.5, %v7010_v17  ;;  %v7136_v24 = vmul.f32 0.5, %v7016_v29  ;;  %v1790_v34 = vmul.f32 0.70710677, %v7109_v54  ;;  %v7141_v4 = vmul.f32 %v2284_v31, %v1516_v63  ;;  %9438 = vst [vmem:[#allocation48_spill] sm:$0xff] %v7147_v6  ;;  %v9439_v17 = vld [vmem:[#allocation49_spill] sm:$0xff] }
 0x21a   : > { %v2286_v13 = vadd.f32 1.0, %v4674_v36  ;;  %4691 = verf.f32 %v1788_v23  ;;  %v7145_v57 = vadd.f32 %v9437_v58, %v5505_v47  ;;  %v7150_v28 = vmul.f32 0.5, %v7031_v49  ;;  %v9440_v23 = vld [vmem:[#allocation80_spill] sm:$0xff] }
 0x21b   : > { %4693 = verf.f32 %v1791_v38  ;;  %v7154_v29 = vadd.f32 %v9439_v17, %v5492_v37  ;;  %v2796_v53 = vpack.c.bf16 %v6996_v41, %v6974_v59  ;;  %v1792_v63 = vmul.f32 0.70710677, %v7130_v20  ;;  %v9441_v17 = vld [vmem:[#allocation24_spill] sm:$0xff]  ;;  %v7169_v59 = vpop.f32.mrf.mxu1 }
 0x21c   : > { %4695 = verf.f32 %v1793_v9  ;;  %v7161_v36 = vadd.f32 %v9440_v23, %v5494_v39  ;;  %v2798_v31 = vpack.c.bf16 %v6999_v48, %v6987_v56  ;;  %v4680_v49 = vpop.eup %4679  ;;  %v2288_v58 = vadd.f32 1.0, %v4676_v10  ;;  %9442 = vst [vmem:[#allocation21_spill] sm:$0xff] %v7169_v59  ;;  %v9443_v56 = vld [vmem:[#allocation19_spill] sm:$0xff]  ;;  %v7184_v10 = vpop.f32.mrf.mxu0 }
 0x21d   : > { %v2290_v38 = vadd.f32 1.0, %v4678_v12  ;;  %4697 = verf.f32 %v1790_v34  ;;  %v7167_v6 = vadd.f32 %v9441_v17, %v5496_v43  ;;  %3251 = vmatprep.mubr.bf16.mxu0 %v2796_v53  ;;  %v4682_v41 = vpop.eup %4681  ;;  %v7171_v9 = vmul.f32 %v2286_v13, %v1518_v30  ;;  %9445 = vst [vmem:[#allocation22_spill] sm:$0xff] %v7184_v10  ;;  %v9446_v13 = vld [vmem:[#allocation50_spill] sm:$0xff]  ;;  %v9447_v17 = vld [vmem:[#allocation91_spill] sm:$0xff]  ;;  %v7198_v59 = vpop.f32.mrf.mxu1 }
 0x21e   : > { %v7174_v23 = vmul.f32 0.5, %v7042_v61  ;;  %v1794_v32 = vmul.f32 0.70710677, %v7145_v57  ;;  %v7179_v48 = vadd.f32 %v9443_v56, %v5505_v47  ;;  %3540 = vmatprep.mubr.bf16.mxu1 %v2798_v31  ;;  %v9444_v12 = vpack.c.bf16 %v6584_v5, %v6582_v22  ;;  %v9448_v56 = vld [vmem:[#allocation90_spill] sm:$0xff]  ;;  %9450 = vst [vmem:[#allocation79_spill] sm:$0xff] %v7198_v59 }
 0x21f   : > { %v1531_v34 = vmul.f32 0.5, %v7050_v35  ;;  %v7188_v30 = vmul.f32 0.5, %v7064_v2  ;;  %v1795_v61 = vmul.f32 0.70710677, %v7154_v29  ;;  %v7193_v53 = vadd.f32 %v9446_v13, %v5492_v37  ;;  %v9451_v35 = vld [vmem:[#allocation25_spill] sm:$0xff] }
 0x220   : > { %3252 = vmatmul.mubr.bf16.gmra.mxu0 %v9444_v12  ;;  %v9449_v31 = vpack.c.bf16 %v9447_v17, %v9448_v56  ;;  %v2292_v5 = vadd.f32 1.0, %v4680_v49  ;;  %4699 = verf.f32 %v1792_v63  ;;  %v1797_v22 = vmul.f32 0.70710677, %v7161_v36  ;;  %v7205_v12 = vpop.f32.mrf.mxu0 }
 0x221   : > { %v7203_v2 = vadd.f32 %v9451_v35, %v5494_v39  ;;  %9452 = vst [vmem:[#allocation49_spill] sm:$0xff] %v7205_v12  ;;  %v4684_v10 = vpop.eup %4683  ;;  %v7207_v1 = vmul.f32 %v2288_v58, %v1520_v3  ;;  %v7209_v13 = vmul.f32 %v2290_v38, %v1522_v44  ;;  %v2294_v42 = vadd.f32 1.0, %v4682_v41  ;;  %v7219_v35 = vpop.f32.mrf.mxu1 }
 0x222   : > { %3541 = vmatmul.mubr.bf16.gmra.mxu1 %v9449_v31  ;;  %v1796_v17 = vmul.f32 0.70710677, %v7167_v6  ;;  %v4686_v56 = vpop.eup %4685  ;;  %v7213_v49 = vmul.f32 0.5, %v7084_v21  ;;  %v7216_v63 = vmul.f32 0.5, %v7109_v54  ;;  %4701 = verf.f32 %v1794_v32  ;;  %9453 = vst [vmem:[#allocation80_spill] sm:$0xff] %v7219_v35  ;;  %v7228_v21 = vpop.f32.mrf.mxu0 }
 0x223   : > { %v1798_v31 = vmul.f32 0.70710677, %v7179_v48  ;;  %v4688_v12 = vpop.eup %4687  ;;  %v7222_v3 = vmul.f32 0.5, %v7097_v7  ;;  %v7225_v44 = vmul.f32 0.5, %v7104_v46  ;;  %4703 = verf.f32 %v1795_v61  ;;  %9454 = vst [vmem:[#allocation24_spill] sm:$0xff] %v7228_v21  ;;  %v9455_v46 = vld [vmem:[#allocation81_spill] sm:$0xff] }
 0x224   : > { %v1799_v58 = vmul.f32 0.70710677, %v7193_v53  ;;  %v7230_v38 = vmul.f32 %v2292_v5, %v1524_v26  ;;  %v7233_v54 = vmul.f32 0.5, %v7130_v20  ;;  %4705 = verf.f32 %v1797_v22  ;;  %v9456_v26 = vld [vmem:[#allocation82_spill] sm:$0xff]  ;;  %v7245_v5 = vpop.f32.mrf.mxu1 }
 0x225   : > { %v1801_v32 = vmul.f32 0.70710677, %v7203_v2  ;;  %v4690_v41 = vpop.eup %4689  ;;  %v7237_v7 = vmul.f32 %v2294_v42, %v7136_v24  ;;  %v2296_v35 = vadd.f32 1.0, %v4684_v10  ;;  %4707 = verf.f32 %v1796_v17  ;;  %9457 = vst [vmem:[#allocation19_spill] sm:$0xff] %v7245_v5  ;;  %v9458_v24 = vld [vmem:[#allocation28_spill] sm:$0xff]  ;;  %v7255_v17 = vpop.f32.mrf.mxu0 }
 0x226   : > { %v7241_v61 = vadd.f32 %v9455_v46, %v5496_v43  ;;  %v2298_v59 = vadd.f32 1.0, %v4686_v56  ;;  %v2299_v21 = vadd.f32 1.0, %v4688_v12  ;;  %4709 = verf.f32 %v1798_v31  ;;  %9459 = vst [vmem:[#allocation50_spill] sm:$0xff] %v7255_v17  ;;  %v9460_v31 = vld [vmem:[#allocation83_spill] sm:$0xff] }
 0x227   : > { %v1259_v20 = vadd.f32 %v9456_v26, %v5505_v47  ;;  %v4692_v22 = vpop.eup %4691  ;;  %v7248_v11 = vmul.f32 0.5, %v7145_v57  ;;  %v7251_v42 = vmul.f32 0.5, %v7154_v29  ;;  %4711 = verf.f32 %v1799_v58 }
 0x228   : > { %v910_v10 = vadd.f32 %v9458_v24, %v5492_v37  ;;  %v4694_v12 = vpop.eup %4693  ;;  %v2301_v56 = vadd.f32 1.0, %v4690_v41  ;;  %4713 = verf.f32 %v1801_v32  ;;  %v1263_v46 = vadd.f32 %v9460_v31, %v5494_v39 }
 0x229   : > { %v2800_v26 = vpack.c.bf16 %v7079_v60, %v7054_v25  ;;  %v4696_v57 = vpop.eup %4695  ;;  %v7262_v5 = vmul.f32 %v2296_v35, %v7150_v28  ;;  %v7265_v29 = vmul.f32 0.5, %v7161_v36  ;;  %v1800_v58 = vmul.f32 0.70710677, %v7241_v61  ;;  %v7278_v28 = vpop.f32.mrf.mxu1 }
 0x22a   : > { %v2802_v24 = vpack.c.bf16 %v7092_v14, %v7069_v8  ;;  %v4698_v41 = vpop.eup %4697  ;;  %v7271_v32 = vmul.f32 %v2298_v59, %v7174_v23  ;;  %v7273_v31 = vmul.f32 %v2299_v21, %v1531_v34  ;;  %v7276_v25 = vmul.f32 0.5, %v7167_v6  ;;  %9462 = vst [vmem:[#allocation90_spill] sm:$0xff] %v7278_v28  ;;  %v9464_v8 = vld [vmem:[#allocation98_spill] sm:$0xff]  ;;  %v9465_v14 = vld [vmem:[#allocation97_spill] sm:$0xff]  ;;  %v7287_v23 = vpop.f32.mrf.mxu0 }
 0x22b   : > { %v1802_v60 = vmul.f32 0.70710677, %v1259_v20  ;;  %3259 = vmatprep.mubr.bf16.mxu0 %v2800_v26  ;;  %v2300_v36 = vadd.f32 1.0, %v4692_v22  ;;  %v2303_v35 = vadd.f32 1.0, %v4694_v12  ;;  %v1803_v17 = vmul.f32 0.70710677, %v910_v10 }
 0x22c   : > { %9461 = vst [vmem:[#allocation91_spill] sm:$0xff] %v7273_v31  ;;  %v7282_v50 = vadd.f32 %v9463_v16, %v5496_v43  ;;  %3548 = vmatprep.mubr.bf16.mxu1 %v2802_v24  ;;  %v9466_v59 = vpack.c.bf16 %v9464_v8, %v9465_v14  ;;  %9467 = vst [vmem:[#allocation25_spill] sm:$0xff] %v7287_v23  ;;  %v7290_v6 = vmul.f32 %v2301_v56, %v7188_v30  ;;  %v9468_v22 = vld [vmem:[#allocation53_spill] sm:$0xff]  ;;  %v9469_v26 = vld [vmem:[#allocation99_spill] sm:$0xff]  ;;  %v7299_v24 = vpop.f32.mrf.mxu1 }
 0x22d   : > { %v2305_v34 = vadd.f32 1.0, %v4696_v57  ;;  %v1805_v21 = vmul.f32 0.70710677, %v1263_v46  ;;  %v7294_v12 = vadd.f32 %v9468_v22, %v5492_v37  ;;  %v9470_v28 = vld [vmem:[#allocation61_spill] sm:$0xff]  ;;  %9472 = vst [vmem:[#allocation81_spill] sm:$0xff] %v7299_v24  ;;  %v4700_v33 = vpop.eup %4699  ;;  %v2302_v8 = vadd.f32 1.0, %v4698_v41  ;;  %v7308_v57 = vpop.f32.mrf.mxu0 }
 0x22e   : > { %3260 = vmatmul.mubr.bf16.gmra.mxu0 %v9466_v59  ;;  %v9471_v16 = vpack.c.bf16 %v9469_v26, %v9470_v28  ;;  %v7302_v14 = vmul.f32 0.5, %v7179_v48  ;;  %4715 = verf.f32 %v1800_v58  ;;  %v9473_v30 = vld [vmem:[#allocation52_spill] sm:$0xff]  ;;  %9474 = vst [vmem:[#allocation82_spill] sm:$0xff] %v7308_v57  ;;  %v7311_v59 = vmul.f32 0.5, %v7193_v53  ;;  %v7327_v53 = vpop.f32.mrf.mxu1  ;;  %v9485_v31 = vld [vmem:[#allocation87_spill] sm:$0xff] }
 0x22f   : > { %v7306_v56 = vadd.f32 %v9473_v30, %v5505_v47  ;;  %v7314_v28 = vmul.f32 0.5, %v7203_v2  ;;  %4717 = verf.f32 %v1802_v60  ;;  %v9475_v22 = vld [vmem:[#allocation84_spill] sm:$0xff]  ;;  %v4702_v48 = vpop.eup %4701  ;;  %v7321_v58 = vmul.f32 %v2300_v36, %v7213_v49  ;;  %9477 = vst [vmem:[#allocation83_spill] sm:$0xff] %v7327_v53  ;;  %v7333_v57 = vpop.f32.mrf.mxu0 }
 0x230   : > { %3549 = vmatmul.mubr.bf16.gmra.mxu1 %v9471_v16  ;;  %v7318_v41 = vadd.f32 %v9475_v22, %v5494_v39  ;;  %v7324_v26 = vmul.f32 %v2303_v35, %v7222_v3  ;;  %4719 = verf.f32 %v1803_v17  ;;  %v1804_v16 = vmul.f32 0.70710677, %v7282_v50  ;;  %v4704_v30 = vpop.eup %4703  ;;  %9478 = vst [vmem:[#allocation18_spill] sm:$0xff] %v7333_v57  ;;  %v7353_v23 = vpop.f32.mrf.mxu1 }
 0x231   : > { %9476 = vst [vmem:[#allocation28_spill] sm:$0xff] %v7321_v58  ;;  %v7330_v2 = vmul.f32 %v2305_v34, %v7225_v44  ;;  %v2304_v60 = vadd.f32 1.0, %v4700_v33  ;;  %4721 = verf.f32 %v1805_v21  ;;  %v1807_v22 = vmul.f32 0.70710677, %v7294_v12  ;;  %v4706_v49 = vpop.eup %4705  ;;  %v9480_v21 = vld [vmem:[#allocation85_spill] sm:$0xff]  ;;  %9482 = vst [vmem:[#allocation97_spill] sm:$0xff] %v7353_v23 }
 0x232   : > { %v7336_v36 = vmul.f32 %v2302_v8, %v7216_v63  ;;  %v7339_v3 = vmul.f32 0.5, %v7241_v61  ;;  %v7341_v17 = vmul.f32 0.5, %v1259_v20  ;;  %v1806_v35 = vmul.f32 0.70710677, %v7306_v56  ;;  %v4708_v53 = vpop.eup %4707  ;;  %v9481_v61 = vld [vmem:[#allocation86_spill] sm:$0xff] }
 0x233   : > { %v7344_v44 = vmul.f32 0.5, %v910_v10  ;;  %v7346_v33 = vmul.f32 0.5, %v1263_v46  ;;  %v1809_v34 = vmul.f32 0.70710677, %v7318_v41  ;;  %v916_v57 = vadd.f32 %v9480_v21, %v5496_v43  ;;  %v4710_v24 = vpop.eup %4709  ;;  %v7362_v21 = vpop.f32.mrf.mxu0 }
 0x234   : > { %9479 = vst [vmem:[#allocation98_spill] sm:$0xff] %v7336_v36  ;;  %v2306_v63 = vadd.f32 1.0, %v4702_v48  ;;  %v2307_v8 = vadd.f32 1.0, %v4704_v30  ;;  %4723 = verf.f32 %v1804_v16  ;;  %v1269_v20 = vadd.f32 %v9481_v61, %v5505_v47  ;;  %v4712_v36 = vpop.eup %4711  ;;  %9483 = vst [vmem:[#allocation53_spill] sm:$0xff] %v7362_v21  ;;  %v9484_v30 = vld [vmem:[#allocation29_spill] sm:$0xff] }
 0x235   : > { %v7360_v58 = vmul.f32 %v2304_v60, %v7233_v54  ;;  %4725 = verf.f32 %v1807_v22  ;;  %v4714_v48 = vpop.eup %4713  ;;  %v2309_v16 = vadd.f32 1.0, %v4706_v49  ;;  %v920_v61 = vadd.f32 %v9484_v30, %v5492_v37  ;;  %v7378_v30 = vpop.f32.mrf.mxu1 }
 0x236   : > { %4727 = verf.f32 %v1806_v35  ;;  %v2804_v23 = vpack.c.bf16 %v7125_v27, %v7114_v62  ;;  %v1808_v10 = vmul.f32 0.70710677, %v916_v57  ;;  %v1273_v46 = vadd.f32 %v9485_v31, %v5494_v39  ;;  %9486 = vst [vmem:[#allocation99_spill] sm:$0xff] %v7378_v30  ;;  %v9487_v31 = vld [vmem:[#allocation75_spill] sm:$0xff] }
 0x237   : > { %4729 = verf.f32 %v1809_v34  ;;  %v2806_v54 = vpack.c.bf16 %v7132_v52, %v7120_v15  ;;  %v7373_v60 = vmul.f32 %v2306_v63, %v7248_v11  ;;  %v7376_v22 = vmul.f32 %v2307_v8, %v7251_v42  ;;  %v9488_v15 = vld [vmem:[#allocation23_spill] sm:$0xff]  ;;  %v7386_v11 = vpop.f32.mrf.mxu0  ;;  %v9492_v63 = vld [vmem:[#allocation105_spill] sm:$0xff] }
 0x238   : > { %v2308_v49 = vadd.f32 1.0, %v4708_v53  ;;  %v1810_v35 = vmul.f32 0.70710677, %v1269_v20  ;;  %3267 = vmatprep.mubr.bf16.mxu0 %v2804_v23  ;;  %v2310_v27 = vadd.f32 1.0, %v4710_v24  ;;  %v2311_v62 = vadd.f32 1.0, %v4712_v36  ;;  %9490 = vst [vmem:[#allocation61_spill] sm:$0xff] %v7386_v11 }
 0x239   : > { %v2313_v34 = vadd.f32 1.0, %v4714_v48  ;;  %v7381_v21 = vmul.f32 0.5, %v7282_v50  ;;  %3556 = vmatprep.mubr.bf16.mxu1 %v2806_v54  ;;  %v9489_v52 = vpack.c.bf16 %v9487_v31, %v9488_v15  ;;  %v7389_v42 = vmul.f32 %v2309_v16, %v7265_v29  ;;  %v9491_v24 = vld [vmem:[#allocation55_spill] sm:$0xff]  ;;  %v7399_v48 = vpop.f32.mrf.mxu1  ;;  %v9496_v16 = vld [vmem:[#allocation88_spill] sm:$0xff]  ;;  %v7406_v15 = vpop.f32.mrf.mxu0 }
 0x23a   : > { %v7392_v23 = vmul.f32 0.5, %v7306_v56  ;;  %v1811_v53 = vmul.f32 0.70710677, %v920_v61  ;;  %v922_v36 = vadd.f32 %v9491_v24, %v5496_v43  ;;  %v9493_v50 = vld [vmem:[#allocation63_spill] sm:$0xff]  ;;  %9495 = vst [vmem:[#allocation52_spill] sm:$0xff] %v7399_v48  ;;  %v7402_v31 = vmul.f32 0.5, %v7294_v12 }
 0x23b   : > { %3268 = vmatmul.mubr.bf16.gmra.mxu0 %v9489_v52  ;;  %v9494_v8 = vpack.c.bf16 %v9492_v63, %v9493_v50  ;;  %v4716_v54 = vpop.eup %4715  ;;  %4731 = verf.f32 %v1808_v10  ;;  %v1813_v29 = vmul.f32 0.70710677, %v1273_v46  ;;  %v1275_v56 = vadd.f32 %v9496_v16, %v5505_v47  ;;  %9497 = vst [vmem:[#allocation84_spill] sm:$0xff] %v7406_v15  ;;  %v9499_v50 = vld [vmem:[#allocation65_spill] sm:$0xff]  ;;  %v7433_v30 = vpop.f32.mrf.mxu0 }
 0x23c   : > { %v4718_v52 = vpop.eup %4717  ;;  %v7409_v24 = vmul.f32 %v2308_v49, %v7276_v25  ;;  %v7412_v63 = vmul.f32 0.5, %v7318_v41  ;;  %4733 = verf.f32 %v1810_v35  ;;  %v7419_v10 = vmul.f32 %v2310_v27, %v7302_v14  ;;  %v7429_v49 = vpop.f32.mrf.mxu1  ;;  %9503 = vst [vmem:[#allocation87_spill] sm:$0xff] %v7433_v30 }
 0x23d   : > { %3557 = vmatmul.mubr.bf16.gmra.mxu1 %v9494_v8  ;;  %v7416_v8 = vadd.f32 %v9499_v50, %v5492_v37  ;;  %v4720_v12 = vpop.eup %4719  ;;  %v7422_v16 = vmul.f32 %v2311_v62, %v7311_v59  ;;  %v7425_v15 = vmul.f32 %v2313_v34, %v7314_v28  ;;  %v7427_v25 = vmul.f32 0.5, %v916_v57  ;;  %9501 = vst [vmem:[#allocation29_spill] sm:$0xff] %v7429_v49  ;;  %v9502_v50 = vld [vmem:[#allocation89_spill] sm:$0xff]  ;;  %v9506_v49 = vld [vmem:[#allocation56_spill] sm:$0xff] }
 0x23e   : > { %9498 = vst [vmem:[#allocation85_spill] sm:$0xff] %v7409_v24  ;;  %9500 = vst [vmem:[#allocation86_spill] sm:$0xff] %v7419_v10  ;;  %v4722_v41 = vpop.eup %4721  ;;  %v2312_v35 = vadd.f32 1.0, %v4716_v54  ;;  %4735 = verf.f32 %v1811_v53  ;;  %v1812_v48 = vmul.f32 0.70710677, %v922_v36  ;;  %v1277_v11 = vadd.f32 %v9502_v50, %v5494_v39  ;;  %v7455_v24 = vpop.f32.mrf.mxu0 }
 0x23f   : > { %v2314_v14 = vadd.f32 1.0, %v4718_v52  ;;  %v7435_v27 = vmul.f32 0.5, %v1269_v20  ;;  %4737 = verf.f32 %v1813_v29  ;;  %v1814_v59 = vmul.f32 0.70710677, %v1275_v56  ;;  %v9504_v20 = vld [vmem:[#allocation66_spill] sm:$0xff]  ;;  %v7448_v29 = vpop.f32.mrf.mxu1  ;;  %9507 = vst [vmem:[#allocation23_spill] sm:$0xff] %v7455_v24 }
 0x240   : > { %v2315_v28 = vadd.f32 1.0, %v4720_v12  ;;  %v7437_v62 = vmul.f32 0.5, %v920_v61  ;;  %v7439_v57 = vmul.f32 0.5, %v1273_v46  ;;  %v1815_v34 = vmul.f32 0.70710677, %v7416_v8  ;;  %9505 = vst [vmem:[#allocation75_spill] sm:$0xff] %v7448_v29 }
 0x241   : > { %v4724_v54 = vpop.eup %4723  ;;  %v2317_v30 = vadd.f32 1.0, %v4722_v41  ;;  %v926_v52 = vadd.f32 %v9504_v20, %v5496_v43  ;;  %v7451_v61 = vmul.f32 %v2312_v35, %v7339_v3  ;;  %4739 = verf.f32 %v1812_v48  ;;  %v9508_v41 = vld [vmem:[#allocation92_spill] sm:$0xff] }
 0x242   : > { %v4726_v12 = vpop.eup %4725  ;;  %v1817_v46 = vmul.f32 0.70710677, %v1277_v11  ;;  %v1279_v10 = vadd.f32 %v9506_v49, %v5505_v47  ;;  %v7458_v50 = vmul.f32 %v2314_v14, %v7341_v17  ;;  %4741 = verf.f32 %v1814_v59 }
 0x243   : > { %v4728_v53 = vpop.eup %4727  ;;  %v930_v20 = vadd.f32 %v9508_v41, %v5492_v37  ;;  %v2808_v29 = vpack.c.bf16 %v7207_v1, %v7141_v4  ;;  %v7465_v48 = vmul.f32 %v2315_v28, %v7344_v44  ;;  %v2316_v35 = vadd.f32 1.0, %v4724_v54  ;;  %v7474_v41 = vpop.f32.mrf.mxu1  ;;  %v9510_v44 = vld [vmem:[#allocation93_spill] sm:$0xff] }
 0x244   : > { %v4730_v3 = vpop.eup %4729  ;;  %4743 = verf.f32 %v1815_v34  ;;  %v2810_v49 = vpack.c.bf16 %v7209_v13, %v7171_v9  ;;  %v7470_v24 = vmul.f32 %v2317_v30, %v7346_v33  ;;  %v2319_v17 = vadd.f32 1.0, %v4726_v12  ;;  %9509 = vst [vmem:[#allocation55_spill] sm:$0xff] %v7474_v41  ;;  %v7481_v13 = vpop.f32.mrf.mxu0  ;;  %v9513_v34 = vld [vmem:[#allocation69_spill] sm:$0xff] }
 0x245   : > { %v7472_v14 = vmul.f32 0.5, %v922_v36  ;;  %v1816_v59 = vmul.f32 0.70710677, %v926_v52  ;;  %3275 = vmatprep.mubr.bf16.mxu0 %v2808_v29  ;;  %v2318_v1 = vadd.f32 1.0, %v4728_v53  ;;  %4745 = verf.f32 %v1817_v46  ;;  %9512 = vst [vmem:[#allocation105_spill] sm:$0xff] %v7481_v13  ;;  %v7492_v29 = vpop.f32.mrf.mxu1  ;;  %v9516_v46 = vld [vmem:[#allocation58_spill] sm:$0xff] }
 0x246   : > { %v1818_v4 = vmul.f32 0.70710677, %v1279_v10  ;;  %v1283_v28 = vadd.f32 %v9510_v44, %v5494_v39  ;;  %3564 = vmatprep.mubr.bf16.mxu1 %v2810_v49  ;;  %v9511_v9 = vpack.c.bf16 %v6925_v19, %v6923_v18  ;;  %v2321_v33 = vadd.f32 1.0, %v4730_v3  ;;  %9515 = vst [vmem:[#allocation63_spill] sm:$0xff] %v7492_v29  ;;  %v7506_v49 = vpop.f32.mrf.mxu0 }
 0x247   : > { %v7483_v30 = vmul.f32 0.5, %v1275_v56  ;;  %v1819_v36 = vmul.f32 0.70710677, %v930_v20  ;;  %v7487_v54 = vadd.f32 %v9513_v34, %v5492_v37  ;;  %v9514_v53 = vpack.c.bf16 %v6932_v40, %v6930_v51  ;;  %9517 = vst [vmem:[#allocation88_spill] sm:$0xff] %v7506_v49 }
 0x248   : > { %3276 = vmatmul.mubr.bf16.gmra.mxu0 %v9511_v9  ;;  %v4732_v12 = vpop.eup %4731  ;;  %v7495_v18 = vmul.f32 %v2316_v35, %v7381_v21  ;;  %v7498_v19 = vmul.f32 0.5, %v7416_v8  ;;  %v7500_v56 = vmul.f32 0.5, %v1277_v11  ;;  %v7504_v3 = vadd.f32 %v9516_v46, %v5494_v39  ;;  %v9518_v21 = vld [vmem:[#allocation94_spill] sm:$0xff]  ;;  %v9519_v9 = vld [vmem:[#allocation95_spill] sm:$0xff] }
 0x249   : > { %3565 = vmatmul.mubr.bf16.gmra.mxu1 %v9514_v53  ;;  %v4734_v44 = vpop.eup %4733  ;;  %v7509_v51 = vmul.f32 %v2319_v17, %v7402_v31  ;;  %v7511_v40 = vmul.f32 0.5, %v926_v52  ;;  %4747 = verf.f32 %v1816_v59  ;;  %v932_v35 = vadd.f32 %v9518_v21, %v5496_v43  ;;  %v7520_v53 = vpop.f32.mrf.mxu1 }
 0x24a   : > { %v7516_v8 = vmul.f32 %v2318_v1, %v7392_v23  ;;  %4749 = verf.f32 %v1818_v4  ;;  %v1821_v11 = vmul.f32 0.70710677, %v1283_v28  ;;  %v1285_v34 = vadd.f32 %v9519_v9, %v5505_v47  ;;  %9520 = vst [vmem:[#allocation65_spill] sm:$0xff] %v7520_v53  ;;  %v7526_v59 = vpop.f32.mrf.mxu0 }
 0x24b   : > { %v4736_v46 = vpop.eup %4735  ;;  %v7523_v31 = vmul.f32 %v2321_v33, %v7412_v63  ;;  %v2320_v52 = vadd.f32 1.0, %v4732_v12  ;;  %4751 = verf.f32 %v1819_v36  ;;  %v1823_v17 = vmul.f32 0.70710677, %v7487_v54  ;;  %9521 = vst [vmem:[#allocation89_spill] sm:$0xff] %v7526_v59  ;;  %v9522_v33 = vld [vmem:[#allocation70_spill] sm:$0xff]  ;;  %v7541_v29 = vpop.f32.mrf.mxu1 }
 0x24c   : > { %v4738_v21 = vpop.eup %4737  ;;  %v2322_v23 = vadd.f32 1.0, %v4734_v44  ;;  %v7528_v1 = vmul.f32 0.5, %v1279_v10  ;;  %v7530_v4 = vmul.f32 0.5, %v930_v20  ;;  %v1825_v9 = vmul.f32 0.70710677, %v7504_v3  ;;  %v9523_v44 = vld [vmem:[#allocation35_spill] sm:$0xff]  ;;  %v7548_v41 = vpop.f32.mrf.mxu0 }
 0x24d   : > { %v7535_v49 = vmul.f32 0.5, %v1283_v28  ;;  %v1820_v63 = vmul.f32 0.70710677, %v932_v35  ;;  %v936_v36 = vadd.f32 %v9522_v33, %v5496_v43  ;;  %v2323_v12 = vadd.f32 1.0, %v4736_v46  ;;  %9524 = vst [vmem:[#allocation66_spill] sm:$0xff] %v7541_v29  ;;  %9525 = vst [vmem:[#allocation56_spill] sm:$0xff] %v7548_v41 }
 0x24e   : > { %4753 = verf.f32 %v1821_v11  ;;  %v1822_v59 = vmul.f32 0.70710677, %v1285_v34  ;;  %v1289_v10 = vadd.f32 %v9523_v44, %v5505_v47  ;;  %v4740_v20 = vpop.eup %4739  ;;  %v7546_v53 = vmul.f32 %v2320_v52, %v7427_v25  ;;  %v9526_v46 = vld [vmem:[#allocation59_spill] sm:$0xff]  ;;  %v9527_v52 = vld [vmem:[#allocation96_spill] sm:$0xff] }
 0x24f   : > { %v2325_v28 = vadd.f32 1.0, %v4738_v21  ;;  %4755 = verf.f32 %v1823_v17  ;;  %v4742_v33 = vpop.eup %4741  ;;  %v7551_v11 = vmul.f32 %v2322_v23, %v7435_v27  ;;  %v7555_v44 = vadd.f32 %v9526_v46, %v5492_v37 }
 0x250   : > { %4757 = verf.f32 %v1825_v9  ;;  %v2812_v29 = vpack.c.bf16 %v7262_v5, %v7230_v38  ;;  %v1824_v25 = vmul.f32 0.70710677, %v936_v36  ;;  %v1293_v17 = vadd.f32 %v9527_v52, %v5494_v39  ;;  %v9529_v9 = vld [vmem:[#allocation34_spill] sm:$0xff]  ;;  %v7570_v38 = vpop.f32.mrf.mxu1 }
 0x251   : > { %v4744_v13 = vpop.eup %4743  ;;  %4759 = verf.f32 %v1820_v63  ;;  %v2814_v21 = vpack.c.bf16 %v7271_v32, %v7237_v7  ;;  %v7564_v27 = vmul.f32 %v2323_v12, %v7437_v62  ;;  %v1826_v23 = vmul.f32 0.70710677, %v1289_v10  ;;  %9530 = vst [vmem:[#allocation93_spill] sm:$0xff] %v7570_v38  ;;  %v9532_v7 = vld [vmem:[#allocation71_spill] sm:$0xff] }
 0x252   : > { %4761 = verf.f32 %v1822_v59  ;;  %v7568_v46 = vadd.f32 %v9529_v9, %v5496_v43  ;;  %3283 = vmatprep.mubr.bf16.mxu0 %v2812_v29  ;;  %v4746_v5 = vpop.eup %4745  ;;  %v7573_v63 = vmul.f32 %v2325_v28, %v7439_v57  ;;  %v2324_v52 = vadd.f32 1.0, %v4740_v20  ;;  %v7584_v59 = vpop.f32.mrf.mxu0  ;;  %v9535_v57 = vld [vmem:[#allocation100_spill] sm:$0xff] }
 0x253   : > { %9528 = vst [vmem:[#allocation92_spill] sm:$0xff] %v7564_v27  ;;  %v7575_v41 = vmul.f32 0.5, %v932_v35  ;;  %v7579_v32 = vadd.f32 %v9532_v7, %v5505_v47  ;;  %3572 = vmatprep.mubr.bf16.mxu1 %v2814_v21  ;;  %v9533_v62 = vpack.c.bf16 %v7027_v0, %v7024_v55  ;;  %9534 = vst [vmem:[#allocation58_spill] sm:$0xff] %v7584_v59  ;;  %v2326_v29 = vadd.f32 1.0, %v4742_v33  ;;  %v9536_v35 = vld [vmem:[#allocation74_spill] sm:$0xff]  ;;  %v7594_v7 = vpop.f32.mrf.mxu1  ;;  %v9539_v55 = vld [vmem:[#allocation101_spill] sm:$0xff] }
 0x254   : > { %9531 = vst [vmem:[#allocation69_spill] sm:$0xff] %v7573_v63  ;;  %v2327_v12 = vadd.f32 1.0, %v4744_v13  ;;  %v1827_v9 = vmul.f32 0.70710677, %v7555_v44  ;;  %v7589_v20 = vadd.f32 %v9535_v57, %v5492_v37  ;;  %v9537_v28 = vpack.c.bf16 %v7038_v45, %v9536_v35  ;;  %9538 = vst [vmem:[#allocation94_spill] sm:$0xff] %v7594_v7  ;;  %v7602_v13 = vpop.f32.mrf.mxu0  ;;  %v9546_v7 = vld [vmem:[#allocation102_spill] sm:$0xff] }
 0x255   : > { %3284 = vmatmul.mubr.bf16.gmra.mxu0 %v9533_v62  ;;  %v7596_v21 = vmul.f32 0.5, %v1285_v34  ;;  %4763 = verf.f32 %v1824_v25  ;;  %v1829_v0 = vmul.f32 0.70710677, %v1293_v17  ;;  %v7600_v33 = vadd.f32 %v9539_v55, %v5494_v39  ;;  %9540 = vst [vmem:[#allocation95_spill] sm:$0xff] %v7602_v13  ;;  %v7617_v13 = vpop.f32.mrf.mxu1 }
 0x256   : > { %3573 = vmatmul.mubr.bf16.gmra.mxu1 %v9537_v28  ;;  %v4748_v62 = vpop.eup %4747  ;;  %v2329_v59 = vadd.f32 1.0, %v4746_v5  ;;  %v7605_v57 = vmul.f32 0.5, %v7487_v54  ;;  %4765 = verf.f32 %v1826_v23  ;;  %v1828_v45 = vmul.f32 0.70710677, %v7568_v46  ;;  %9542 = vst [vmem:[#allocation35_spill] sm:$0xff] %v7617_v13 }
 0x257   : > { %v4750_v35 = vpop.eup %4749  ;;  %v7609_v34 = vmul.f32 %v2324_v52, %v7472_v14  ;;  %v7612_v25 = vmul.f32 0.5, %v7504_v3  ;;  %v7614_v28 = vmul.f32 0.5, %v936_v36  ;;  %v1830_v55 = vmul.f32 0.70710677, %v7579_v32  ;;  %v7626_v52 = vpop.f32.mrf.mxu0 }
 0x258   : > { %v4752_v5 = vpop.eup %4751  ;;  %v7620_v54 = vmul.f32 %v2326_v29, %v7483_v30  ;;  %v7623_v23 = vmul.f32 %v2327_v12, %v7498_v19  ;;  %4767 = verf.f32 %v1827_v9  ;;  %v1831_v14 = vmul.f32 0.70710677, %v7589_v20  ;;  %9545 = vst [vmem:[#allocation34_spill] sm:$0xff] %v7626_v52  ;;  %v9547_v19 = vld [vmem:[#allocation103_spill] sm:$0xff] }
 0x259   : > { %9541 = vst [vmem:[#allocation70_spill] sm:$0xff] %v7609_v34  ;;  %v7628_v3 = vmul.f32 0.5, %v1289_v10  ;;  %4769 = verf.f32 %v1829_v0  ;;  %v1833_v36 = vmul.f32 0.70710677, %v7600_v33  ;;  %v7633_v13 = vadd.f32 %v9546_v7, %v5496_v43  ;;  %v9548_v0 = vld [vmem:[#allocation62_spill] sm:$0xff] }
 0x25a   : > { %9543 = vst [vmem:[#allocation59_spill] sm:$0xff] %v7620_v54  ;;  %9544 = vst [vmem:[#allocation96_spill] sm:$0xff] %v7623_v23  ;;  %v7636_v30 = vmul.f32 %v2329_v59, %v7500_v56  ;;  %v2328_v29 = vadd.f32 1.0, %v4748_v62  ;;  %4771 = verf.f32 %v1828_v45  ;;  %v7640_v12 = vadd.f32 %v9547_v19, %v5505_v47  ;;  %v7646_v54 = vpop.f32.mrf.mxu1  ;;  %v7655_v45 = vpop.f32.mrf.mxu0 }
 0x25b   : > { %v4754_v9 = vpop.eup %4753  ;;  %v2330_v52 = vadd.f32 1.0, %v4750_v35  ;;  %v2331_v10 = vadd.f32 1.0, %v4752_v5  ;;  %4773 = verf.f32 %v1830_v55  ;;  %v7644_v38 = vadd.f32 %v9548_v0, %v5492_v37  ;;  %9549 = vst [vmem:[#allocation71_spill] sm:$0xff] %v7646_v54  ;;  %9550 = vst [vmem:[#allocation100_spill] sm:$0xff] %v7655_v45  ;;  %v9551_v5 = vld [vmem:[#allocation36_spill] sm:$0xff] }
 0x25c   : > { %v4756_v7 = vpop.eup %4755  ;;  %v7651_v59 = vmul.f32 0.5, %v7555_v44  ;;  %v7653_v62 = vmul.f32 0.5, %v1293_v17  ;;  %4775 = verf.f32 %v1831_v14  ;;  %v1832_v55 = vmul.f32 0.70710677, %v7633_v13  ;;  %v9552_v0 = vld [vmem:[#allocation28_spill] sm:$0xff]  ;;  %v9553_v14 = vld [vmem:[#allocation98_spill] sm:$0xff] }
 0x25d   : > { %v4758_v35 = vpop.eup %4757  ;;  %4777 = verf.f32 %v1833_v36  ;;  %v1303_v19 = vadd.f32 %v9551_v5, %v5494_v39  ;;  %v2816_v54 = vpack.c.bf16 %v7360_v58, %v9552_v0  ;;  %v2333_v56 = vadd.f32 1.0, %v4754_v9  ;;  %v7677_v0 = vpop.f32.mrf.mxu1 }
 0x25e   : > { %v4760_v34 = vpop.eup %4759  ;;  %v1834_v17 = vmul.f32 0.70710677, %v7640_v12  ;;  %v2818_v45 = vpack.c.bf16 %v7373_v60, %v9553_v14  ;;  %v7668_v36 = vmul.f32 %v2328_v29, %v7511_v40  ;;  %v7671_v23 = vmul.f32 %v2330_v52, %v7528_v1  ;;  %9554 = vst [vmem:[#allocation74_spill] sm:$0xff] %v7677_v0  ;;  %v9555_v60 = vld [vmem:[#allocation16_spill] sm:$0xff]  ;;  %v9556_v1 = vld [vmem:[#allocation91_spill] sm:$0xff] }
 0x25f   : > { %v4762_v27 = vpop.eup %4761  ;;  %v7674_v5 = vmul.f32 %v2331_v10, %v7530_v4  ;;  %v1835_v58 = vmul.f32 0.70710677, %v7644_v38  ;;  %3291 = vmatprep.mubr.bf16.mxu0 %v2816_v54  ;;  %v2335_v9 = vadd.f32 1.0, %v4756_v7  ;;  %v2337_v44 = vadd.f32 1.0, %v4758_v35  ;;  %v7689_v4 = vpop.f32.mrf.mxu0  ;;  %v9559_v10 = vld [vmem:[#allocation40_spill] sm:$0xff] }
 0x260   : > { %v7680_v63 = vmul.f32 0.5, %v7568_v46  ;;  %v7684_v40 = vadd.f32 %v9555_v60, %v5496_v43  ;;  %3580 = vmatprep.mubr.bf16.mxu1 %v2818_v45  ;;  %v9557_v52 = vpack.c.bf16 %v7324_v26, %v9556_v1  ;;  %9558 = vst [vmem:[#allocation101_spill] sm:$0xff] %v7689_v4  ;;  %v2332_v29 = vadd.f32 1.0, %v4760_v34  ;;  %v7698_v35 = vpop.f32.mrf.mxu1  ;;  %v9563_v34 = vld [vmem:[#allocation72_spill] sm:$0xff] }
 0x261   : > { %4779 = verf.f32 %v1832_v55  ;;  %v1837_v54 = vmul.f32 0.70710677, %v1303_v19  ;;  %v7693_v7 = vadd.f32 %v9559_v10, %v5505_v47  ;;  %v9560_v46 = vpack.c.bf16 %v7330_v2, %v7290_v6  ;;  %9561 = vst [vmem:[#allocation102_spill] sm:$0xff] %v7698_v35  ;;  %v7707_v60 = vpop.f32.mrf.mxu0  ;;  %v9565_v2 = vld [vmem:[#allocation41_spill] sm:$0xff] }
 0x262   : > { %3292 = vmatmul.mubr.bf16.gmra.mxu0 %v9557_v52  ;;  %v4764_v45 = vpop.eup %4763  ;;  %v7701_v14 = vmul.f32 %v2333_v56, %v7535_v49  ;;  %v2334_v26 = vadd.f32 1.0, %v4762_v27  ;;  %4781 = verf.f32 %v1834_v17  ;;  %v7705_v55 = vadd.f32 %v9563_v34, %v5492_v37  ;;  %9564 = vst [vmem:[#allocation62_spill] sm:$0xff] %v7707_v60 }
 0x263   : > { %3581 = vmatmul.mubr.bf16.gmra.mxu1 %v9560_v46  ;;  %v4766_v1 = vpop.eup %4765  ;;  %v7710_v52 = vmul.f32 0.5, %v7579_v32  ;;  %v7713_v6 = vmul.f32 0.5, %v7589_v20  ;;  %4783 = verf.f32 %v1835_v58  ;;  %v1307_v49 = vadd.f32 %v9565_v2, %v5494_v39  ;;  %v7727_v32 = vpop.f32.mrf.mxu1 }
 0x264   : > { %9562 = vst [vmem:[#allocation103_spill] sm:$0xff] %v7701_v14  ;;  %v7718_v27 = vmul.f32 %v2335_v9, %v7605_v57  ;;  %v7721_v56 = vmul.f32 %v2337_v44, %v7612_v25  ;;  %v7724_v17 = vmul.f32 0.5, %v7600_v33  ;;  %v1836_v10 = vmul.f32 0.70710677, %v7684_v40  ;;  %9566 = vst [vmem:[#allocation36_spill] sm:$0xff] %v7727_v32  ;;  %v7733_v57 = vpop.f32.mrf.mxu0 }
 0x265   : > { %v4768_v46 = vpop.eup %4767  ;;  %v7730_v20 = vmul.f32 %v2332_v29, %v7575_v41  ;;  %v2336_v58 = vadd.f32 1.0, %v4764_v45  ;;  %4785 = verf.f32 %v1837_v54  ;;  %v1838_v34 = vmul.f32 0.70710677, %v7693_v7  ;;  %9567 = vst [vmem:[#allocation28_spill] sm:$0xff] %v7733_v57 }
 0x266   : > { %v4770_v9 = vpop.eup %4769  ;;  %v7736_v25 = vmul.f32 %v2334_v26, %v7596_v21  ;;  %v2338_v33 = vadd.f32 1.0, %v4766_v1  ;;  %v7739_v44 = vmul.f32 0.5, %v7633_v13  ;;  %v1839_v2 = vmul.f32 0.70710677, %v7705_v55  ;;  %v7754_v1 = vpop.f32.mrf.mxu1  ;;  %v9572_v13 = vld [vmem:[#allocation85_spill] sm:$0xff] }
 0x267   : > { %v4772_v32 = vpop.eup %4771  ;;  %v7743_v41 = vmul.f32 0.5, %v7640_v12  ;;  %v7746_v29 = vmul.f32 0.5, %v7644_v38  ;;  %v7748_v54 = vmul.f32 0.5, %v1303_v19  ;;  %v1841_v45 = vmul.f32 0.70710677, %v1307_v49  ;;  %9568 = vst [vmem:[#allocation98_spill] sm:$0xff] %v7754_v1  ;;  %v7761_v4 = vpop.f32.mrf.mxu0 }
 0x268   : > { %v4774_v57 = vpop.eup %4773  ;;  %v2339_v26 = vadd.f32 1.0, %v4768_v46  ;;  %4787 = verf.f32 %v1836_v10  ;;  %v7757_v12 = vmul.f32 %v2336_v58, %v7614_v28  ;;  %v2341_v38 = vadd.f32 1.0, %v4770_v9  ;;  %v9569_v19 = vld [vmem:[#allocation77_spill] sm:$0xff]  ;;  %9570 = vst [vmem:[#allocation16_spill] sm:$0xff] %v7761_v4  ;;  %v9571_v10 = vld [vmem:[#allocation26_spill] sm:$0xff]  ;;  %v9573_v58 = vld [vmem:[#allocation76_spill] sm:$0xff] }
 0x269   : > { %v4776_v60 = vpop.eup %4775  ;;  %4789 = verf.f32 %v1838_v34  ;;  %v956_v35 = vadd.f32 %v9569_v19, %v5496_v43  ;;  %v7764_v21 = vmul.f32 %v2338_v33, %v7628_v3  ;;  %v1309_v46 = vadd.f32 %v9571_v10, %v5505_v47  ;;  %v9574_v9 = vld [vmem:[#allocation86_spill] sm:$0xff]  ;;  %v7779_v10 = vpop.f32.mrf.mxu1 }
 0x26a   : > { %v4778_v0 = vpop.eup %4777  ;;  %4791 = verf.f32 %v1839_v2  ;;  %v2820_v1 = vpack.c.bf16 %v7451_v61, %v9572_v13  ;;  %v2340_v28 = vadd.f32 1.0, %v4772_v32  ;;  %v960_v34 = vadd.f32 %v9573_v58, %v5492_v37  ;;  %v9576_v2 = vld [vmem:[#allocation104_spill] sm:$0xff]  ;;  %9577 = vst [vmem:[#allocation40_spill] sm:$0xff] %v7779_v10  ;;  %v9587_v10 = vld [vmem:[#allocation54_spill] sm:$0xff] }
 0x26b   : > { %4793 = verf.f32 %v1841_v45  ;;  %v2822_v19 = vpack.c.bf16 %v7458_v50, %v9574_v9  ;;  %v7775_v4 = vmul.f32 %v2339_v26, %v7651_v59  ;;  %v2342_v3 = vadd.f32 1.0, %v4774_v57  ;;  %v7790_v59 = vpop.f32.mrf.mxu0  ;;  %v9582_v58 = vld [vmem:[#allocation20_spill] sm:$0xff] }
 0x26c   : > { %v2343_v33 = vadd.f32 1.0, %v4776_v60  ;;  %v1313_v14 = vadd.f32 %v9576_v2, %v5494_v39  ;;  %3299 = vmatprep.mubr.bf16.mxu0 %v2820_v1  ;;  %v7782_v61 = vmul.f32 %v2341_v38, %v7653_v62  ;;  %v2345_v32 = vadd.f32 1.0, %v4778_v0  ;;  %9579 = vst [vmem:[#allocation72_spill] sm:$0xff] %v7790_v59  ;;  %v7803_v1 = vpop.f32.mrf.mxu1  ;;  %v9584_v2 = vld [vmem:[#allocation106_spill] sm:$0xff] }
 0x26d   : > { %9575 = vst [vmem:[#allocation91_spill] sm:$0xff] %v7775_v4  ;;  %v7785_v45 = vmul.f32 0.5, %v7684_v40  ;;  %v1840_v13 = vmul.f32 0.70710677, %v956_v35  ;;  %3588 = vmatprep.mubr.bf16.mxu1 %v2822_v19  ;;  %v9578_v50 = vpack.c.bf16 %v7422_v16, %v7376_v22  ;;  %v7793_v57 = vmul.f32 0.5, %v7693_v7  ;;  %9581 = vst [vmem:[#allocation41_spill] sm:$0xff] %v7803_v1  ;;  %v7812_v9 = vpop.f32.mrf.mxu0 }
 0x26e   : > { %v4780_v60 = vpop.eup %4779  ;;  %v7796_v26 = vmul.f32 0.5, %v7705_v55  ;;  %v7798_v62 = vmul.f32 0.5, %v1307_v49  ;;  %v1842_v0 = vmul.f32 0.70710677, %v1309_v46  ;;  %v9580_v40 = vpack.c.bf16 %v7425_v15, %v7389_v42  ;;  %9583 = vst [vmem:[#allocation77_spill] sm:$0xff] %v7812_v9 }
 0x26f   : > { %3300 = vmatmul.mubr.bf16.gmra.mxu0 %v9578_v50  ;;  %v4782_v22 = vpop.eup %4781  ;;  %v7806_v16 = vmul.f32 %v2340_v28, %v7680_v63  ;;  %v7808_v38 = vmul.f32 0.5, %v956_v35  ;;  %v1843_v7 = vmul.f32 0.70710677, %v960_v34  ;;  %v962_v55 = vadd.f32 %v9582_v58, %v5496_v43  ;;  %v7824_v35 = vpop.f32.mrf.mxu1 }
 0x270   : > { %3589 = vmatmul.mubr.bf16.gmra.mxu1 %v9580_v40  ;;  %v4784_v49 = vpop.eup %4783  ;;  %v7815_v19 = vmul.f32 %v2342_v3, %v7710_v52  ;;  %v7818_v42 = vmul.f32 %v2343_v33, %v7713_v6  ;;  %v1845_v15 = vmul.f32 0.70710677, %v1313_v14  ;;  %v7822_v63 = vadd.f32 %v9584_v2, %v5505_v47  ;;  %9585 = vst [vmem:[#allocation26_spill] sm:$0xff] %v7824_v35  ;;  %v9586_v40 = vld [vmem:[#allocation51_spill] sm:$0xff]  ;;  %v3175_v3 = vpop.f32.mrf.mxu0 }
 0x271   : > { %v7827_v28 = vmul.f32 %v2345_v32, %v7724_v17  ;;  %4795 = verf.f32 %v1840_v13  ;;  %v7829_v50 = vmul.f32 0.5, %v1309_v46  ;;  %v964_v52 = vadd.f32 %v9586_v40, %v5492_v37  ;;  %v3464_v1 = vpop.f32.mrf.mxu1 }
 0x272   : > { %v4786_v58 = vpop.eup %4785  ;;  %v2344_v6 = vadd.f32 1.0, %v4780_v60  ;;  %v2346_v33 = vadd.f32 1.0, %v4782_v22  ;;  %4797 = verf.f32 %v1842_v0  ;;  %v1317_v2 = vadd.f32 %v9587_v10, %v5494_v39  ;;  %v7837_v32 = vpop.f32.mrf.mxu0 }
 0x273   : > { %v2347_v59 = vadd.f32 1.0, %v4784_v49  ;;  %v7835_v35 = vmul.f32 0.5, %v960_v34  ;;  %4799 = verf.f32 %v1843_v7  ;;  %v1844_v17 = vmul.f32 0.70710677, %v962_v55  ;;  %9588 = vst [vmem:[#allocation85_spill] sm:$0xff] %v7837_v32  ;;  %v7844_v0 = vpop.f32.mrf.mxu1  ;;  %v9590_v7 = vld [vmem:[#allocation64_spill] sm:$0xff] }
 0x274   : > { %v7841_v13 = vmul.f32 0.5, %v1313_v14  ;;  %4801 = verf.f32 %v1845_v15  ;;  %v1846_v60 = vmul.f32 0.70710677, %v7822_v63  ;;  %9589 = vst [vmem:[#allocation76_spill] sm:$0xff] %v7844_v0  ;;  %v2349_v34 = vadd.f32 1.0, %v4786_v58  ;;  %v3178_v40 = vpop.f32.mrf.mxu0  ;;  %v9591_v0 = vld [vmem:[#allocation67_spill] sm:$0xff] }
 0x275   : > { %v4788_v22 = vpop.eup %4787  ;;  %v1847_v1 = vmul.f32 0.70710677, %v964_v52  ;;  %v966_v49 = vadd.f32 %v9590_v7, %v5496_v43  ;;  %v7851_v46 = vmul.f32 %v2344_v6, %v7739_v44  ;;  %v7854_v14 = vmul.f32 %v2346_v33, %v7743_v41  ;;  %v3467_v9 = vpop.f32.mrf.mxu1  ;;  %v9593_v7 = vld [vmem:[#allocation44_spill] sm:$0xff] }
 0x276   : > { %v4790_v3 = vpop.eup %4789  ;;  %v1849_v15 = vmul.f32 0.70710677, %v1317_v2  ;;  %v1319_v32 = vadd.f32 %v9591_v0, %v5505_v47  ;;  %v7859_v58 = vmul.f32 %v2347_v59, %v7746_v29  ;;  %4803 = verf.f32 %v1844_v17  ;;  %v7865_v6 = vpop.f32.mrf.mxu0  ;;  %v9595_v0 = vld [vmem:[#allocation17_spill] sm:$0xff] }
 0x277   : > { %v4792_v4 = vpop.eup %4791  ;;  %v970_v40 = vadd.f32 %v9593_v7, %v5492_v37  ;;  %v2824_v44 = vpack.c.bf16 %v7546_v53, %v7495_v18  ;;  %9594 = vst [vmem:[#allocation104_spill] sm:$0xff] %v7865_v6  ;;  %v7867_v33 = vmul.f32 0.5, %v962_v55  ;;  %4805 = verf.f32 %v1846_v60  ;;  %v7873_v59 = vpop.f32.mrf.mxu1  ;;  %v9598_v60 = vld [vmem:[#allocation78_spill] sm:$0xff] }
 0x278   : > { %9592 = vst [vmem:[#allocation86_spill] sm:$0xff] %v7859_v58  ;;  %v4794_v41 = vpop.eup %4793  ;;  %v1323_v9 = vadd.f32 %v9595_v0, %v5494_v39  ;;  %v2826_v29 = vpack.c.bf16 %v7551_v11, %v7516_v8  ;;  %9596 = vst [vmem:[#allocation20_spill] sm:$0xff] %v7873_v59  ;;  %v7876_v17 = vmul.f32 %v2349_v34, %v7748_v54  ;;  %v2348_v7 = vadd.f32 1.0, %v4788_v22  ;;  %v3183_v53 = vpop.f32.mrf.mxu0 }
 0x279   : > { %4807 = verf.f32 %v1847_v1  ;;  %v1848_v18 = vmul.f32 0.70710677, %v966_v49  ;;  %3307 = vmatprep.mubr.bf16.mxu0 %v2824_v44  ;;  %v2350_v10 = vadd.f32 1.0, %v4790_v3  ;;  %v1850_v55 = vmul.f32 0.70710677, %v1319_v32  ;;  %v3472_v11 = vpop.f32.mrf.mxu1  ;;  %v9600_v1 = vld [vmem:[#allocation27_spill] sm:$0xff] }
 0x27a   : > { %9597 = vst [vmem:[#allocation106_spill] sm:$0xff] %v7876_v17  ;;  %4809 = verf.f32 %v1849_v15  ;;  %v7880_v6 = vadd.f32 %v9598_v60, %v5496_v43  ;;  %3596 = vmatprep.mubr.bf16.mxu1 %v2826_v29  ;;  %v9599_v8 = vpack.c.bf16 %v7509_v51, %v7465_v48  ;;  %v2351_v54 = vadd.f32 1.0, %v4792_v4  ;;  %v7892_v15 = vpop.f32.mrf.mxu0  ;;  %v9603_v51 = vld [vmem:[#allocation60_spill] sm:$0xff]  ;;  %v9605_v11 = vld [vmem:[#allocation46_spill] sm:$0xff] }
 0x27b   : > { %v2353_v34 = vadd.f32 1.0, %v4794_v41  ;;  %v1851_v22 = vmul.f32 0.70710677, %v970_v40  ;;  %v7887_v44 = vadd.f32 %v9600_v1, %v5492_v37  ;;  %v9601_v3 = vpack.c.bf16 %v7523_v31, %v7470_v24  ;;  %9602 = vst [vmem:[#allocation51_spill] sm:$0xff] %v7892_v15  ;;  %v7903_v41 = vpop.f32.mrf.mxu1  ;;  %v9613_v15 = vld [vmem:[#allocation70_spill] sm:$0xff] }
 0x27c   : > { %3308 = vmatmul.mubr.bf16.gmra.mxu0 %v9599_v8  ;;  %v7895_v0 = vmul.f32 0.5, %v7822_v63  ;;  %v7897_v29 = vmul.f32 0.5, %v964_v52  ;;  %v1853_v48 = vmul.f32 0.70710677, %v1323_v9  ;;  %v7901_v4 = vadd.f32 %v9603_v51, %v5494_v39  ;;  %9604 = vst [vmem:[#allocation54_spill] sm:$0xff] %v7903_v41  ;;  %v3186_v31 = vpop.f32.mrf.mxu0  ;;  %v9608_v51 = vld [vmem:[#allocation68_spill] sm:$0xff] }
 0x27d   : > { %3597 = vmatmul.mubr.bf16.gmra.mxu1 %v9601_v3  ;;  %v7906_v53 = vmul.f32 %v2348_v7, %v7785_v45  ;;  %v7908_v60 = vmul.f32 0.5, %v1317_v2  ;;  %v7910_v24 = vmul.f32 0.5, %v966_v49  ;;  %4811 = verf.f32 %v1848_v18  ;;  %v3475_v3 = vpop.f32.mrf.mxu1 }
 0x27e   : > { %v4796_v63 = vpop.eup %4795  ;;  %v7913_v52 = vmul.f32 %v2350_v10, %v7793_v57  ;;  %4813 = verf.f32 %v1850_v55  ;;  %v1852_v8 = vmul.f32 0.70710677, %v7880_v6  ;;  %v7918_v1 = vadd.f32 %v9605_v11, %v5505_v47  ;;  %v7927_v57 = vpop.f32.mrf.mxu0  ;;  %v9610_v11 = vld [vmem:[#allocation32_spill] sm:$0xff] }
 0x27f   : > { %v4798_v45 = vpop.eup %4797  ;;  %v7921_v2 = vmul.f32 %v2351_v54, %v7796_v26  ;;  %v7924_v49 = vmul.f32 %v2353_v34, %v7798_v62  ;;  %4815 = verf.f32 %v1851_v22  ;;  %v1855_v7 = vmul.f32 0.70710677, %v7887_v44  ;;  %9607 = vst [vmem:[#allocation67_spill] sm:$0xff] %v7927_v57  ;;  %v7936_v26 = vpop.f32.mrf.mxu1 }
 0x280   : > { %v4800_v10 = vpop.eup %4799  ;;  %v7929_v18 = vmul.f32 0.5, %v1319_v32  ;;  %4817 = verf.f32 %v1853_v48  ;;  %v1857_v55 = vmul.f32 0.70710677, %v7901_v4  ;;  %v7934_v31 = vadd.f32 %v9608_v51, %v5496_v43  ;;  %9609 = vst [vmem:[#allocation44_spill] sm:$0xff] %v7936_v26  ;;  %v3191_v32 = vpop.f32.mrf.mxu0  ;;  %v9611_v51 = vld [vmem:[#allocation33_spill] sm:$0xff] }
 0x281   : > { %9606 = vst [vmem:[#allocation64_spill] sm:$0xff] %v7924_v49  ;;  %v4802_v54 = vpop.eup %4801  ;;  %v2352_v62 = vadd.f32 1.0, %v4796_v63  ;;  %v7938_v34 = vmul.f32 0.5, %v970_v40  ;;  %v7940_v22 = vmul.f32 0.5, %v1323_v9  ;;  %v7944_v3 = vadd.f32 %v9610_v11, %v5505_v47  ;;  %v3480_v26 = vpop.f32.mrf.mxu1 }
 0x282   : > { %v2354_v48 = vadd.f32 1.0, %v4798_v45  ;;  %4819 = verf.f32 %v1852_v8  ;;  %v1854_v57 = vmul.f32 0.70710677, %v7918_v1  ;;  %v7949_v41 = vadd.f32 %v9611_v51, %v5492_v37  ;;  %v7955_v11 = vpop.f32.mrf.mxu0 }
 0x283   : > { %v2355_v63 = vadd.f32 1.0, %v4800_v10  ;;  %4821 = verf.f32 %v1855_v7  ;;  %9612 = vst [vmem:[#allocation17_spill] sm:$0xff] %v7955_v11  ;;  %v4804_v32 = vpop.eup %4803  ;;  %v2357_v45 = vadd.f32 1.0, %v4802_v54  ;;  %v1856_v8 = vmul.f32 0.70710677, %v7934_v31  ;;  %v7960_v59 = vpop.f32.mrf.mxu1  ;;  %v9615_v7 = vld [vmem:[#allocation30_spill] sm:$0xff] }
 0x284   : > { %4823 = verf.f32 %v1857_v55  ;;  %v2828_v51 = vpack.c.bf16 %v7668_v36, %v9613_v15  ;;  %9614 = vst [vmem:[#allocation78_spill] sm:$0xff] %v7960_v59  ;;  %v4806_v26 = vpop.eup %4805  ;;  %v7963_v40 = vmul.f32 %v2352_v62, %v7808_v38  ;;  %v1858_v9 = vmul.f32 0.70710677, %v7944_v3  ;;  %v9616_v11 = vld [vmem:[#allocation59_spill] sm:$0xff]  ;;  %v3194_v54 = vpop.f32.mrf.mxu0 }
 0x285   : > { %v7968_v10 = vadd.f32 %v9615_v7, %v5494_v39  ;;  %v2830_v55 = vpack.c.bf16 %v7671_v23, %v9616_v11  ;;  %v7973_v49 = vmul.f32 %v2354_v48, %v7829_v50  ;;  %4825 = verf.f32 %v1854_v57  ;;  %v9617_v38 = vld [vmem:[#allocation31_spill] sm:$0xff]  ;;  %v3483_v62 = vpop.f32.mrf.mxu1  ;;  %v9618_v50 = vld [vmem:[#allocation73_spill] sm:$0xff]  ;;  %v9619_v57 = vld [vmem:[#allocation96_spill] sm:$0xff] }
 0x286   : > { %v4808_v17 = vpop.eup %4807  ;;  %v1859_v36 = vmul.f32 0.70710677, %v7949_v41  ;;  %v7978_v15 = vadd.f32 %v9617_v38, %v5496_v43  ;;  %3315 = vmatprep.mubr.bf16.mxu0 %v2828_v51  ;;  %v7981_v7 = vmul.f32 %v2355_v63, %v7835_v35  ;;  %v2356_v58 = vadd.f32 1.0, %v4804_v32  ;;  %v9620_v11 = vld [vmem:[#allocation92_spill] sm:$0xff]  ;;  %v7993_v38 = vpop.f32.mrf.mxu0  ;;  %v9624_v63 = vld [vmem:[#allocation37_spill] sm:$0xff] }
 0x287   : > { %v4810_v59 = vpop.eup %4809  ;;  %v7984_v23 = vmul.f32 0.5, %v7880_v6  ;;  %v7988_v48 = vadd.f32 %v9618_v50, %v5505_v47  ;;  %3604 = vmatprep.mubr.bf16.mxu1 %v2830_v55  ;;  %v9621_v54 = vpack.c.bf16 %v9619_v57, %v9620_v11  ;;  %9622 = vst [vmem:[#allocation27_spill] sm:$0xff] %v7993_v38  ;;  %v7996_v51 = vmul.f32 %v2357_v45, %v7841_v13  ;;  %v9625_v32 = vld [vmem:[#allocation69_spill] sm:$0xff]  ;;  %v8005_v55 = vpop.f32.mrf.mxu1  ;;  %v9628_v11 = vld [vmem:[#allocation39_spill] sm:$0xff] }
 0x288   : > { %v2358_v35 = vadd.f32 1.0, %v4806_v26  ;;  %4827 = verf.f32 %v1856_v8  ;;  %v8000_v6 = vadd.f32 %v9624_v63, %v5492_v37  ;;  %v9626_v62 = vpack.c.bf16 %v7636_v30, %v9625_v32  ;;  %9627 = vst [vmem:[#allocation46_spill] sm:$0xff] %v8005_v55  ;;  %v3199_v45 = vpop.f32.mrf.mxu0 }
 0x289   : > { %3316 = vmatmul.mubr.bf16.gmra.mxu0 %v9621_v54  ;;  %9623 = vst [vmem:[#allocation60_spill] sm:$0xff] %v7996_v51  ;;  %v2359_v50 = vadd.f32 1.0, %v4808_v17  ;;  %4829 = verf.f32 %v1858_v9  ;;  %v1861_v57 = vmul.f32 0.70710677, %v7968_v10  ;;  %v8010_v13 = vadd.f32 %v9628_v11, %v5494_v39  ;;  %v3488_v63 = vpop.f32.mrf.mxu1 }
 0x28a   : > { %3605 = vmatmul.mubr.bf16.gmra.mxu1 %v9626_v62  ;;  %v4812_v8 = vpop.eup %4811  ;;  %v2361_v26 = vadd.f32 1.0, %v4810_v59  ;;  %v8013_v54 = vmul.f32 0.5, %v7918_v1  ;;  %4831 = verf.f32 %v1859_v36  ;;  %v1860_v30 = vmul.f32 0.70710677, %v7978_v15  ;;  %v8026_v59 = vpop.f32.mrf.mxu0 }
 0x28b   : > { %v4814_v32 = vpop.eup %4813  ;;  %v8017_v17 = vmul.f32 %v2356_v58, %v7867_v33  ;;  %v8020_v9 = vmul.f32 0.5, %v7887_v44  ;;  %v8023_v62 = vmul.f32 0.5, %v7901_v4  ;;  %v1862_v11 = vmul.f32 0.70710677, %v7988_v48  ;;  %9630 = vst [vmem:[#allocation32_spill] sm:$0xff] %v8026_v59  ;;  %v8038_v44 = vpop.f32.mrf.mxu1 }
 0x28c   : > { %v4816_v1 = vpop.eup %4815  ;;  %v8029_v36 = vmul.f32 %v2358_v35, %v7895_v0  ;;  %v8032_v45 = vmul.f32 0.5, %v7934_v31  ;;  %v8035_v58 = vmul.f32 0.5, %v7944_v3  ;;  %v1863_v33 = vmul.f32 0.70710677, %v8000_v6  ;;  %9632 = vst [vmem:[#allocation70_spill] sm:$0xff] %v8038_v44  ;;  %v9633_v0 = vld [vmem:[#allocation45_spill] sm:$0xff]  ;;  %v3202_v31 = vpop.f32.mrf.mxu0 }
 0x28d   : > { %9629 = vst [vmem:[#allocation68_spill] sm:$0xff] %v8017_v17  ;;  %v4818_v4 = vpop.eup %4817  ;;  %v8041_v63 = vmul.f32 %v2359_v50, %v7897_v29  ;;  %4833 = verf.f32 %v1861_v57  ;;  %v1865_v59 = vmul.f32 0.70710677, %v8010_v13  ;;  %v8046_v35 = vadd.f32 %v9633_v0, %v5496_v43  ;;  %v9635_v44 = vld [vmem:[#allocation38_spill] sm:$0xff]  ;;  %v3491_v29 = vpop.f32.mrf.mxu1 }
 0x28e   : > { %9631 = vst [vmem:[#allocation33_spill] sm:$0xff] %v8029_v36  ;;  %v8049_v55 = vmul.f32 %v2361_v26, %v7908_v60  ;;  %v8052_v3 = vmul.f32 0.5, %v7949_v41  ;;  %4835 = verf.f32 %v1860_v30  ;;  %v8056_v38 = vadd.f32 %v9635_v44, %v5505_v47  ;;  %v9636_v0 = vld [vmem:[#allocation42_spill] sm:$0xff]  ;;  %v9637_v29 = vld [vmem:[#allocation43_spill] sm:$0xff] }
 0x28f   : > { %v4820_v50 = vpop.eup %4819  ;;  %v2360_v57 = vadd.f32 1.0, %v4812_v8  ;;  %v2362_v36 = vadd.f32 1.0, %v4814_v32  ;;  %4837 = verf.f32 %v1862_v11  ;;  %v8060_v17 = vadd.f32 %v9636_v0, %v5492_v37 }
 0x290   : > { %9634 = vst [vmem:[#allocation30_spill] sm:$0xff] %v8049_v55  ;;  %v4822_v31 = vpop.eup %4821  ;;  %v2363_v60 = vadd.f32 1.0, %v4816_v1  ;;  %v2365_v26 = vadd.f32 1.0, %v4818_v4  ;;  %v8063_v41 = vmul.f32 0.5, %v7968_v10  ;;  %4839 = verf.f32 %v1863_v33  ;;  %v8070_v11 = vpop.f32.mrf.mxu0 }
 0x291   : > { %v4824_v30 = vpop.eup %4823  ;;  %4841 = verf.f32 %v1865_v59  ;;  %v1864_v44 = vmul.f32 0.70710677, %v8046_v35  ;;  %v1343_v8 = vadd.f32 %v9637_v29, %v5494_v39  ;;  %v2832_v32 = vpack.c.bf16 %v7757_v12, %v7730_v20  ;;  %9638 = vst [vmem:[#allocation59_spill] sm:$0xff] %v8070_v11 }
 0x292   : > { %v1866_v33 = vmul.f32 0.70710677, %v8056_v38  ;;  %v2834_v59 = vpack.c.bf16 %v7764_v21, %v7736_v25  ;;  %v4826_v0 = vpop.eup %4825  ;;  %v8082_v29 = vmul.f32 %v2360_v57, %v7910_v24  ;;  %v8085_v20 = vmul.f32 %v2362_v36, %v7929_v18  ;;  %v3207_v11 = vpop.f32.mrf.mxu0 }
 0x293   : > { %v2367_v12 = vadd.f32 1.0, %v4822_v31  ;;  %v1867_v1 = vmul.f32 0.70710677, %v8060_v17  ;;  %3323 = vmatprep.mubr.bf16.mxu0 %v2832_v32  ;;  %v8089_v10 = vmul.f32 %v2363_v60, %v7938_v34  ;;  %v2364_v51 = vadd.f32 1.0, %v4820_v50  ;;  %v9641_v50 = vld [vmem:[#allocation103_spill] sm:$0xff]  ;;  %v9646_v32 = vld [vmem:[#allocation57_spill] sm:$0xff] }
 0x294   : > { %v2369_v55 = vadd.f32 1.0, %v4824_v30  ;;  %v8092_v25 = vmul.f32 0.5, %v7978_v15  ;;  %3612 = vmatprep.mubr.bf16.mxu1 %v2834_v59  ;;  %v9640_v21 = vpack.c.bf16 %v7718_v27, %v7674_v5  ;;  %v8098_v36 = vmul.f32 %v2365_v26, %v7940_v22  ;;  %v8106_v15 = vpop.f32.mrf.mxu0  ;;  %v9644_v27 = vld [vmem:[#allocation47_spill] sm:$0xff] }
 0x295   : > { %v8079_v4 = vpop.f32.mrf.mxu1  ;;  %v4828_v18 = vpop.eup %4827  ;;  %v8101_v57 = vmul.f32 0.5, %v7988_v48  ;;  %4843 = verf.f32 %v1864_v44  ;;  %v1869_v34 = vmul.f32 0.70710677, %v1343_v8  ;;  %v9642_v31 = vpack.c.bf16 %v7721_v56, %v9641_v50  ;;  %9643 = vst [vmem:[#allocation73_spill] sm:$0xff] %v8106_v15 }
 0x296   : > { %9639 = vst [vmem:[#allocation31_spill] sm:$0xff] %v8079_v4  ;;  %3324 = vmatmul.mubr.bf16.gmra.mxu0 %v9640_v21  ;;  %v4830_v60 = vpop.eup %4829  ;;  %v2366_v30 = vadd.f32 1.0, %v4826_v0  ;;  %v8109_v5 = vmul.f32 0.5, %v8000_v6  ;;  %4845 = verf.f32 %v1866_v33  ;;  %v992_v22 = vadd.f32 %v9644_v27, %v5496_v43  ;;  %v3210_v59 = vpop.f32.mrf.mxu0  ;;  %v9647_v21 = vld [vmem:[#allocation48_spill] sm:$0xff] }
 0x297   : > { %v3496_v24 = vpop.f32.mrf.mxu1  ;;  %3613 = vmatmul.mubr.bf16.gmra.mxu1 %v9642_v31  ;;  %v4832_v48 = vpop.eup %4831  ;;  %v8116_v44 = vmul.f32 %v2367_v12, %v8020_v9  ;;  %v8119_v56 = vmul.f32 0.5, %v8010_v13  ;;  %4847 = verf.f32 %v1867_v1  ;;  %v1345_v11 = vadd.f32 %v9646_v32, %v5505_v47  ;;  %v9648_v1 = vld [vmem:[#allocation21_spill] sm:$0xff] }
 0x298   : > { %v8124_v6 = vmul.f32 %v2364_v51, %v7984_v23  ;;  %v8127_v33 = vmul.f32 %v2369_v55, %v8023_v62  ;;  %v2368_v0 = vadd.f32 1.0, %v4828_v18  ;;  %v994_v24 = vadd.f32 %v9647_v21, %v5492_v37 }
 0x299   : > { %v8113_v26 = vpop.f32.mrf.mxu1  ;;  %v2370_v12 = vadd.f32 1.0, %v4830_v60  ;;  %v8132_v13 = vmul.f32 0.5, %v8046_v35  ;;  %4849 = verf.f32 %v1869_v34  ;;  %v1347_v50 = vadd.f32 %v9648_v1, %v5494_v39 }
 0x29a   : > { %9645 = vst [vmem:[#allocation96_spill] sm:$0xff] %v8113_v26  ;;  %v4834_v31 = vpop.eup %4833  ;;  %v8137_v23 = vmul.f32 %v2366_v30, %v8013_v54  ;;  %v2371_v51 = vadd.f32 1.0, %v4832_v48  ;;  %v8140_v55 = vmul.f32 0.5, %v8056_v38  ;;  %v1868_v62 = vmul.f32 0.70710677, %v992_v22  ;;  %v9649_v48 = vld [vmem:[#allocation22_spill] sm:$0xff] }
 0x29b   : > { %v3499_v9 = vpop.f32.mrf.mxu1  ;;  %v4836_v18 = vpop.eup %4835  ;;  %v8145_v35 = vmul.f32 0.5, %v8060_v17  ;;  %v8147_v34 = vmul.f32 0.5, %v1343_v8  ;;  %v1870_v27 = vmul.f32 0.70710677, %v1345_v11  ;;  %v8152_v30 = vmul.f32 %v2368_v0, %v8032_v45  ;;  %v9650_v8 = vld [vmem:[#allocation79_spill] sm:$0xff]  ;;  %v9651_v45 = vld [vmem:[#allocation49_spill] sm:$0xff] }
 0x29c   : > { %v4838_v32 = vpop.eup %4837  ;;  %v1871_v38 = vmul.f32 0.70710677, %v994_v24  ;;  %v996_v59 = vadd.f32 %v9649_v48, %v5496_v43  ;;  %v8157_v9 = vmul.f32 %v2370_v12, %v8035_v58  ;;  %v2373_v17 = vadd.f32 1.0, %v4834_v31  ;;  %v9653_v12 = vld [vmem:[#allocation80_spill] sm:$0xff] }
 0x29d   : > { %v4840_v21 = vpop.eup %4839  ;;  %v1873_v1 = vmul.f32 0.70710677, %v1347_v50  ;;  %v1349_v60 = vadd.f32 %v9650_v8, %v5505_v47  ;;  %v8162_v15 = vmul.f32 %v2371_v51, %v8052_v3  ;;  %4851 = verf.f32 %v1868_v62 }
 0x29e   : > { %v4842_v26 = vpop.eup %4841  ;;  %v1000_v0 = vadd.f32 %v9651_v45, %v5492_v37  ;;  %v2836_v48 = vpack.c.bf16 %v7851_v46, %v7806_v16  ;;  %v8168_v54 = vpop.f32.mrf.mxu0  ;;  %v2372_v58 = vadd.f32 1.0, %v4836_v18  ;;  %4853 = verf.f32 %v1870_v27  ;;  %v9655_v27 = vld [vmem:[#allocation91_spill] sm:$0xff] }
 0x29f   : > { %9652 = vst [vmem:[#allocation92_spill] sm:$0xff] %v8168_v54  ;;  %v1353_v31 = vadd.f32 %v9653_v12, %v5494_v39  ;;  %v2838_v8 = vpack.c.bf16 %v7854_v14, %v7815_v19  ;;  %v2375_v3 = vadd.f32 1.0, %v4840_v21  ;;  %v8176_v51 = vmul.f32 0.5, %v992_v22 }
 0x2a0   : > { %v8174_v4 = vpop.f32.mrf.mxu1  ;;  %4855 = verf.f32 %v1871_v38  ;;  %v1872_v62 = vmul.f32 0.70710677, %v996_v59  ;;  %3331 = vmatprep.mubr.bf16.mxu0 %v2836_v48  ;;  %v3215_v45 = vpop.f32.mrf.mxu0  ;;  %v2374_v16 = vadd.f32 1.0, %v4838_v32  ;;  %v2377_v46 = vadd.f32 1.0, %v4842_v26 }
 0x2a1   : > { %9654 = vst [vmem:[#allocation37_spill] sm:$0xff] %v8174_v4  ;;  %4857 = verf.f32 %v1873_v1  ;;  %v1874_v18 = vmul.f32 0.70710677, %v1349_v60  ;;  %3620 = vmatprep.mubr.bf16.mxu1 %v2838_v8  ;;  %v9656_v12 = vpack.c.bf16 %v7818_v42, %v9655_v27  ;;  %v8182_v14 = vmul.f32 %v2373_v17, %v8063_v41  ;;  %v9660_v41 = vld [vmem:[#allocation50_spill] sm:$0xff]  ;;  %v9664_v27 = vld [vmem:[#allocation24_spill] sm:$0xff] }
 0x2a2   : > { %v3504_v54 = vpop.f32.mrf.mxu1  ;;  %v4844_v19 = vpop.eup %4843  ;;  %v8184_v22 = vmul.f32 0.5, %v1345_v11  ;;  %v8186_v38 = vmul.f32 0.5, %v994_v24  ;;  %v1875_v21 = vmul.f32 0.70710677, %v1000_v0  ;;  %v9658_v26 = vpack.c.bf16 %v7827_v28, %v7782_v61  ;;  %v9662_v28 = vld [vmem:[#allocation90_spill] sm:$0xff] }
 0x2a3   : > { %3332 = vmatmul.mubr.bf16.gmra.mxu0 %v9656_v12  ;;  %9657 = vst [vmem:[#allocation69_spill] sm:$0xff] %v8182_v14  ;;  %v8191_v32 = vpop.f32.mrf.mxu0  ;;  %v4846_v1 = vpop.eup %4845  ;;  %v8194_v42 = vmul.f32 %v2372_v58, %v8092_v25  ;;  %v8196_v54 = vmul.f32 0.5, %v1347_v50  ;;  %v1877_v48 = vmul.f32 0.70710677, %v1353_v31  ;;  %v8200_v11 = vadd.f32 %v9660_v41, %v5492_v37 }
 0x2a4   : > { %3621 = vmatmul.mubr.bf16.gmra.mxu1 %v9658_v26  ;;  %9659 = vst [vmem:[#allocation39_spill] sm:$0xff] %v8191_v32  ;;  %v8202_v24 = vpop.f32.mrf.mxu1  ;;  %v4848_v17 = vpop.eup %4847  ;;  %v8205_v8 = vmul.f32 %v2375_v3, %v8109_v5  ;;  %v8207_v61 = vmul.f32 0.5, %v996_v59  ;;  %4859 = verf.f32 %v1872_v62  ;;  %v8211_v25 = vadd.f32 %v9662_v28, %v5494_v39  ;;  %v9665_v62 = vld [vmem:[#allocation19_spill] sm:$0xff] }
 0x2a5   : > { %9661 = vst [vmem:[#allocation45_spill] sm:$0xff] %v8202_v24  ;;  %v3218_v50 = vpop.f32.mrf.mxu0  ;;  %v8214_v58 = vmul.f32 %v2374_v16, %v8101_v57  ;;  %v8217_v45 = vmul.f32 %v2377_v46, %v8119_v56  ;;  %4861 = verf.f32 %v1874_v18  ;;  %v1002_v12 = vadd.f32 %v9664_v27, %v5496_v43 }
 0x2a6   : > { %v3507_v5 = vpop.f32.mrf.mxu1  ;;  %v4850_v3 = vpop.eup %4849  ;;  %v2376_v59 = vadd.f32 1.0, %v4844_v19  ;;  %v2378_v26 = vadd.f32 1.0, %v4846_v1  ;;  %4863 = verf.f32 %v1875_v21  ;;  %v1355_v41 = vadd.f32 %v9665_v62, %v5505_v47 }
 0x2a7   : > { %9663 = vst [vmem:[#allocation38_spill] sm:$0xff] %v8217_v45  ;;  %v2379_v28 = vadd.f32 1.0, %v4848_v17  ;;  %v8223_v50 = vmul.f32 0.5, %v1349_v60  ;;  %4865 = verf.f32 %v1877_v48  ;;  %v1879_v57 = vmul.f32 0.70710677, %v8200_v11  ;;  %v9666_v60 = vld [vmem:[#allocation25_spill] sm:$0xff] }
 0x2a8   : > { %v8228_v16 = vmul.f32 0.5, %v1000_v0  ;;  %v8230_v46 = vmul.f32 0.5, %v1353_v31  ;;  %v1881_v18 = vmul.f32 0.70710677, %v8211_v25  ;;  %v2381_v21 = vadd.f32 1.0, %v4850_v3  ;;  %v9667_v31 = vld [vmem:[#allocation81_spill] sm:$0xff] }
 0x2a9   : > { %v1876_v1 = vmul.f32 0.70710677, %v1002_v12  ;;  %v1006_v17 = vadd.f32 %v9666_v60, %v5496_v43  ;;  %v8238_v48 = vmul.f32 %v2376_v59, %v8132_v13  ;;  %v8241_v27 = vmul.f32 %v2378_v26, %v8140_v55  ;;  %v9669_v3 = vld [vmem:[#allocation82_spill] sm:$0xff]  ;;  %v9671_v26 = vld [vmem:[#allocation83_spill] sm:$0xff] }
 0x2aa   : > { %v1878_v0 = vmul.f32 0.70710677, %v1355_v41  ;;  %v1359_v5 = vadd.f32 %v9667_v31, %v5505_v47  ;;  %v4852_v62 = vpop.eup %4851  ;;  %v8246_v56 = vmul.f32 %v2379_v28, %v8145_v35  ;;  %4867 = verf.f32 %v1879_v57 }
 0x2ab   : > { %v1010_v19 = vadd.f32 %v9669_v3, %v5492_v37  ;;  %v2840_v60 = vpack.c.bf16 %v7963_v40, %v7906_v53  ;;  %v8252_v13 = vpop.f32.mrf.mxu0  ;;  %v4854_v59 = vpop.eup %4853  ;;  %v8254_v55 = vmul.f32 0.5, %v1002_v12  ;;  %4869 = verf.f32 %v1881_v18  ;;  %v9674_v40 = vld [vmem:[#allocation18_spill] sm:$0xff] }
 0x2ac   : > { %9668 = vst [vmem:[#allocation42_spill] sm:$0xff] %v8246_v56  ;;  %9670 = vst [vmem:[#allocation43_spill] sm:$0xff] %v8252_v13  ;;  %v1363_v31 = vadd.f32 %v9671_v26, %v5494_v39  ;;  %v2842_v35 = vpack.c.bf16 %v7973_v49, %v7913_v52  ;;  %v8263_v3 = vmul.f32 %v2381_v21, %v8147_v34  ;;  %4871 = verf.f32 %v1876_v1  ;;  %v9675_v52 = vld [vmem:[#allocation53_spill] sm:$0xff]  ;;  %v9676_v34 = vld [vmem:[#allocation86_spill] sm:$0xff] }
 0x2ad   : > { %v4856_v57 = vpop.eup %4855  ;;  %v1880_v53 = vmul.f32 0.70710677, %v1006_v17  ;;  %v8267_v13 = vadd.f32 %v9674_v40, %v5496_v43  ;;  %3339 = vmatprep.mubr.bf16.mxu0 %v2840_v60  ;;  %v3223_v12 = vpop.f32.mrf.mxu0  ;;  %v2380_v24 = vadd.f32 1.0, %v4852_v62  ;;  %4873 = verf.f32 %v1878_v0  ;;  %v9678_v60 = vld [vmem:[#allocation99_spill] sm:$0xff]  ;;  %v9679_v0 = vld [vmem:[#allocation64_spill] sm:$0xff]  ;;  %v9680_v62 = vld [vmem:[#allocation106_spill] sm:$0xff] }
 0x2ae   : > { %v8260_v28 = vpop.f32.mrf.mxu1  ;;  %9673 = vst [vmem:[#allocation47_spill] sm:$0xff] %v8263_v3  ;;  %v4858_v18 = vpop.eup %4857  ;;  %v1882_v26 = vmul.f32 0.70710677, %v1359_v5  ;;  %v8271_v49 = vadd.f32 %v9675_v52, %v5492_v37  ;;  %3628 = vmatprep.mubr.bf16.mxu1 %v2842_v35  ;;  %v9677_v21 = vpack.c.bf16 %v7921_v2, %v9676_v34  ;;  %v8276_v32 = vmul.f32 0.5, %v1355_v41 }
 0x2af   : > { %9672 = vst [vmem:[#allocation103_spill] sm:$0xff] %v8260_v28  ;;  %v2382_v28 = vadd.f32 1.0, %v4854_v59  ;;  %v1883_v40 = vmul.f32 0.70710677, %v1010_v19  ;;  %v8280_v12 = vadd.f32 %v9678_v60, %v5494_v39  ;;  %v9681_v4 = vpack.c.bf16 %v9679_v0, %v9680_v62  ;;  %v8285_v52 = vpop.f32.mrf.mxu0  ;;  %v9683_v59 = vld [vmem:[#allocation97_spill] sm:$0xff] }
 0x2b0   : > { %3340 = vmatmul.mubr.bf16.gmra.mxu0 %v9677_v21  ;;  %v3512_v1 = vpop.f32.mrf.mxu1  ;;  %9682 = vst [vmem:[#allocation57_spill] sm:$0xff] %v8285_v52  ;;  %v2383_v35 = vadd.f32 1.0, %v4856_v57  ;;  %v8288_v14 = vmul.f32 0.5, %v8200_v11  ;;  %v1885_v2 = vmul.f32 0.70710677, %v1363_v31  ;;  %v8292_v41 = vadd.f32 %v9683_v59, %v5505_v47 }
 0x2b1   : > { %3629 = vmatmul.mubr.bf16.gmra.mxu1 %v9681_v4  ;;  %v4860_v21 = vpop.eup %4859  ;;  %v2385_v1 = vadd.f32 1.0, %v4858_v18  ;;  %v8297_v60 = vmul.f32 0.5, %v8211_v25  ;;  %4875 = verf.f32 %v1880_v53  ;;  %v1884_v4 = vmul.f32 0.70710677, %v8267_v13  ;;  %v3226_v0 = vpop.f32.mrf.mxu0 }
 0x2b2   : > { %v8294_v34 = vpop.f32.mrf.mxu1  ;;  %v4862_v57 = vpop.eup %4861  ;;  %v8301_v11 = vmul.f32 %v2380_v24, %v8176_v51  ;;  %v8303_v62 = vmul.f32 0.5, %v1006_v17  ;;  %4877 = verf.f32 %v1882_v26  ;;  %v1887_v59 = vmul.f32 0.70710677, %v8271_v49  ;;  %v9688_v24 = vld [vmem:[#allocation61_spill] sm:$0xff] }
 0x2b3   : > { %9684 = vst [vmem:[#allocation48_spill] sm:$0xff] %v8294_v34  ;;  %v4864_v34 = vpop.eup %4863  ;;  %v8307_v18 = vmul.f32 %v2382_v28, %v8184_v22  ;;  %v8309_v25 = vmul.f32 0.5, %v1359_v5  ;;  %4879 = verf.f32 %v1883_v40  ;;  %v1889_v53 = vmul.f32 0.70710677, %v8280_v12  ;;  %v9689_v5 = vld [vmem:[#allocation52_spill] sm:$0xff] }
 0x2b4   : > { %9685 = vst [vmem:[#allocation21_spill] sm:$0xff] %v8301_v11  ;;  %v3515_v52 = vpop.f32.mrf.mxu1  ;;  %v4866_v0 = vpop.eup %4865  ;;  %v8313_v45 = vmul.f32 %v2383_v35, %v8186_v38  ;;  %4881 = verf.f32 %v1885_v2  ;;  %v1886_v51 = vmul.f32 0.70710677, %v8292_v41  ;;  %v8318_v17 = vadd.f32 %v9688_v24, %v5496_v43  ;;  %v9690_v24 = vld [vmem:[#allocation84_spill] sm:$0xff] }
 0x2b5   : > { %9686 = vst [vmem:[#allocation22_spill] sm:$0xff] %v8307_v18  ;;  %v8321_v26 = vmul.f32 %v2385_v1, %v8196_v54  ;;  %v8323_v22 = vmul.f32 0.5, %v1010_v19  ;;  %4883 = verf.f32 %v1884_v4  ;;  %v8327_v28 = vadd.f32 %v9689_v5, %v5505_v47  ;;  %v9691_v1 = vld [vmem:[#allocation29_spill] sm:$0xff] }
 0x2b6   : > { %9687 = vst [vmem:[#allocation79_spill] sm:$0xff] %v8313_v45  ;;  %v2384_v40 = vadd.f32 1.0, %v4860_v21  ;;  %v2386_v38 = vadd.f32 1.0, %v4862_v57  ;;  %v8329_v52 = vmul.f32 0.5, %v1363_v31  ;;  %4885 = verf.f32 %v1887_v59  ;;  %v9692_v21 = vld [vmem:[#allocation68_spill] sm:$0xff]  ;;  %v9695_v5 = vld [vmem:[#allocation33_spill] sm:$0xff] }
 0x2b7   : > { %v2387_v35 = vadd.f32 1.0, %v4864_v34  ;;  %v2389_v2 = vadd.f32 1.0, %v4866_v0  ;;  %4887 = verf.f32 %v1889_v53  ;;  %v8333_v18 = vadd.f32 %v9690_v24, %v5492_v37  ;;  %v4868_v54 = vpop.eup %4867  ;;  %v9694_v0 = vld [vmem:[#allocation87_spill] sm:$0xff] }
 0x2b8   : > { %4889 = verf.f32 %v1886_v51  ;;  %v1888_v19 = vmul.f32 0.70710677, %v8318_v17  ;;  %v8338_v4 = vadd.f32 %v9691_v1, %v5494_v39  ;;  %v2844_v31 = vpack.c.bf16 %v8082_v29, %v9692_v21  ;;  %v4870_v34 = vpop.eup %4869 }
 0x2b9   : > { %v1890_v53 = vmul.f32 0.70710677, %v8327_v28  ;;  %v8349_v51 = vadd.f32 %v9694_v0, %v5496_v43  ;;  %v2846_v24 = vpack.c.bf16 %v8085_v20, %v9695_v5  ;;  %v4872_v11 = vpop.eup %4871  ;;  %v8358_v21 = vmul.f32 %v2384_v40, %v8207_v61 }
 0x2ba   : > { %v8361_v59 = vmul.f32 %v2386_v38, %v8223_v50  ;;  %3347 = vmatprep.mubr.bf16.mxu0 %v2844_v31  ;;  %v4874_v45 = vpop.eup %4873  ;;  %v8368_v20 = vmul.f32 %v2387_v35, %v8228_v16  ;;  %v8371_v5 = vmul.f32 %v2389_v2, %v8230_v46  ;;  %v8374_v29 = vmul.f32 0.5, %v8267_v13  ;;  %v9700_v35 = vld [vmem:[#allocation30_spill] sm:$0xff] }
 0x2bb   : > { %v8342_v57 = vpop.f32.mrf.mxu0  ;;  %v8353_v1 = vpop.f32.mrf.mxu1  ;;  %v1891_v61 = vmul.f32 0.70710677, %v8333_v18  ;;  %3636 = vmatprep.mubr.bf16.mxu1 %v2846_v24  ;;  %v9699_v50 = vpack.c.bf16 %v8041_v63, %v7981_v7  ;;  %v2391_v38 = vadd.f32 1.0, %v4868_v54  ;;  %v2393_v31 = vadd.f32 1.0, %v4870_v34 }
 0x2bc   : > { %9693 = vst [vmem:[#allocation49_spill] sm:$0xff] %v8342_v57  ;;  %9696 = vst [vmem:[#allocation80_spill] sm:$0xff] %v8353_v1  ;;  %v9697_v57 = vld [vmem:[#allocation23_spill] sm:$0xff]  ;;  %4891 = verf.f32 %v1888_v19  ;;  %v1893_v16 = vmul.f32 0.70710677, %v8338_v4  ;;  %v2388_v13 = vadd.f32 1.0, %v4872_v11 }
 0x2bd   : > { %v8365_v56 = vadd.f32 %v9697_v57, %v5492_v37  ;;  %v3231_v0 = vpop.f32.mrf.mxu0  ;;  %9698 = vst [vmem:[#allocation91_spill] sm:$0xff] %v8368_v20  ;;  %3348 = vmatmul.mubr.bf16.gmra.mxu0 %v9699_v50  ;;  %v3520_v40 = vpop.f32.mrf.mxu1  ;;  %v9701_v57 = vld [vmem:[#allocation60_spill] sm:$0xff]  ;;  %4893 = verf.f32 %v1890_v53  ;;  %v1892_v24 = vmul.f32 0.70710677, %v8349_v51  ;;  %v2390_v19 = vadd.f32 1.0, %v4874_v45  ;;  %v9707_v45 = vld [vmem:[#allocation105_spill] sm:$0xff] }
 0x2be   : > { %v9702_v46 = vpack.c.bf16 %v9700_v35, %v9701_v57  ;;  %v9704_v0 = vld [vmem:[#allocation75_spill] sm:$0xff]  ;;  %v4876_v54 = vpop.eup %4875  ;;  %v8394_v34 = vmul.f32 0.5, %v8292_v41  ;;  %v8402_v57 = vmul.f32 0.5, %v8271_v49  ;;  %4895 = verf.f32 %v1891_v61 }
 0x2bf   : > { %v8384_v2 = vpop.f32.mrf.mxu0  ;;  %v8389_v7 = vadd.f32 %v9704_v0, %v5505_v47  ;;  %v8391_v63 = vpop.f32.mrf.mxu1  ;;  %v1895_v50 = vmul.f32 0.70710677, %v8365_v56  ;;  %v9706_v40 = vld [vmem:[#allocation55_spill] sm:$0xff]  ;;  %v8409_v0 = vadd.f32 %v9707_v45, %v5496_v43  ;;  %4897 = verf.f32 %v1893_v16 }
 0x2c0   : > { %3637 = vmatmul.mubr.bf16.gmra.mxu1 %v9702_v46  ;;  %9703 = vst [vmem:[#allocation50_spill] sm:$0xff] %v8384_v2  ;;  %9705 = vst [vmem:[#allocation90_spill] sm:$0xff] %v8391_v63  ;;  %v8399_v35 = vadd.f32 %v9706_v40, %v5494_v39  ;;  %v4878_v53 = vpop.eup %4877  ;;  %v8405_v46 = vmul.f32 0.5, %v8280_v12  ;;  %v8412_v2 = vmul.f32 %v2391_v38, %v8288_v14  ;;  %v9708_v49 = vld [vmem:[#allocation63_spill] sm:$0xff]  ;;  %v2392_v1 = vadd.f32 1.0, %v4876_v54 }
 0x2c1   : > { %v3234_v11 = vpop.f32.mrf.mxu0  ;;  %v3523_v41 = vpop.f32.mrf.mxu1  ;;  %v8415_v40 = vmul.f32 %v2393_v31, %v8297_v60  ;;  %v8422_v61 = vmul.f32 %v2388_v13, %v8254_v55  ;;  %4899 = verf.f32 %v1892_v24  ;;  %v1894_v45 = vmul.f32 0.70710677, %v8389_v7 }
 0x2c2   : > { %v4880_v63 = vpop.eup %4879  ;;  %v8419_v11 = vadd.f32 %v9708_v49, %v5505_v47  ;;  %v8426_v14 = vmul.f32 %v2390_v19, %v8276_v32  ;;  %v8429_v60 = vmul.f32 0.5, %v8318_v17  ;;  %4901 = verf.f32 %v1895_v50  ;;  %v9710_v17 = vld [vmem:[#allocation89_spill] sm:$0xff] }
 0x2c3   : > { %v4882_v12 = vpop.eup %4881  ;;  %v1897_v38 = vmul.f32 0.70710677, %v8399_v35  ;;  %v8433_v16 = vmul.f32 0.5, %v8327_v28  ;;  %v8436_v55 = vmul.f32 0.5, %v8333_v18  ;;  %v8439_v13 = vmul.f32 0.5, %v8338_v4 }
 0x2c4   : > { %v4884_v41 = vpop.eup %4883  ;;  %9709 = vst [vmem:[#allocation24_spill] sm:$0xff] %v8426_v14  ;;  %v1896_v24 = vmul.f32 0.70710677, %v8409_v0  ;;  %v2394_v19 = vadd.f32 1.0, %v4878_v53  ;;  %v1898_v50 = vmul.f32 0.70710677, %v8419_v11  ;;  %v8448_v49 = vmul.f32 %v2392_v1, %v8303_v62 }
 0x2c5   : > { %v4886_v31 = vpop.eup %4885  ;;  %v2395_v18 = vadd.f32 1.0, %v4880_v63  ;;  %4903 = verf.f32 %v1894_v45  ;;  %v2848_v4 = vpack.c.bf16 %v8152_v30, %v8124_v6  ;;  %v2397_v3 = vadd.f32 1.0, %v4882_v12  ;;  %v9711_v63 = vld [vmem:[#allocation88_spill] sm:$0xff] }
 0x2c6   : > { %v4888_v32 = vpop.eup %4887  ;;  %v8452_v14 = vpop.f32.mrf.mxu0  ;;  %4905 = verf.f32 %v1897_v38  ;;  %v8456_v20 = vadd.f32 %v9710_v17, %v5496_v43  ;;  %v2850_v53 = vpack.c.bf16 %v8157_v9, %v8137_v23  ;;  %v2399_v62 = vadd.f32 1.0, %v4886_v31  ;;  %v9712_v38 = vld [vmem:[#allocation66_spill] sm:$0xff] }
 0x2c7   : > { %v4890_v28 = vpop.eup %4889  ;;  %v8460_v54 = vpop.f32.mrf.mxu1  ;;  %v2401_v1 = vadd.f32 1.0, %v4888_v32  ;;  %4907 = verf.f32 %v1896_v24  ;;  %v1030_v45 = vadd.f32 %v9711_v63, %v5492_v37  ;;  %3355 = vmatprep.mubr.bf16.mxu0 %v2848_v4  ;;  %v2396_v30 = vadd.f32 1.0, %v4884_v41 }
 0x2c8   : > { %v3239_v6 = vpop.f32.mrf.mxu0  ;;  %v2398_v12 = vadd.f32 1.0, %v4890_v28  ;;  %4909 = verf.f32 %v1898_v50  ;;  %v8466_v17 = vadd.f32 %v9712_v38, %v5505_v47  ;;  %3644 = vmatprep.mubr.bf16.mxu1 %v2850_v53  ;;  %v9713_v23 = vpack.c.bf16 %v8116_v44, %v8089_v10  ;;  %v9714_v50 = vld [vmem:[#allocation65_spill] sm:$0xff] }
 0x2c9   : > { %v3528_v9 = vpop.f32.mrf.mxu1  ;;  %v4892_v31 = vpop.eup %4891  ;;  %v8472_v24 = vmul.f32 %v2394_v19, %v8309_v25  ;;  %v8475_v32 = vmul.f32 %v2395_v18, %v8323_v22  ;;  %v8478_v41 = vmul.f32 0.5, %v8349_v51  ;;  %v8482_v28 = vadd.f32 %v9714_v50, %v5494_v39 }
 0x2ca   : > { %3356 = vmatmul.mubr.bf16.gmra.mxu0 %v9713_v23  ;;  %v9716_v4 = vpack.c.bf16 %v8127_v33, %v8098_v36  ;;  %v8487_v10 = vpop.f32.mrf.mxu0  ;;  %v4894_v44 = vpop.eup %4893  ;;  %v8490_v25 = vmul.f32 %v2397_v3, %v8329_v52  ;;  %v8493_v22 = vmul.f32 0.5, %v8389_v7  ;;  %v8496_v51 = vmul.f32 0.5, %v8365_v56  ;;  %v9719_v23 = vld [vmem:[#allocation56_spill] sm:$0xff] }
 0x2cb   : > { %9715 = vst [vmem:[#allocation19_spill] sm:$0xff] %v8482_v28  ;;  %v1900_v19 = vmul.f32 0.70710677, %v8456_v20  ;;  %v8499_v18 = vpop.f32.mrf.mxu1  ;;  %v8502_v53 = vmul.f32 %v2399_v62, %v8402_v57  ;;  %v8505_v36 = vmul.f32 %v2401_v1, %v8405_v46  ;;  %v8508_v33 = vmul.f32 0.5, %v8399_v35  ;;  %v4896_v7 = vpop.eup %4895 }
 0x2cc   : > { %3645 = vmatmul.mubr.bf16.gmra.mxu1 %v9716_v4  ;;  %9717 = vst [vmem:[#allocation25_spill] sm:$0xff] %v8490_v25  ;;  %v1899_v3 = vmul.f32 0.70710677, %v1030_v45  ;;  %v3242_v52 = vpop.f32.mrf.mxu0  ;;  %v8511_v63 = vmul.f32 %v2396_v30, %v8374_v29  ;;  %v8514_v56 = vmul.f32 %v2398_v12, %v8394_v34  ;;  %v8517_v6 = vmul.f32 0.5, %v8409_v0  ;;  %v4898_v46 = vpop.eup %4897  ;;  %v9721_v0 = vld [vmem:[#allocation93_spill] sm:$0xff] }
 0x2cd   : > { %9718 = vst [vmem:[#allocation81_spill] sm:$0xff] %v8505_v36  ;;  %v1902_v57 = vmul.f32 0.70710677, %v8466_v17  ;;  %v3531_v62 = vpop.f32.mrf.mxu1  ;;  %v2400_v1 = vadd.f32 1.0, %v4892_v31  ;;  %v2402_v38 = vadd.f32 1.0, %v4894_v44  ;;  %v1034_v9 = vadd.f32 %v9719_v23, %v5492_v37  ;;  %v9723_v44 = vld [vmem:[#allocation58_spill] sm:$0xff] }
 0x2ce   : > { %v1901_v35 = vmul.f32 0.70710677, %v8482_v28  ;;  %v4900_v50 = vpop.eup %4899  ;;  %v8524_v29 = vmul.f32 0.5, %v8419_v11  ;;  %v8526_v34 = vmul.f32 0.5, %v1030_v45  ;;  %4911 = verf.f32 %v1900_v19  ;;  %v9724_v45 = vld [vmem:[#allocation94_spill] sm:$0xff] }
 0x2cf   : > { %v8530_v30 = vadd.f32 %v9721_v0, %v5494_v39  ;;  %v4902_v12 = vpop.eup %4901  ;;  %4913 = verf.f32 %v1899_v3  ;;  %v1036_v52 = vadd.f32 %v9723_v44, %v5496_v43  ;;  %v2403_v11 = vadd.f32 1.0, %v4896_v7 }
 0x2d0   : > { %9720 = vst [vmem:[#allocation82_spill] sm:$0xff] %v8526_v34  ;;  %v2405_v62 = vadd.f32 1.0, %v4898_v46  ;;  %4915 = verf.f32 %v1902_v57  ;;  %v1389_v19 = vadd.f32 %v9724_v45, %v5505_v47  ;;  %v8541_v23 = vmul.f32 %v2400_v1, %v8429_v60  ;;  %v9725_v60 = vld [vmem:[#allocation95_spill] sm:$0xff] }
 0x2d1   : > { %9722 = vst [vmem:[#allocation83_spill] sm:$0xff] %v8530_v30  ;;  %v8544_v0 = vmul.f32 %v2402_v38, %v8433_v16  ;;  %4917 = verf.f32 %v1901_v35  ;;  %v1903_v31 = vmul.f32 0.70710677, %v1034_v9  ;;  %v2404_v4 = vadd.f32 1.0, %v4900_v50  ;;  %v9727_v16 = vld [vmem:[#allocation35_spill] sm:$0xff] }
 0x2d2   : > { %v4904_v28 = vpop.eup %4903  ;;  %v2407_v3 = vadd.f32 1.0, %v4902_v12  ;;  %v1905_v34 = vmul.f32 0.70710677, %v8530_v30  ;;  %v2852_v7 = vpack.c.bf16 %v8238_v48, %v8194_v42  ;;  %v1904_v44 = vmul.f32 0.70710677, %v1036_v52 }
 0x2d3   : > { %v8549_v57 = vpop.f32.mrf.mxu0  ;;  %v4906_v46 = vpop.eup %4905  ;;  %v8553_v1 = vadd.f32 %v9725_v60, %v5492_v37  ;;  %v8557_v38 = vadd.f32 %v9727_v16, %v5494_v39  ;;  %v2854_v35 = vpack.c.bf16 %v8241_v27, %v8214_v58  ;;  %v8564_v42 = vmul.f32 %v2403_v11, %v8436_v55 }
 0x2d4   : > { %v8561_v50 = vpop.f32.mrf.mxu1  ;;  %v4908_v12 = vpop.eup %4907  ;;  %v8567_v48 = vmul.f32 %v2405_v62, %v8439_v13  ;;  %v8570_v45 = vmul.f32 0.5, %v8456_v20  ;;  %v1906_v60 = vmul.f32 0.70710677, %v1389_v19  ;;  %3363 = vmatprep.mubr.bf16.mxu0 %v2852_v7  ;;  %v2406_v25 = vadd.f32 1.0, %v4904_v28  ;;  %v9731_v28 = vld [vmem:[#allocation38_spill] sm:$0xff] }
 0x2d5   : > { %9726 = vst [vmem:[#allocation18_spill] sm:$0xff] %v8553_v1  ;;  %9728 = vst [vmem:[#allocation53_spill] sm:$0xff] %v8557_v38  ;;  %v3247_v30 = vpop.f32.mrf.mxu0  ;;  %v4910_v16 = vpop.eup %4909  ;;  %v8573_v36 = vmul.f32 0.5, %v8466_v17  ;;  %v8575_v58 = vmul.f32 0.5, %v1034_v9  ;;  %4919 = verf.f32 %v1903_v31  ;;  %3652 = vmatprep.mubr.bf16.mxu1 %v2854_v35  ;;  %v9730_v27 = vpack.c.bf16 %v8205_v8, %v8162_v15  ;;  %v9732_v17 = vld [vmem:[#allocation69_spill] sm:$0xff]  ;;  %v9734_v8 = vld [vmem:[#allocation34_spill] sm:$0xff] }
 0x2d6   : > { %v3536_v55 = vpop.f32.mrf.mxu1  ;;  %v8581_v20 = vmul.f32 %v2404_v4, %v8478_v41  ;;  %v8584_v13 = vmul.f32 %v2407_v3, %v8496_v51  ;;  %v2409_v30 = vadd.f32 1.0, %v4906_v46  ;;  %4921 = verf.f32 %v1905_v34  ;;  %v9736_v34 = vld [vmem:[#allocation71_spill] sm:$0xff]  ;;  %v9738_v35 = vld [vmem:[#allocation100_spill] sm:$0xff] }
 0x2d7   : > { %9729 = vst [vmem:[#allocation86_spill] sm:$0xff] %v8575_v58  ;;  %3364 = vmatmul.mubr.bf16.gmra.mxu0 %v9730_v27  ;;  %v9733_v11 = vpack.c.bf16 %v9731_v28, %v9732_v17  ;;  %v8589_v9 = vpop.f32.mrf.mxu0  ;;  %4923 = verf.f32 %v1904_v44  ;;  %v1907_v31 = vmul.f32 0.70710677, %v8553_v1  ;;  %v1909_v15 = vmul.f32 0.70710677, %v8557_v38  ;;  %v9740_v55 = vld [vmem:[#allocation74_spill] sm:$0xff] }
 0x2d8   : > { %v8595_v41 = vadd.f32 %v9734_v8, %v5496_v43  ;;  %v8597_v4 = vpop.f32.mrf.mxu1  ;;  %v2408_v51 = vadd.f32 1.0, %v4908_v12  ;;  %v2410_v62 = vadd.f32 1.0, %v4910_v16  ;;  %4925 = verf.f32 %v1906_v60  ;;  %v9742_v17 = vld [vmem:[#allocation77_spill] sm:$0xff] }
 0x2d9   : > { %3653 = vmatmul.mubr.bf16.gmra.mxu1 %v9733_v11  ;;  %v8601_v3 = vadd.f32 %v9736_v34, %v5505_v47  ;;  %v3250_v7 = vpop.f32.mrf.mxu0  ;;  %v8604_v46 = vmul.f32 %v2406_v25, %v8493_v22  ;;  %v8606_v44 = vmul.f32 0.5, %v1036_v52  ;;  %v8610_v27 = vadd.f32 %v9738_v35, %v5492_v37  ;;  %v9743_v11 = vld [vmem:[#allocation26_spill] sm:$0xff]  ;;  %v8626_v22 = vld [vmem:[%s9033_s4] ss:$0 sm:$0xff]  ;;  %v9744_v52 = vld [vmem:[#allocation21_spill] sm:$0xff] }
 0x2da   : > { %9735 = vst [vmem:[#allocation99_spill] sm:$0xff] %v8595_v41  ;;  %v8614_v28 = vadd.f32 %v9740_v55, %v5494_v39  ;;  %v3539_v12 = vpop.f32.mrf.mxu1  ;;  %v8617_v60 = vmul.f32 %v2409_v30, %v8508_v33  ;;  %v8619_v16 = vmul.f32 0.5, %v1389_v19  ;;  %v3463_v25 = vadd.f32 %v9743_v11, %v9742_v17  ;;  %v9745_v19 = vld [vmem:[#allocation101_spill] sm:$0xff] }
 0x2db   : > { %9737 = vst [vmem:[#allocation64_spill] sm:$0xff] %v8601_v3  ;;  %9739 = vst [vmem:[#allocation106_spill] sm:$0xff] %v8610_v27  ;;  %v2856_v8 = vpack.c.bf16 %v8358_v21, %v9744_v52  ;;  %v4912_v34 = vpop.eup %4911  ;;  %4927 = verf.f32 %v1907_v31  ;;  %v1908_v33 = vmul.f32 0.70710677, %v8595_v41  ;;  %v8635_v30 = vadd.f32 %v9745_v19, %v5496_v43  ;;  %v9747_v19 = vld [vmem:[#allocation22_spill] sm:$0xff]  ;;  %v9754_v1 = vld [vmem:[#allocation85_spill] sm:$0xff] }
 0x2dc   : > { %9741 = vst [vmem:[#allocation97_spill] sm:$0xff] %v8614_v28  ;;  %v8637_v35 = vpop.eup %4913  ;;  %v8640_v55 = vmul.f32 %v2408_v51, %v8517_v6  ;;  %v8643_v12 = vmul.f32 %v2410_v62, %v8524_v29  ;;  %4929 = verf.f32 %v1909_v15  ;;  %v1910_v21 = vmul.f32 0.70710677, %v8601_v3  ;;  %v9748_v6 = vld [vmem:[#allocation79_spill] sm:$0xff]  ;;  %v9749_v51 = vld [vmem:[#allocation42_spill] sm:$0xff]  ;;  %v9757_v41 = vld [vmem:[#allocation20_spill] sm:$0xff] }
 0x2dd   : > { %9746 = vst [vmem:[#allocation61_spill] sm:$0xff] %v8635_v30  ;;  %3371 = vmatprep.mubr.bf16.mxu0 %v2856_v8  ;;  %v4916_v31 = vpop.eup %4915  ;;  %v1911_v17 = vmul.f32 0.70710677, %v8610_v27  ;;  %v1913_v11 = vmul.f32 0.70710677, %v8614_v28  ;;  %v3919_v52 = vadd.f32 %v8626_v22, %v3463_v25  ;;  %v2858_v7 = vpack.c.bf16 %v8361_v59, %v9747_v19  ;;  %v9752_v62 = vld [vmem:[#allocation102_spill] sm:$0xff] }
 0x2de   : > { %v9750_v38 = vpack.c.bf16 %v9748_v6, %v9749_v51  ;;  %v8654_v29 = vpop.eup %4917  ;;  %v2412_v15 = vadd.f32 1.0, %v4912_v34  ;;  %v8658_v8 = vadd.f32 %v9752_v62, %v5505_v47  ;;  %v9755_v27 = vld [vmem:[#allocation76_spill] sm:$0xff]  ;;  %4931 = verf.f32 %v1908_v33  ;;  %v9758_v19 = vld [vmem:[#allocation62_spill] sm:$0xff]  ;;  %v9760_v34 = vld [vmem:[#allocation47_spill] sm:$0xff] }
 0x2df   : > { %9751 = vst [vmem:[#allocation52_spill] sm:$0xff] %v8654_v29  ;;  %v3466_v3 = vadd.f32 %v9755_v27, %v9754_v1  ;;  %v9756_v28 = vld [vmem:[#allocation104_spill] sm:$0xff]  ;;  %v1912_v59 = vmul.f32 0.70710677, %v8635_v30  ;;  %v8667_v6 = vadd.f32 %v9758_v19, %v5492_v37  ;;  %3983 = vst [vmem:[%s8671_s30] sm:$0xff] %v3919_v52  ;;  %3660 = vmatprep.mubr.bf16.mxu1 %v2858_v7  ;;  %v8678_v27 = vadd.f32 1.0, %v4916_v31  ;;  %v9764_v31 = vld [vmem:[#allocation51_spill] sm:$0xff] }
 0x2e0   : > { %3372 = vmatmul.mubr.bf16.gmra.mxu0 %v9750_v38  ;;  %9753 = vst [vmem:[#allocation84_spill] sm:$0xff] %v8658_v8  ;;  %v3471_v25 = vadd.f32 %v9757_v41, %v9756_v28  ;;  %v2860_v38 = vpack.c.bf16 %v8448_v49, %v8422_v61  ;;  %v8676_v1 = vpop.f32.mrf.mxu0  ;;  %4933 = verf.f32 %v1910_v21  ;;  %v9761_v33 = vpack.c.bf16 %v8321_v26, %v9760_v34  ;;  %v9762_v61 = vld [vmem:[#allocation36_spill] sm:$0xff]  ;;  %v9765_v51 = vld [vmem:[#allocation54_spill] sm:$0xff]  ;;  %v9766_v19 = vld [vmem:[#allocation67_spill] sm:$0xff] }
 0x2e1   : > { %9759 = vst [vmem:[#allocation29_spill] sm:$0xff] %v8667_v6  ;;  %v3920_v41 = vadd.f32 %v8626_v22, %v3466_v3  ;;  %4935 = verf.f32 %v1911_v17  ;;  %v8689_v49 = vadd.f32 %v9762_v61, %v5494_v39  ;;  %v9763_v7 = vld [vmem:[#allocation24_spill] sm:$0xff]  ;;  %v3474_v3 = vadd.f32 %v9765_v51, %v9764_v31  ;;  %v9779_v29 = vld [vmem:[#allocation59_spill] sm:$0xff]  ;;  %v9781_v30 = vld [vmem:[#allocation98_spill] sm:$0xff] }
 0x2e2   : > { %v3921_v28 = vadd.f32 %v8626_v22, %v3471_v25  ;;  %3661 = vmatmul.mubr.bf16.gmra.mxu1 %v9761_v33  ;;  %v8685_v52 = vpop.f32.mrf.mxu1  ;;  %3379 = vmatprep.mubr.bf16.mxu0 %v2860_v38  ;;  %v2862_v21 = vpack.c.bf16 %v8472_v24, %v9763_v7  ;;  %v3255_v62 = vpop.f32.mrf.mxu0  ;;  %v8698_v26 = vmul.f32 %v2412_v15, %v8570_v45  ;;  %4937 = verf.f32 %v1913_v11  ;;  %v9767_v34 = vld [vmem:[#allocation44_spill] sm:$0xff]  ;;  %v9769_v15 = vld [vmem:[#allocation17_spill] sm:$0xff]  ;;  %v9770_v11 = vld [vmem:[#allocation78_spill] sm:$0xff] }
 0x2e3   : > { %v8695_v25 = vpop.eup %4919  ;;  %v1914_v17 = vmul.f32 0.70710677, %v8658_v8  ;;  %3984 = vst [vmem:[%s8671_s30 + $0x8] sm:$0xff] %v3920_v41  ;;  %v3479_v38 = vadd.f32 %v9767_v34, %v9766_v19  ;;  %4939 = verf.f32 %v1912_v59  ;;  %v8708_v61 = vmul.f32 0.70710677, %v8667_v6  ;;  %v9772_v19 = vld [vmem:[#allocation27_spill] sm:$0xff] }
 0x2e4   : > { %3985 = vst [vmem:[%s8671_s30 + $0x10] sm:$0xff] %v3921_v28  ;;  %v3544_v33 = vpop.f32.mrf.mxu1  ;;  %v8705_v24 = vpop.eup %4921  ;;  %3668 = vmatprep.mubr.bf16.mxu1 %v2862_v21  ;;  %v3922_v45 = vadd.f32 %v8626_v22, %v3474_v3  ;;  %v3482_v7 = vadd.f32 %v9770_v11, %v9769_v15  ;;  %v9771_v28 = vld [vmem:[#allocation72_spill] sm:$0xff]  ;;  %v2864_v59 = vpack.c.bf16 %v8541_v23, %v8511_v63  ;;  %v9773_v21 = vld [vmem:[#allocation46_spill] sm:$0xff] }
 0x2e5   : > { %9768 = vst [vmem:[#allocation68_spill] sm:$0xff] %v8705_v24  ;;  %v8713_v31 = vpop.f32.mrf.mxu0  ;;  %v4924_v41 = vpop.eup %4923  ;;  %v8717_v51 = vadd.f32 %v9771_v28, %v5496_v43  ;;  %v3923_v62 = vadd.f32 %v8626_v22, %v3479_v38  ;;  %v3487_v34 = vadd.f32 %v9773_v21, %v9772_v19  ;;  %v9774_v15 = vld [vmem:[#allocation28_spill] sm:$0xff]  ;;  %v9775_v28 = vld [vmem:[#allocation91_spill] sm:$0xff]  ;;  %v9778_v63 = vld [vmem:[#allocation70_spill] sm:$0xff]  ;;  %4941 = verf.f32 %v1914_v17 }
 0x2e6   : > { %v8724_v3 = vpop.f32.mrf.mxu1  ;;  %v4926_v33 = vpop.eup %4925  ;;  %v8728_v11 = vadd.f32 %v9774_v15, %v5496_v43  ;;  %3986 = vst [vmem:[%s8671_s30 + $0x18] sm:$0xff] %v3922_v45  ;;  %v9776_v6 = vpack.c.bf16 %v8412_v2, %v9775_v28  ;;  %v3924_v38 = vadd.f32 %v8626_v22, %v3482_v7  ;;  %v9777_v8 = vld [vmem:[#allocation32_spill] sm:$0xff]  ;;  %v9780_v19 = vld [vmem:[#allocation31_spill] sm:$0xff]  ;;  %v8741_v24 = vadd.f32 %v9781_v30, %v5505_v47  ;;  %v9782_v43 = vld [vmem:[#allocation41_spill] sm:$0xff] }
 0x2e7   : > { %v3490_v23 = vadd.f32 %v9778_v63, %v9777_v8  ;;  %v3495_v21 = vadd.f32 %v9780_v19, %v9779_v29  ;;  %v3258_v58 = vpop.f32.mrf.mxu0  ;;  %v8745_v45 = vadd.f32 %v9782_v43, %v5505_v47  ;;  %3987 = vst [vmem:[%s8671_s30 + $0x20] sm:$0xff] %v3923_v62  ;;  %v3925_v2 = vadd.f32 %v8626_v22, %v3487_v34  ;;  %v9784_v29 = vld [vmem:[#allocation73_spill] sm:$0xff]  ;;  %v9785_v17 = vld [vmem:[#allocation96_spill] sm:$0xff]  ;;  %v9791_v43 = vld [vmem:[#allocation39_spill] sm:$0xff] }
 0x2e8   : > { %3380 = vmatmul.mubr.bf16.gmra.mxu0 %v9776_v6  ;;  %v3547_v6 = vpop.f32.mrf.mxu1  ;;  %v2866_v8 = vpack.c.bf16 %v8544_v0, %v8514_v56  ;;  %3988 = vst [vmem:[%s8671_s30 + $0x28] sm:$0xff] %v3924_v38  ;;  %v3498_v7 = vadd.f32 %v9785_v17, %v9784_v29  ;;  %v8756_v47 = vpop.eup %4927  ;;  %v2416_v62 = vadd.f32 1.0, %v4924_v41  ;;  %v1920_v34 = vmul.f32 0.70710677, %v8717_v51  ;;  %v9787_v0 = vld [vmem:[#allocation92_spill] sm:$0xff]  ;;  %v9788_v15 = vld [vmem:[#allocation37_spill] sm:$0xff] }
 0x2e9   : > { %9783 = vst [vmem:[#allocation87_spill] sm:$0xff] %v8745_v45  ;;  %3387 = vmatprep.mubr.bf16.mxu0 %v2864_v59  ;;  %v3926_v58 = vadd.f32 %v8626_v22, %v3490_v23  ;;  %v3927_v30 = vadd.f32 %v8626_v22, %v3495_v21  ;;  %v8758_v59 = vadd.f32 1.0, %v4926_v33  ;;  %v9786_v56 = vpack.c.bf16 %v8415_v40, %v8371_v5  ;;  %v8767_v38 = vpop.eup %4929  ;;  %v9789_v23 = vld [vmem:[#allocation16_spill] sm:$0xff]  ;;  %v9793_v29 = vld [vmem:[#allocation43_spill] sm:$0xff] }
 0x2ea   : > { %3989 = vst [vmem:[%s8671_s30 + $0x30] sm:$0xff] %v3925_v2  ;;  %v3503_v28 = vadd.f32 %v9788_v15, %v9787_v0  ;;  %v1916_v63 = vmul.f32 0.70710677, %v8728_v11  ;;  %v8772_v41 = vadd.f32 %v9789_v23, %v5492_v37  ;;  %v9790_v33 = vld [vmem:[#allocation40_spill] sm:$0xff]  ;;  %v3928_v5 = vadd.f32 %v8626_v22, %v3498_v7  ;;  %v9792_v2 = vld [vmem:[#allocation45_spill] sm:$0xff]  ;;  %v9794_v37 = vld [vmem:[#allocation103_spill] sm:$0xff] }
 0x2eb   : > { %3669 = vmatmul.mubr.bf16.gmra.mxu1 %v9786_v56  ;;  %v8776_v19 = vadd.f32 %v9790_v33, %v5494_v39  ;;  %3990 = vst [vmem:[%s8671_s30 + $0x38] sm:$0xff] %v3926_v58  ;;  %3991 = vst [vmem:[%s8671_s30 + $0x40] sm:$0xff] %v3927_v30  ;;  %v1922_v40 = vmul.f32 0.70710677, %v8745_v45  ;;  %v3506_v6 = vadd.f32 %v9792_v2, %v9791_v43  ;;  %v1918_v56 = vmul.f32 0.70710677, %v8741_v24  ;;  %v8795_v45 = vpop.eup %4931 }
 0x2ec   : > { %3676 = vmatprep.mubr.bf16.mxu1 %v2866_v8  ;;  %v3929_v21 = vadd.f32 %v8626_v22, %v3503_v28  ;;  %v3511_v17 = vadd.f32 %v9794_v37, %v9793_v29  ;;  %3992 = vst [vmem:[%s8671_s30 + $0x48] sm:$0xff] %v3928_v5  ;;  %v9795_v39 = vld [vmem:[#allocation57_spill] sm:$0xff]  ;;  %v9796_v8 = vld [vmem:[#allocation48_spill] sm:$0xff]  ;;  %v9799_v7 = vld [vmem:[#allocation50_spill] sm:$0xff]  ;;  %4943 = verf.f32 %v1920_v34  ;;  %v2868_v28 = vpack.c.bf16 %v8640_v55, %v8581_v20 }
 0x2ed   : > { %v3514_v0 = vadd.f32 %v9796_v8, %v9795_v39  ;;  %v9797_v58 = vld [vmem:[#allocation49_spill] sm:$0xff]  ;;  %v9798_v30 = vld [vmem:[#allocation80_spill] sm:$0xff]  ;;  %v9800_v23 = vld [vmem:[#allocation90_spill] sm:$0xff]  ;;  %v3930_v5 = vadd.f32 %v8626_v22, %v3506_v6  ;;  %v8802_v29 = vpop.eup %4933  ;;  %4945 = verf.f32 %v1916_v63  ;;  %v1919_v37 = vmul.f32 0.70710677, %v8772_v41 }
 0x2ee   : > { %v3519_v15 = vadd.f32 %v9798_v30, %v9797_v58  ;;  %v3522_v33 = vadd.f32 %v9800_v23, %v9799_v7  ;;  %3993 = vst [vmem:[%s8671_s30 + $0x50] sm:$0xff] %v3929_v21  ;;  %v3931_v43 = vadd.f32 %v8626_v22, %v3511_v17  ;;  %v3261_v2 = vpop.f32.mrf.mxu0  ;;  %v9801_v39 = vpack.c.bf16 %v8502_v53, %v8475_v32  ;;  %v8810_v21 = vpop.eup %4935  ;;  %v9802_v58 = vld [vmem:[#allocation81_spill] sm:$0xff] }
 0x2ef   : > { %v3932_v20 = vadd.f32 %v8626_v22, %v3514_v0  ;;  %4947 = verf.f32 %v1922_v40  ;;  %3994 = vst [vmem:[%s8671_s30 + $0x58] sm:$0xff] %v3930_v5  ;;  %v3527_v32 = vadd.f32 %v8460_v54, %v8452_v14  ;;  %v3530_v53 = vadd.f32 %v8499_v18, %v8487_v10  ;;  %v8819_v17 = vpop.eup %4937  ;;  %v9803_v30 = vld [vmem:[#allocation25_spill] sm:$0xff] }
 0x2f0   : > { %3388 = vmatmul.mubr.bf16.gmra.mxu0 %v9801_v39  ;;  %v3933_v55 = vadd.f32 %v8626_v22, %v3519_v15  ;;  %v3550_v34 = vpop.f32.mrf.mxu1  ;;  %3995 = vst [vmem:[%s8671_s30 + $0x60] sm:$0xff] %v3931_v43  ;;  %v3934_v63 = vadd.f32 %v8626_v22, %v3522_v33  ;;  %v3263_v6 = vpop.f32.mrf.mxu0  ;;  %v2870_v8 = vpack.c.bf16 %v8643_v12, %v8604_v46  ;;  %4949 = verf.f32 %v1918_v56 }
 0x2f1   : > { %3395 = vmatprep.mubr.bf16.mxu0 %v2868_v28  ;;  %3996 = vst [vmem:[%s8671_s30 + $0x68] sm:$0xff] %v3932_v20  ;;  %v3535_v40 = vadd.f32 %v8561_v50, %v8549_v57  ;;  %v3538_v0 = vadd.f32 %v8597_v4, %v8589_v9  ;;  %v3543_v14 = vadd.f32 %v8685_v52, %v8676_v1  ;;  %v4940_v10 = vpop.eup %4939  ;;  %v2415_v23 = vadd.f32 1.0, %v8695_v25 }
 0x2f2   : > { %3997 = vst [vmem:[%s8671_s30 + $0x70] sm:$0xff] %v3933_v55  ;;  %v3552_v54 = vpop.f32.mrf.mxu1  ;;  %v2672_v18 = vmul.f32 %v2416_v62, %v8606_v44  ;;  %v9804_v46 = vpack.c.bf16 %v9802_v58, %v9803_v30  ;;  %3998 = vst [vmem:[%s8671_s30 + $0x78] sm:$0xff] %v3934_v63  ;;  %v3935_v12 = vadd.f32 %v8626_v22, %v3527_v32  ;;  %v3264_v9 = vpop.f32.mrf.mxu0  ;;  %v1921_v62 = vmul.f32 0.70710677, %v8776_v19  ;;  %v9807_v63 = vld [vmem:[#allocation61_spill] sm:$0xff]  ;;  %v9814_v30 = vld [vmem:[#allocation19_spill] sm:$0xff] }
 0x2f3   : > { %v3936_v57 = vadd.f32 %v8626_v22, %v3530_v53  ;;  %v3546_v50 = vadd.f32 %v8724_v3, %v8713_v31  ;;  %v3937_v4 = vadd.f32 %v8626_v22, %v3535_v40  ;;  %v3938_v44 = vadd.f32 %v8626_v22, %v3538_v0  ;;  %v4942_v7 = vpop.eup %4941  ;;  %v9810_v53 = vld [vmem:[#allocation52_spill] sm:$0xff]  ;;  %v9812_v40 = vld [vmem:[#allocation82_spill] sm:$0xff] }
 0x2f4   : > { %3677 = vmatmul.mubr.bf16.gmra.mxu1 %v9804_v46  ;;  %v3939_v1 = vadd.f32 %v8626_v22, %v3543_v14  ;;  %v3553_v52 = vpop.f32.mrf.mxu1  ;;  %3999 = vst [vmem:[%s8671_s30 + $0x80] sm:$0xff] %v3935_v12  ;;  %v3551_v3 = vadd.f32 %v3550_v34, %v3261_v2  ;;  %v3266_v15 = vpop.f32.mrf.mxu0  ;;  %v2674_v33 = vmul.f32 %v8758_v59, %v8619_v16  ;;  %v1917_v28 = vmul.f32 0.70710677, %v8689_v49  ;;  %v9813_v54 = vld [vmem:[#allocation84_spill] sm:$0xff] }
 0x2f5   : > { %3684 = vmatprep.mubr.bf16.mxu1 %v2870_v8  ;;  %4000 = vst [vmem:[%s8671_s30 + $0x88] sm:$0xff] %v3936_v57  ;;  %v3940_v31 = vadd.f32 %v8626_v22, %v3546_v50  ;;  %v3554_v56 = vadd.f32 %v3553_v52, %v3264_v9  ;;  %4951 = verf.f32 %v1919_v37  ;;  %4001 = vst [vmem:[%s8671_s30 + $0x90] sm:$0xff] %v3937_v4  ;;  %v2424_v43 = vadd.f32 1.0, %v4940_v10  ;;  %v9815_v50 = vld [vmem:[#allocation64_spill] sm:$0xff] }
 0x2f6   : > { %4002 = vst [vmem:[%s8671_s30 + $0x98] sm:$0xff] %v3938_v44  ;;  %4003 = vst [vmem:[%s8671_s30 + $0xa0] sm:$0xff] %v3939_v1  ;;  %v3555_v5 = vpop.f32.mrf.mxu1  ;;  %v2872_v2 = vpack.c.bf16 %v2672_v18, %v8698_v26  ;;  %v3941_v39 = vadd.f32 %v8626_v22, %v3551_v3  ;;  %v2869_v16 = vpack.c.bf16 %v8617_v60, %v8567_v48  ;;  %v2411_v59 = vadd.f32 1.0, %v8637_v35  ;;  %v9806_v26 = vld [vmem:[#allocation68_spill] sm:$0xff]  ;;  %v9808_v48 = vld [vmem:[#allocation86_spill] sm:$0xff] }
 0x2f7   : > { %4004 = vst [vmem:[%s8671_s30 + $0xa8] sm:$0xff] %v3940_v31  ;;  %v3942_v25 = vadd.f32 %v8626_v22, %v3554_v56  ;;  %v2670_v37 = vmul.f32 %v8678_v27, %v8573_v36  ;;  %4953 = verf.f32 %v8708_v61  ;;  %v9805_v20 = vpack.c.bf16 %v8584_v13, %v8564_v42  ;;  %v9809_v35 = vld [vmem:[#allocation83_spill] sm:$0xff]  ;;  %v9816_v56 = vld [vmem:[#allocation18_spill] sm:$0xff] }
 0x2f8   : > { %v2417_v55 = vadd.f32 1.0, %v9806_v26  ;;  %v2420_v34 = vadd.f32 1.0, %v8795_v45  ;;  %v1656_v32 = vmul.f32 0.5, %v9807_v63  ;;  %4955 = verf.f32 %v1921_v62  ;;  %4005 = vst [vmem:[%s8671_s30 + $0xb0] sm:$0xff] %v3941_v39  ;;  %v9811_v42 = vld [vmem:[#allocation99_spill] sm:$0xff] }
 0x2f9   : > { %3396 = vmatmul.mubr.bf16.gmra.mxu0 %v9805_v20  ;;  %4006 = vst [vmem:[%s8671_s30 + $0xb8] sm:$0xff] %v3942_v25  ;;  %v2671_v60 = vmul.f32 %v2415_v23, %v9808_v48  ;;  %v1649_v36 = vmul.f32 0.5, %v9809_v35  ;;  %v2426_v27 = vadd.f32 1.0, %v4942_v7  ;;  %v2874_v61 = vpack.c.bf16 %v2674_v33, %v2670_v37  ;;  %v4944_v45 = vpop.eup %4943  ;;  %v9818_v35 = vld [vmem:[#allocation97_spill] sm:$0xff] }
 0x2fa   : > { %3403 = vmatprep.mubr.bf16.mxu0 %v2872_v2  ;;  %v2413_v6 = vadd.f32 1.0, %v9810_v53  ;;  %v1652_v13 = vmul.f32 0.5, %v9811_v42  ;;  %v2680_v8 = vmul.f32 %v2424_v43, %v1656_v32  ;;  %4957 = verf.f32 %v1917_v28  ;;  %v4946_v58 = vpop.eup %4945  ;;  %v9817_v43 = vld [vmem:[#allocation106_spill] sm:$0xff] }
 0x2fb   : > { %v2667_v0 = vmul.f32 %v2411_v59, %v9812_v40  ;;  %v2422_v14 = vadd.f32 1.0, %v8802_v29  ;;  %v1658_v10 = vmul.f32 0.5, %v9813_v54  ;;  %v3269_v18 = vpop.f32.mrf.mxu0  ;;  %v1645_v46 = vmul.f32 0.5, %v9814_v30 }
 0x2fc   : > { %3685 = vmatmul.mubr.bf16.gmra.mxu1 %v2869_v16  ;;  %v2673_v12 = vmul.f32 %v2417_v55, %v1649_v36  ;;  %v2676_v57 = vmul.f32 %v2420_v34, %v1652_v13  ;;  %v1654_v9 = vmul.f32 0.5, %v9815_v50  ;;  %v4948_v44 = vpop.eup %4947  ;;  %v2423_v52 = vadd.f32 1.0, %v8810_v21 }
 0x2fd   : > { %3692 = vmatprep.mubr.bf16.mxu1 %v2874_v61  ;;  %v3558_v4 = vpop.f32.mrf.mxu1  ;;  %v2871_v1 = vpack.c.bf16 %v2671_v60, %v2667_v0  ;;  %v2682_v62 = vmul.f32 %v2426_v27, %v1658_v10  ;;  %v3271_v3 = vpop.f32.mrf.mxu0  ;;  %v2669_v29 = vmul.f32 %v2413_v6, %v1645_v46  ;;  %v1651_v15 = vmul.f32 0.5, %v9816_v56  ;;  %v9819_v6 = vld [vmem:[#allocation87_spill] sm:$0xff] }
 0x2fe   : > { %v3559_v31 = vadd.f32 %v3558_v4, %v3269_v18  ;;  %v2432_v7 = vadd.f32 1.0, %v4944_v45  ;;  %v2876_v23 = vpack.c.bf16 %v2680_v8, %v2676_v57  ;;  %v2419_v28 = vadd.f32 1.0, %v8756_v47  ;;  %v4950_v21 = vpop.eup %4949  ;;  %v9820_v45 = vld [vmem:[#allocation53_spill] sm:$0xff] }
 0x2ff   : > { %v3560_v33 = vpop.f32.mrf.mxu1  ;;  %v2678_v5 = vmul.f32 %v2422_v14, %v1654_v9  ;;  %v1655_v2 = vmul.f32 0.5, %v9817_v43  ;;  %v3272_v25 = vpop.f32.mrf.mxu0  ;;  %v2873_v16 = vpack.c.bf16 %v2673_v12, %v2669_v29  ;;  %v2425_v59 = vadd.f32 1.0, %v8819_v17 }
 0x300   : > { %v3943_v39 = vadd.f32 %v8626_v22, %v3559_v31  ;;  %v2428_v37 = vadd.f32 1.0, %v4946_v58  ;;  %v1664_v20 = vmul.f32 0.5, %v8717_v51  ;;  %v2434_v34 = vadd.f32 1.0, %v4948_v44 }
 0x301   : > { %3404 = vmatmul.mubr.bf16.gmra.mxu0 %v2871_v1  ;;  %v3561_v26 = vpop.f32.mrf.mxu1  ;;  %v2679_v55 = vmul.f32 %v2423_v52, %v1655_v2  ;;  %v2878_v47 = vpack.c.bf16 %v2682_v62, %v2678_v5  ;;  %v3274_v32 = vpop.f32.mrf.mxu0  ;;  %v2421_v60 = vadd.f32 1.0, %v8767_v38  ;;  %v1657_v36 = vmul.f32 0.5, %v9818_v35  ;;  %v9821_v1 = vld [vmem:[#allocation29_spill] sm:$0xff] }
 0x302   : > { %3411 = vmatprep.mubr.bf16.mxu0 %v2876_v23  ;;  %4007 = vst [vmem:[%s8671_s30 + $0xc0] sm:$0xff] %v3943_v39  ;;  %v3562_v63 = vadd.f32 %v3561_v26, %v3272_v25  ;;  %v4952_v48 = vpop.eup %4951  ;;  %v1660_v27 = vmul.f32 0.5, %v8728_v11  ;;  %v2688_v61 = vmul.f32 %v2432_v7, %v1664_v20  ;;  %v2675_v51 = vmul.f32 %v2419_v28, %v1651_v15 }
 0x303   : > { %v3563_v17 = vpop.f32.mrf.mxu1  ;;  %v2430_v53 = vadd.f32 1.0, %v4950_v21  ;;  %v1666_v42 = vmul.f32 0.5, %v9819_v6  ;;  %v1653_v40 = vmul.f32 0.5, %v9820_v45  ;;  %v2681_v0 = vmul.f32 %v2425_v59, %v1657_v36 }
 0x304   : > { %3693 = vmatmul.mubr.bf16.gmra.mxu1 %v2873_v16  ;;  %v3944_v13 = vadd.f32 %v8626_v22, %v3562_v63  ;;  %v4954_v8 = vpop.eup %4953  ;;  %v2684_v38 = vmul.f32 %v2428_v37, %v1660_v27  ;;  %v2875_v54 = vpack.c.bf16 %v2679_v55, %v2675_v51  ;;  %v1662_v11 = vmul.f32 0.5, %v8741_v24 }
 0x305   : > { %3700 = vmatprep.mubr.bf16.mxu1 %v2878_v47  ;;  %v4956_v14 = vpop.eup %4955  ;;  %v2431_v10 = vadd.f32 1.0, %v4952_v48  ;;  %v2690_v18 = vmul.f32 %v2434_v34, %v1666_v42  ;;  %v2677_v58 = vmul.f32 %v2421_v60, %v1653_v40  ;;  %v2427_v12 = vadd.f32 1.0, %v4954_v8 }
 0x306   : > { %4008 = vst [vmem:[%s8671_s30 + $0xc8] sm:$0xff] %v3944_v13  ;;  %v2880_v30 = vpack.c.bf16 %v2688_v61, %v2684_v38  ;;  %v2686_v57 = vmul.f32 %v2430_v53, %v1662_v11  ;;  %v1663_v50 = vmul.f32 0.5, %v8772_v41  ;;  %v2433_v4 = vadd.f32 1.0, %v4956_v14 }
 0x307   : > { %v4958_v46 = vpop.eup %4957  ;;  %v2877_v9 = vpack.c.bf16 %v2681_v0, %v2677_v58  ;;  %v1659_v52 = vmul.f32 0.5, %v9821_v1  ;;  %v1665_v29 = vmul.f32 0.5, %v8776_v19  ;;  %v1661_v23 = vmul.f32 0.5, %v8689_v49 }
 0x308   : > { %v3277_v44 = vpop.f32.mrf.mxu0  ;;  %v2687_v62 = vmul.f32 %v2431_v10, %v1663_v50  ;;  %v2882_v31 = vpack.c.bf16 %v2690_v18, %v2686_v57  ;;  %v2429_v3 = vadd.f32 1.0, %v4958_v46 }
 0x309   : > { %3412 = vmatmul.mubr.bf16.gmra.mxu0 %v2875_v54  ;;  %v3566_v24 = vpop.f32.mrf.mxu1  ;;  %v2683_v7 = vmul.f32 %v2427_v12, %v1659_v52  ;;  %v2689_v33 = vmul.f32 %v2433_v4, %v1665_v29 }
 0x30a   : > { %3419 = vmatprep.mubr.bf16.mxu0 %v2880_v30  ;;  %v3567_v56 = vadd.f32 %v3566_v24, %v3277_v44  ;;  %v3279_v15 = vpop.f32.mrf.mxu0  ;;  %v2685_v39 = vmul.f32 %v2429_v3, %v1661_v23 }
 0x30b   : > { %v3568_v41 = vpop.f32.mrf.mxu1  ;;  %v2879_v43 = vpack.c.bf16 %v2687_v62, %v2683_v7 }
 0x30c   : > { %3701 = vmatmul.mubr.bf16.gmra.mxu1 %v2877_v9  ;;  %v3945_v28 = vadd.f32 %v8626_v22, %v3567_v56  ;;  %v3280_v5 = vpop.f32.mrf.mxu0  ;;  %v2881_v16 = vpack.c.bf16 %v2689_v33, %v2685_v39 }
 0x30d   : > { %3708 = vmatprep.mubr.bf16.mxu1 %v2882_v31  ;;  %v3569_v2 = vpop.f32.mrf.mxu1 }
 0x30e   : > { %4009 = vst [vmem:[%s8671_s30 + $0xd0] sm:$0xff] %v3945_v28  ;;  %v3570_v25 = vadd.f32 %v3569_v2, %v3280_v5  ;;  %v3282_v19 = vpop.f32.mrf.mxu0 }
 0x30f   : > { %v3571_v21 = vpop.f32.mrf.mxu1 }
 0x310   : > { %v3946_v59 = vadd.f32 %v8626_v22, %v3570_v25 }
 0x311   : > { %3420 = vmatmul.mubr.bf16.gmra.mxu0 %v2879_v43 }
 0x312   : > { %4010 = vst [vmem:[%s8671_s30 + $0xd8] sm:$0xff] %v3946_v59 }
 0x314   : > { %3709 = vmatmul.mubr.bf16.gmra.mxu1 %v2881_v16 }
 0x315   : > { %v3285_v49 = vpop.f32.mrf.mxu0 }
 0x316   : > { %v3574_v37 = vpop.f32.mrf.mxu1 }
 0x317   : > { %v3575_v20 = vadd.f32 %v3574_v37, %v3285_v49  ;;  %v3287_v26 = vpop.f32.mrf.mxu0 }
 0x318   : > { %v3576_v55 = vpop.f32.mrf.mxu1 }
 0x319   : > { %v3947_v34 = vadd.f32 %v8626_v22, %v3575_v20  ;;  %v3288_v47 = vpop.f32.mrf.mxu0 }
 0x31a   : > { %v3577_v63 = vpop.f32.mrf.mxu1 }
 0x31b   : > { %4011 = vst [vmem:[%s8671_s30 + $0xe0] sm:$0xff] %v3947_v34  ;;  %v3578_v32 = vadd.f32 %v3577_v63, %v3288_v47  ;;  %v3290_v48 = vpop.f32.mrf.mxu0 }
 0x31c   : > { %v3579_v60 = vpop.f32.mrf.mxu1 }
 0x31d   : > { %v3948_v35 = vadd.f32 %v8626_v22, %v3578_v32 }
 0x31f   : > { %4012 = vst [vmem:[%s8671_s30 + $0xe8] sm:$0xff] %v3948_v35 }
 0x322   : > { %v3293_v36 = vpop.f32.mrf.mxu0 }
 0x323   : > { %v3582_v27 = vpop.f32.mrf.mxu1 }
 0x324   : > { %v3583_v61 = vadd.f32 %v3582_v27, %v3293_v36  ;;  %v3295_v17 = vpop.f32.mrf.mxu0 }
 0x325   : > { %v3584_v51 = vpop.f32.mrf.mxu1 }
 0x326   : > { %v3949_v53 = vadd.f32 %v8626_v22, %v3583_v61  ;;  %v3296_v6 = vpop.f32.mrf.mxu0 }
 0x327   : > { %v3585_v42 = vpop.f32.mrf.mxu1 }
 0x328   : > { %4013 = vst [vmem:[%s8671_s30 + $0xf0] sm:$0xff] %v3949_v53  ;;  %v3586_v13 = vadd.f32 %v3585_v42, %v3296_v6  ;;  %v3298_v8 = vpop.f32.mrf.mxu0 }
 0x329   : > { %v3587_v45 = vpop.f32.mrf.mxu1 }
 0x32a   : > { %v3950_v40 = vadd.f32 %v8626_v22, %v3586_v13 }
 0x32c   : > { %4014 = vst [vmem:[%s8671_s30 + $0xf8] sm:$0xff] %v3950_v40 }
 0x32f   : > { %v3301_v0 = vpop.f32.mrf.mxu0 }
 0x330   : > { %v3590_v38 = vpop.f32.mrf.mxu1 }
 0x331   : > { %v3591_v14 = vadd.f32 %v3590_v38, %v3301_v0  ;;  %v3303_v54 = vpop.f32.mrf.mxu0 }
 0x332   : > { %v3592_v11 = vpop.f32.mrf.mxu1 }
 0x333   : > { %v3951_v10 = vadd.f32 %v8626_v22, %v3591_v14  ;;  %v3304_v18 = vpop.f32.mrf.mxu0 }
 0x334   : > { %v3593_v58 = vpop.f32.mrf.mxu1 }
 0x335   : > { %4015 = vst [vmem:[%s8671_s30 + $0x100] sm:$0xff] %v3951_v10  ;;  %v3594_v30 = vadd.f32 %v3593_v58, %v3304_v18  ;;  %v3306_v46 = vpop.f32.mrf.mxu0 }
 0x336   : > { %v3595_v12 = vpop.f32.mrf.mxu1 }
 0x337   : > { %v3952_v57 = vadd.f32 %v8626_v22, %v3594_v30 }
 0x339   : > { %4016 = vst [vmem:[%s8671_s30 + $0x108] sm:$0xff] %v3952_v57 }
 0x33c   : > { %v3309_v50 = vpop.f32.mrf.mxu0 }
 0x33d   : > { %v3598_v9 = vpop.f32.mrf.mxu1 }
 0x33e   : > { %v3599_v4 = vadd.f32 %v3598_v9, %v3309_v50  ;;  %v3311_v44 = vpop.f32.mrf.mxu0 }
 0x33f   : > { %v3600_v1 = vpop.f32.mrf.mxu1 }
 0x340   : > { %v3953_v52 = vadd.f32 %v8626_v22, %v3599_v4  ;;  %v3312_v62 = vpop.f32.mrf.mxu0 }
 0x341   : > { %v3601_v31 = vpop.f32.mrf.mxu1 }
 0x342   : > { %4017 = vst [vmem:[%s8671_s30 + $0x110] sm:$0xff] %v3953_v52  ;;  %v3602_v24 = vadd.f32 %v3601_v31, %v3312_v62  ;;  %v3314_v3 = vpop.f32.mrf.mxu0 }
 0x343   : > { %v3603_v29 = vpop.f32.mrf.mxu1 }
 0x344   : > { %v3954_v56 = vadd.f32 %v8626_v22, %v3602_v24 }
 0x346   : > { %4018 = vst [vmem:[%s8671_s30 + $0x118] sm:$0xff] %v3954_v56 }
 0x349   : > { %v3317_v15 = vpop.f32.mrf.mxu0 }
 0x34a   : > { %v3606_v7 = vpop.f32.mrf.mxu1 }
 0x34b   : > { %v3607_v41 = vadd.f32 %v3606_v7, %v3317_v15  ;;  %v3319_v23 = vpop.f32.mrf.mxu0 }
 0x34c   : > { %v3608_v33 = vpop.f32.mrf.mxu1 }
 0x34d   : > { %v3955_v28 = vadd.f32 %v8626_v22, %v3607_v41  ;;  %v3320_v5 = vpop.f32.mrf.mxu0 }
 0x34e   : > { %v3609_v43 = vpop.f32.mrf.mxu1 }
 0x34f   : > { %4019 = vst [vmem:[%s8671_s30 + $0x120] sm:$0xff] %v3955_v28  ;;  %v3610_v2 = vadd.f32 %v3609_v43, %v3320_v5  ;;  %v3322_v39 = vpop.f32.mrf.mxu0 }
 0x350   : > { %v3611_v25 = vpop.f32.mrf.mxu1 }
 0x351   : > { %v3956_v19 = vadd.f32 %v8626_v22, %v3610_v2 }
 0x353   : > { %4020 = vst [vmem:[%s8671_s30 + $0x128] sm:$0xff] %v3956_v19 }
 0x356   : > { %v3325_v21 = vpop.f32.mrf.mxu0 }
 0x357   : > { %v3614_v16 = vpop.f32.mrf.mxu1 }
 0x358   : > { %v3615_v59 = vadd.f32 %v3614_v16, %v3325_v21  ;;  %v3327_v49 = vpop.f32.mrf.mxu0 }
 0x359   : > { %v3616_v37 = vpop.f32.mrf.mxu1 }
 0x35a   : > { %v3957_v20 = vadd.f32 %v8626_v22, %v3615_v59  ;;  %v3328_v26 = vpop.f32.mrf.mxu0 }
 0x35b   : > { %v3617_v55 = vpop.f32.mrf.mxu1 }
 0x35c   : > { %4021 = vst [vmem:[%s8671_s30 + $0x130] sm:$0xff] %v3957_v20  ;;  %v3618_v34 = vadd.f32 %v3617_v55, %v3328_v26  ;;  %v3330_v47 = vpop.f32.mrf.mxu0 }
 0x35d   : > { %v3619_v63 = vpop.f32.mrf.mxu1 }
 0x35e   : > { %v3958_v32 = vadd.f32 %v8626_v22, %v3618_v34 }
 0x360   : > { %4022 = vst [vmem:[%s8671_s30 + $0x138] sm:$0xff] %v3958_v32 }
 0x363   : > { %v3333_v48 = vpop.f32.mrf.mxu0 }
 0x364   : > { %v3622_v60 = vpop.f32.mrf.mxu1 }
 0x365   : > { %v3623_v35 = vadd.f32 %v3622_v60, %v3333_v48  ;;  %v3335_v36 = vpop.f32.mrf.mxu0 }
 0x366   : > { %v3624_v27 = vpop.f32.mrf.mxu1 }
 0x367   : > { %v3959_v61 = vadd.f32 %v8626_v22, %v3623_v35  ;;  %v3336_v17 = vpop.f32.mrf.mxu0 }
 0x368   : > { %v3625_v51 = vpop.f32.mrf.mxu1 }
 0x369   : > { %4023 = vst [vmem:[%s8671_s30 + $0x140] sm:$0xff] %v3959_v61  ;;  %v3626_v53 = vadd.f32 %v3625_v51, %v3336_v17  ;;  %v3338_v6 = vpop.f32.mrf.mxu0 }
 0x36a   : > { %v3627_v42 = vpop.f32.mrf.mxu1 }
 0x36b   : > { %v3960_v13 = vadd.f32 %v8626_v22, %v3626_v53 }
 0x36d   : > { %4024 = vst [vmem:[%s8671_s30 + $0x148] sm:$0xff] %v3960_v13 }
 0x370   : > { %v3341_v8 = vpop.f32.mrf.mxu0 }
 0x371   : > { %v3630_v45 = vpop.f32.mrf.mxu1 }
 0x372   : > { %v3631_v40 = vadd.f32 %v3630_v45, %v3341_v8  ;;  %v3343_v0 = vpop.f32.mrf.mxu0 }
 0x373   : > { %v3632_v38 = vpop.f32.mrf.mxu1 }
 0x374   : > { %v3961_v14 = vadd.f32 %v8626_v22, %v3631_v40  ;;  %v3344_v54 = vpop.f32.mrf.mxu0 }
 0x375   : > { %v3633_v11 = vpop.f32.mrf.mxu1 }
 0x376   : > { %4025 = vst [vmem:[%s8671_s30 + $0x150] sm:$0xff] %v3961_v14  ;;  %v3634_v10 = vadd.f32 %v3633_v11, %v3344_v54  ;;  %v3346_v18 = vpop.f32.mrf.mxu0 }
 0x377   : > { %v3635_v58 = vpop.f32.mrf.mxu1 }
 0x378   : > { %v3962_v30 = vadd.f32 %v8626_v22, %v3634_v10 }
 0x37a   : > { %4026 = vst [vmem:[%s8671_s30 + $0x158] sm:$0xff] %v3962_v30 }
 0x37d   : > { %v3349_v46 = vpop.f32.mrf.mxu0 }
 0x37f   : > { %v3351_v50 = vpop.f32.mrf.mxu0 }
 0x380   : > { %v3638_v12 = vpop.f32.mrf.mxu1 }
 0x381   : > { %v3639_v57 = vadd.f32 %v3638_v12, %v3349_v46  ;;  %v3352_v44 = vpop.f32.mrf.mxu0 }
 0x382   : > { %v3640_v9 = vpop.f32.mrf.mxu1 }
 0x383   : > { %v3963_v4 = vadd.f32 %v8626_v22, %v3639_v57  ;;  %v3354_v62 = vpop.f32.mrf.mxu0 }
 0x384   : > { %v3641_v1 = vpop.f32.mrf.mxu1 }
 0x385   : > { %4027 = vst [vmem:[%s8671_s30 + $0x160] sm:$0xff] %v3963_v4  ;;  %v3642_v52 = vadd.f32 %v3641_v1, %v3352_v44 }
 0x386   : > { %v3643_v31 = vpop.f32.mrf.mxu1 }
 0x387   : > { %v3964_v24 = vadd.f32 %v8626_v22, %v3642_v52 }
 0x389   : > { %4028 = vst [vmem:[%s8671_s30 + $0x168] sm:$0xff] %v3964_v24 }
 0x38a   : > { %v3357_v3 = vpop.f32.mrf.mxu0 }
 0x38c   : > { %v3646_v29 = vpop.f32.mrf.mxu1  ;;  %v3359_v15 = vpop.f32.mrf.mxu0 }
 0x38d   : > { %v3647_v56 = vadd.f32 %v3646_v29, %v3357_v3 }
 0x38e   : > { %v3648_v7 = vpop.f32.mrf.mxu1  ;;  %v3360_v23 = vpop.f32.mrf.mxu0 }
 0x38f   : > { %v3965_v41 = vadd.f32 %v8626_v22, %v3647_v56 }
 0x390   : > { %v3649_v33 = vpop.f32.mrf.mxu1  ;;  %v3362_v5 = vpop.f32.mrf.mxu0 }
 0x391   : > { %4029 = vst [vmem:[%s8671_s30 + $0x170] sm:$0xff] %v3965_v41  ;;  %v3650_v28 = vadd.f32 %v3649_v33, %v3360_v23 }
 0x392   : > { %v3651_v43 = vpop.f32.mrf.mxu1 }
 0x393   : > { %v3966_v2 = vadd.f32 %v8626_v22, %v3650_v28 }
 0x395   : > { %4030 = vst [vmem:[%s8671_s30 + $0x178] sm:$0xff] %v3966_v2 }
 0x397   : > { %v3365_v39 = vpop.f32.mrf.mxu0 }
 0x399   : > { %v3654_v25 = vpop.f32.mrf.mxu1  ;;  %v3367_v21 = vpop.f32.mrf.mxu0 }
 0x39a   : > { %v3655_v19 = vadd.f32 %v3654_v25, %v3365_v39  ;;  %v4959_v21 = vld [vmem:[%s9033_s4] ss:$0 sm:$0xff] }
 0x39b   : > { %v3656_v16 = vpop.f32.mrf.mxu1  ;;  %v3368_v49 = vpop.f32.mrf.mxu0 }
 0x39c   : > { %v3967_v59 = vadd.f32 %v8626_v22, %v3655_v19 }
 0x39d   : > { %v3657_v37 = vpop.f32.mrf.mxu1  ;;  %v3370_v26 = vpop.f32.mrf.mxu0 }
 0x39e   : > { %4031 = vst [vmem:[%s8671_s30 + $0x180] sm:$0xff] %v3967_v59  ;;  %v3658_v20 = vadd.f32 %v3657_v37, %v3368_v49 }
 0x39f   : > { %v3659_v55 = vpop.f32.mrf.mxu1 }
 0x3a0   : > { %v3968_v34 = vadd.f32 %v8626_v22, %v3658_v20  ;;  %v3373_v47 = vpop.f32.mrf.mxu0 }
 0x3a2   : > { %4032 = vst [vmem:[%s8671_s30 + $0x188] sm:$0xff] %v3968_v34  ;;  %v3375_v63 = vpop.f32.mrf.mxu0  ;;  %v3662_v32 = vpop.f32.mrf.mxu1 }
 0x3a3   : > { %v3663_v48 = vadd.f32 %v3662_v32, %v3373_v47 }
 0x3a4   : > { %v3376_v60 = vpop.f32.mrf.mxu0  ;;  %v3664_v35 = vpop.f32.mrf.mxu1 }
 0x3a5   : > { %v3969_v36 = vadd.f32 %v8626_v22, %v3663_v48 }
 0x3a6   : > { %v3378_v27 = vpop.f32.mrf.mxu0  ;;  %v3665_v61 = vpop.f32.mrf.mxu1 }
 0x3a7   : > { %4033 = vst [vmem:[%s8671_s30 + $0x190] sm:$0xff] %v3969_v36  ;;  %v3666_v17 = vadd.f32 %v3665_v61, %v3376_v60 }
 0x3a8   : > { %v3381_v51 = vpop.f32.mrf.mxu0  ;;  %v3667_v53 = vpop.f32.mrf.mxu1 }
 0x3a9   : > { %v3970_v6 = vadd.f32 %v8626_v22, %v3666_v17 }
 0x3aa   : > { %v3383_v42 = vpop.f32.mrf.mxu0 }
 0x3ab   : > { %v3670_v13 = vpop.f32.mrf.mxu1  ;;  %4034 = vst [vmem:[%s8671_s30 + $0x198] sm:$0xff] %v3970_v6 }
 0x3ac   : > { %v3671_v8 = vadd.f32 %v3670_v13, %v3381_v51  ;;  %v3384_v45 = vpop.f32.mrf.mxu0 }
 0x3ad   : > { %v3672_v40 = vpop.f32.mrf.mxu1 }
 0x3ae   : > { %v3971_v0 = vadd.f32 %v8626_v22, %v3671_v8  ;;  %v3386_v38 = vpop.f32.mrf.mxu0 }
 0x3af   : > { %v3673_v14 = vpop.f32.mrf.mxu1 }
 0x3b0   : > { %4035 = vst [vmem:[%s8671_s30 + $0x1a0] sm:$0xff] %v3971_v0  ;;  %v3674_v54 = vadd.f32 %v3673_v14, %v3384_v45  ;;  %v3389_v11 = vpop.f32.mrf.mxu0 }
 0x3b1   : > { %v3675_v10 = vpop.f32.mrf.mxu1 }
 0x3b2   : > { %v3972_v18 = vadd.f32 %v8626_v22, %v3674_v54  ;;  %v3391_v58 = vpop.f32.mrf.mxu0 }
 0x3b4   : > { %v3678_v30 = vpop.f32.mrf.mxu1  ;;  %4036 = vst [vmem:[%s8671_s30 + $0x1a8] sm:$0xff] %v3972_v18  ;;  %v3392_v12 = vpop.f32.mrf.mxu0 }
 0x3b5   : > { %v3679_v46 = vadd.f32 %v3678_v30, %v3389_v11 }
 0x3b6   : > { %v3680_v57 = vpop.f32.mrf.mxu1  ;;  %v3394_v9 = vpop.f32.mrf.mxu0 }
 0x3b7   : > { %v3973_v50 = vadd.f32 %v8626_v22, %v3679_v46 }
 0x3b8   : > { %v3681_v4 = vpop.f32.mrf.mxu1 }
 0x3b9   : > { %4037 = vst [vmem:[%s8671_s30 + $0x1b0] sm:$0xff] %v3973_v50  ;;  %v3682_v44 = vadd.f32 %v3681_v4, %v3392_v12  ;;  %v3397_v1 = vpop.f32.mrf.mxu0 }
 0x3ba   : > { %v3683_v52 = vpop.f32.mrf.mxu1 }
 0x3bb   : > { %v3974_v62 = vadd.f32 %v8626_v22, %v3682_v44  ;;  %v3399_v31 = vpop.f32.mrf.mxu0 }
 0x3bc   : > { %v3686_v24 = vpop.f32.mrf.mxu1 }
 0x3bd   : > { %4038 = vst [vmem:[%s8671_s30 + $0x1b8] sm:$0xff] %v3974_v62  ;;  %v3687_v3 = vadd.f32 %v3686_v24, %v3397_v1  ;;  %v3400_v29 = vpop.f32.mrf.mxu0 }
 0x3be   : > { %v3688_v56 = vpop.f32.mrf.mxu1 }
 0x3bf   : > { %v3975_v15 = vadd.f32 %v8626_v22, %v3687_v3  ;;  %v3402_v7 = vpop.f32.mrf.mxu0 }
 0x3c0   : > { %v3689_v41 = vpop.f32.mrf.mxu1 }
 0x3c1   : > { %4039 = vst [vmem:[%s8671_s30 + $0x1c0] sm:$0xff] %v3975_v15  ;;  %v3690_v23 = vadd.f32 %v3689_v41, %v3400_v29  ;;  %v3405_v33 = vpop.f32.mrf.mxu0 }
 0x3c2   : > { %v3691_v28 = vpop.f32.mrf.mxu1 }
 0x3c3   : > { %v3976_v5 = vadd.f32 %v8626_v22, %v3690_v23  ;;  %v3407_v43 = vpop.f32.mrf.mxu0 }
 0x3c4   : > { %v3694_v2 = vpop.f32.mrf.mxu1 }
 0x3c5   : > { %4040 = vst [vmem:[%s8671_s30 + $0x1c8] sm:$0xff] %v3976_v5  ;;  %v3695_v39 = vadd.f32 %v3694_v2, %v3405_v33  ;;  %v3408_v25 = vpop.f32.mrf.mxu0 }
 0x3c6   : > { %v3696_v19 = vpop.f32.mrf.mxu1 }
 0x3c7   : > { %v3977_v16 = vadd.f32 %v4959_v21, %v3695_v39  ;;  %v3410_v59 = vpop.f32.mrf.mxu0 }
 0x3c8   : > { %v3697_v49 = vpop.f32.mrf.mxu1 }
 0x3c9   : > { %4041 = vst [vmem:[%s8671_s30 + $0x1d0] sm:$0xff] %v3977_v16  ;;  %v3698_v37 = vadd.f32 %v3697_v49, %v3408_v25  ;;  %v3413_v20 = vpop.f32.mrf.mxu0 }
 0x3ca   : > { %v3699_v26 = vpop.f32.mrf.mxu1 }
 0x3cb   : > { %v3978_v22 = vadd.f32 %v4959_v21, %v3698_v37  ;;  %v3415_v55 = vpop.f32.mrf.mxu0 }
 0x3cc   : > { %v3702_v34 = vpop.f32.mrf.mxu1 }
 0x3cd   : > { %4042 = vst [vmem:[%s8671_s30 + $0x1d8] sm:$0xff] %v3978_v22  ;;  %v3703_v47 = vadd.f32 %v3702_v34, %v3413_v20  ;;  %v3416_v63 = vpop.f32.mrf.mxu0 }
 0x3ce   : > { %v3704_v32 = vpop.f32.mrf.mxu1 }
 0x3cf   : > { %v3979_v48 = vadd.f32 %v4959_v21, %v3703_v47  ;;  %v3418_v60 = vpop.f32.mrf.mxu0 }
 0x3d0   : > { %v3705_v35 = vpop.f32.mrf.mxu1 }
 0x3d1   : > { %4043 = vst [vmem:[%s8671_s30 + $0x1e0] sm:$0xff] %v3979_v48  ;;  %v3706_v36 = vadd.f32 %v3705_v35, %v3416_v63  ;;  %v3421_v27 = vpop.f32.mrf.mxu0 }
 0x3d2   : > { %v3707_v61 = vpop.f32.mrf.mxu1 }
 0x3d3   : > { %v3980_v17 = vadd.f32 %v4959_v21, %v3706_v36  ;;  %v3423_v51 = vpop.f32.mrf.mxu0 }
 0x3d4   : > { %v3710_v53 = vpop.f32.mrf.mxu1 }
 0x3d5   : > { %4044 = vst [vmem:[%s8671_s30 + $0x1e8] sm:$0xff] %v3980_v17  ;;  %v3711_v6 = vadd.f32 %v3710_v53, %v3421_v27  ;;  %v3424_v42 = vpop.f32.mrf.mxu0 }
 0x3d6   : > { %v3712_v13 = vpop.f32.mrf.mxu1 }
 0x3d7   : > { %v3981_v8 = vadd.f32 %v4959_v21, %v3711_v6  ;;  %v3426_v45 = vpop.f32.mrf.mxu0 }
 0x3d8   : > { %v3713_v40 = vpop.f32.mrf.mxu1 }
 0x3d9   : > { %4045 = vst [vmem:[%s8671_s30 + $0x1f0] sm:$0xff] %v3981_v8  ;;  %v3714_v0 = vadd.f32 %v3713_v40, %v3424_v42 }
 0x3da   : > { %v3715_v38 = vpop.f32.mrf.mxu1 }
 0x3db   : > { %v3982_v14 = vadd.f32 %v4959_v21, %v3714_v0 }
 0x3dd   : > { %4046 = vst [vmem:[%s8671_s30 + $0x1f8] sm:$0xff] %v3982_v14 }
 0x3de   : > { %5079 = shalt.err (!%p5076_p13)
}
 0x3df   : > { %s5080_s9 = scalar_lea.hbm %s8978_s24, 8192  ;;  %s5084_s30 = scalar_lea.hbm %s9034_s5, 16384 }
 0x3e0   : > { %p5081_p1 = scmp.ne.s32.totalorder %s8978_s24, %s5080_s9  ;;  %p5085_p12 = scmp.lt.s32.totalorder %s8978_s24, %s9034_s5 }
 0x3e1   : > { %p5086_p5 = scmp.lt.s32.totalorder %s5084_s30, %s5080_s9 }
 0x3e2   : > { %p5082_p4 = pnand %p5081_p1, %p5300_p0 }
 0x3e3   : > { %p5087_p3 = por %p5086_p5, %p5085_p12 }
 0x3e4   : > { %p5083_p8 = pneg %p5082_p4 }
 0x3e6   : > { %p5088_p10 = pnand %p5087_p3, %p5083_p8 }
 0x3e8   : > { %5091 = shalt.err (!%p5088_p10)
}
 0x3e9   : > { %s5168_s11 = smov 128   ;;  %s5169_s17 = smov 8  }
 0x3ea   : > { %4279 = dma.vmem_to_hbm [thread:$0]  (%p5300_p0), %s8980_s13, 8192, %s8978_s24, %s4048_s12, %s5168_s11, %s5168_s11, %s5169_s17  }
 0x3eb PF: > { %s4076_s14 = sand.u32 1, %s5134_s18   ;;  %p9822_p2 = scmp.ne.s32.totalorder %s9107_s29, 0 }
 0x3ec   : > { %p9823_p11 = scmp.ge.s32.totalorder %s5154_s23, 2  ;;  %s4077_s6 = scalar_lea.sflag [#allocation5], %s4076_s14 }
 0x3ee   : > { %p4296_p7 = pnand %p9823_p11, %p9822_p2 }
 0x3f0   : > { %p4297_p6 = pneg %p4296_p7 }
 0x3f2   : > { %5129 = dma.done.wait (%p4297_p6), %s4077_s6, 8192  }
 0x3f3   : > { %5131 = vsyncadd (%p4297_p6), %s4077_s6, 4294959104  ;;  %s23_s23 = sadd.s32 1, %s5154_s23   ;;  %s9824_s18 = smov %s5138_s19 }
 0x3f4   : > { %p20_p9 = scmp.ge.s32.totalorder %s23_s23, 4   ;;  %s9825_s19 = smov %s5142_s20 }
 0x3f5   : > { %s9826_s20 = smov %s5312_s25  ;;  %s9827_s21 = smov %s5150_s22 }
 0x3f6   : > { %s9828_s22 = smov %s9830_s15  ;;  %22 = sbr.rel (!%p20_p9) target bundleno = 10 (0xa), region = 108 }
 0x3fb   :  { %4082 = vsyncpa [#allocation4], 1 }
 0x3fc   :  { %4084 = vsyncpa [#allocation4 + $0x1], 1 }
 0x3fd   :  { %4085 = vsyncpa [#allocation7], 1 }
 0x3fe   :  { %4086 = vsyncpa [#allocation10], 1 }
 0x3ff   :  { %4087 = vsyncpa [#allocation5], 1 }
 0x400   :  { %4089 = vsyncpa [#allocation5 + $0x1], 1 }

</bundles_post_ra>
